<compile_context>
chip_gen: v7x
topology: tpu7x:2x2x1
jax: 0.10.0
libtpu: 0.0.40
codegen_flags: <defaults>
</compile_context>

<pallas_src>
import numpy as np
import jax
import jax.numpy as jnp
from jax.experimental import pallas as pl
from jax.experimental.pallas import tpu as pltpu


MODALITIES = ('clinical', 'mRNA', 'miRNA', 'CNV')


# -----------------------------------------------------------------------------
# Fused kernel: whole forward pass in one invocation, everything in VMEM.
# -----------------------------------------------------------------------------
def _fused_net_kernel(
    # modality inputs
    xc_ref, xm_ref, xmi_ref, xcv_ref,
    # clinical: pre-BN (folded) + Linear
    c_bn_s_ref, c_bn_h_ref, c_w_ref, c_b_ref,
    # mRNA: Linear + BN + relu
    m_w_ref, m_b_ref, m_s_ref, m_h_ref,
    # miRNA: 2 x (Linear + BN + relu)
    mi_w1_ref, mi_b1_ref, mi_s1_ref, mi_h1_ref,
    mi_w2_ref, mi_b2_ref, mi_s2_ref, mi_h2_ref,
    # CNV: 4 x (Linear + BN + relu)
    cv_w1_ref, cv_b1_ref, cv_s1_ref, cv_h1_ref,
    cv_w2_ref, cv_b2_ref, cv_s2_ref, cv_h2_ref,
    cv_w3_ref, cv_b3_ref, cv_s3_ref, cv_h3_ref,
    cv_w4_ref, cv_b4_ref, cv_s4_ref, cv_h4_ref,
    # attention weights (pre-transposed: rep @ aw == Linear_nobias(rep))
    aw_c_ref, aw_m_ref, aw_mi_ref, aw_cv_ref,
    # heads: label weights (for logsumexp) + packed lane-padded (L, 8) head slab
    lb_w_ref, lb_b_ref, head_w_ref, head_b_ref,
    # outputs
    rep_c_ref, rep_m_ref, rep_mi_ref, rep_cv_ref, fused_ref, head_ref,
):
    f32 = jnp.float32

    def dense(x, w_ref, b_ref, s_ref=None, h_ref=None, relu=False):
        # MXU matmul in the weight dtype (bf16 for the big layers), f32 accumulate.
        y = jnp.dot(x.astype(w_ref.dtype), w_ref[...], preferred_element_type=f32)
        y = y + b_ref[...]
        if s_ref is not None:                      # folded eval-mode BatchNorm
            y = y * s_ref[...] + h_ref[...]
        if relu:
            y = jnp.maximum(y, 0.0)
        return y

    # ---------------- per-modality sub-networks ----------------
    xc = xc_ref[...].astype(f32) * c_bn_s_ref[...] + c_bn_h_ref[...]     # BN first
    rep_c = dense(xc, c_w_ref, c_b_ref)                                  # clinical

    rep_m = dense(xm_ref[...].astype(f32), m_w_ref, m_b_ref,
                  m_s_ref, m_h_ref, relu=True)                           # mRNA

    h = dense(xmi_ref[...].astype(f32), mi_w1_ref, mi_b1_ref,
              mi_s1_ref, mi_h1_ref, relu=True)
    rep_mi = dense(h, mi_w2_ref, mi_b2_ref, mi_s2_ref, mi_h2_ref, relu=True)   # miRNA

    h = dense(xcv_ref[...].astype(f32), cv_w1_ref, cv_b1_ref,
              cv_s1_ref, cv_h1_ref, relu=True)
    h = dense(h, cv_w2_ref, cv_b2_ref, cv_s2_ref, cv_h2_ref, relu=True)
    h = dense(h, cv_w3_ref, cv_b3_ref, cv_s3_ref, cv_h3_ref, relu=True)
    rep_cv = dense(h, cv_w4_ref, cv_b4_ref, cv_s4_ref, cv_h4_ref, relu=True)   # CNV

    rep_c_ref[...] = rep_c
    rep_m_ref[...] = rep_m
    rep_mi_ref[...] = rep_mi
    rep_cv_ref[...] = rep_cv

    # ---------------- Attention fusion (softmax over modality axis) ----------------
    a_c = jnp.tanh(jnp.dot(rep_c, aw_c_ref[...], preferred_element_type=f32))
    a_m = jnp.tanh(jnp.dot(rep_m, aw_m_ref[...], preferred_element_type=f32))
    a_mi = jnp.tanh(jnp.dot(rep_mi, aw_mi_ref[...], preferred_element_type=f32))
    a_cv = jnp.tanh(jnp.dot(rep_cv, aw_cv_ref[...], preferred_element_type=f32))

    mx = jnp.maximum(jnp.maximum(a_c, a_m), jnp.maximum(a_mi, a_cv))
    e_c = jnp.exp(a_c - mx)
    e_m = jnp.exp(a_m - mx)
    e_mi = jnp.exp(a_mi - mx)
    e_cv = jnp.exp(a_cv - mx)
    denom = e_c + e_m + e_mi + e_cv
    fused = (rep_c * e_c + rep_m * e_m + rep_mi * e_mi + rep_cv * e_cv) / denom

    # _scale_for_missing_modalities: count modalities whose feature-sum is exactly 0
    zc = (jnp.sum(rep_c, axis=1, keepdims=True) == 0.0).astype(f32)
    zm = (jnp.sum(rep_m, axis=1, keepdims=True) == 0.0).astype(f32)
    zmi = (jnp.sum(rep_mi, axis=1, keepdims=True) == 0.0).astype(f32)
    zcv = (jnp.sum(rep_cv, axis=1, keepdims=True) == 0.0).astype(f32)
    zero_cnt = zc + zm + zmi + zcv
    scaler = jnp.where(zero_cnt > 0.0, zero_cnt + 1.0, 1.0)
    fused = fused * scaler
    fused_ref[...] = fused

    # ---------------- heads: one lane-padded (B, 8) output slab ----------------
    # col 0 = hazard, cols 1:3 = log-softmax(label logits), cols 3:8 = 0
    logits = jnp.dot(fused, lb_w_ref[...], preferred_element_type=f32) + lb_b_ref[...]
    lmax = jnp.max(logits, axis=1, keepdims=True)
    lse = lmax + jnp.log(jnp.sum(jnp.exp(logits - lmax), axis=1, keepdims=True))  # (B,1)

    hraw = jnp.dot(fused, head_w_ref[...], preferred_element_type=f32) + head_b_ref[...]
    col = jax.lax.broadcasted_iota(jnp.int32, hraw.shape, 1)
    score_cols = jnp.logical_and(col >= 1, col <= 2).astype(f32)       # (B, 8) mask
    head_ref[...] = hraw - lse * score_cols                            # single dense store


# -----------------------------------------------------------------------------
# Wrapper: one pallas_call, no grid, everything whole-array in VMEM.
# -----------------------------------------------------------------------------
def _vmem():
    return pl.BlockSpec(memory_space=pltpu.MemorySpace.VMEM)


def net_forward_fused(x, params):
    B = x['clinical'].shape[0]
    L = params['m_length']

    pc, pm, pmi, pcv = params['clinical'], params['mRNA'], params['miRNA'], params['CNV']
    inputs = (
        x['clinical'], x['mRNA'], x['miRNA'], x['CNV'],
        pc['bn_scale'], pc['bn_shift'], pc['w'], pc['b'],
        pm['w'], pm['b'], pm['s'], pm['h'],
        pmi['w1'], pmi['b1'], pmi['s1'], pmi['h1'],
        pmi['w2'], pmi['b2'], pmi['s2'], pmi['h2'],
        pcv['w1'], pcv['b1'], pcv['s1'], pcv['h1'],
        pcv['w2'], pcv['b2'], pcv['s2'], pcv['h2'],
        pcv['w3'], pcv['b3'], pcv['s3'], pcv['h3'],
        pcv['w4'], pcv['b4'], pcv['s4'], pcv['h4'],
        params['attn']['clinical'], params['attn']['mRNA'],
        params['attn']['miRNA'], params['attn']['CNV'],
        params['label_w'], params['label_b'], params['head_w'], params['head_b'],
    )

    out_shape = (
        jax.ShapeDtypeStruct((B, L), jnp.float32),   # rep clinical
        jax.ShapeDtypeStruct((B, L), jnp.float32),   # rep mRNA
        jax.ShapeDtypeStruct((B, L), jnp.float32),   # rep miRNA
        jax.ShapeDtypeStruct((B, L), jnp.float32),   # rep CNV
        jax.ShapeDtypeStruct((B, L), jnp.float32),   # fused attention output
        jax.ShapeDtypeStruct((B, 8), jnp.float32),   # [hazard | log_softmax(score) | pad]
    )

    outs = pl.pallas_call(
        _fused_net_kernel,
        out_shape=out_shape,
        in_specs=[_vmem() for _ in inputs],
        out_specs=tuple(_vmem() for _ in out_shape),
    )(*inputs)

    rep = dict(zip(MODALITIES, outs[:4]))
    fused = outs[4]
    head = outs[5]
    return {'hazard': head[:, 0:1], 'score': head[:, 1:3], 'fused': fused}, rep


# -----------------------------------------------------------------------------
# Deterministic parameter init (pre-transposed weights, folded eval-mode BN)
# -----------------------------------------------------------------------------
class _KeyGen:
    def __init__(self, key):
        self._key = key

    def __call__(self):
        self._key, k = jax.random.split(self._key)
        return k


def init_params(key, m_length, dims, weight_dtype=jnp.bfloat16):
    kg = _KeyGen(key)

    def lin(din, dout, dtype):
        bound = 1.0 / np.sqrt(din)
        w = jax.random.uniform(kg(), (dout, din), jnp.float32, -bound, bound)
        b = jax.random.uniform(kg(), (dout,), jnp.float32, -bound, bound)
        # Pre-transpose to (Din, Dout): the kernel runs a plain `x @ w` contraction.
        return jnp.asarray(w.T, dtype), b.reshape(1, dout)

    def bn(d, eps=1e-5):
        gamma = 1.0 + 0.1 * jax.random.normal(kg(), (d,), jnp.float32)
        beta = 0.1 * jax.random.normal(kg(), (d,), jnp.float32)
        rmean = 0.1 * jax.random.normal(kg(), (d,), jnp.float32)
        rvar = jnp.abs(1.0 + 0.1 * jax.random.normal(kg(), (d,), jnp.float32))
        scale = gamma / jnp.sqrt(rvar + eps)
        shift = beta - rmean * scale
        return scale.reshape(1, d), shift.reshape(1, d)

    p = {'m_length': m_length}

    wc, bc = lin(dims['clinical'], m_length, weight_dtype)
    sc, hc = bn(dims['clinical'])
    p['clinical'] = dict(w=wc, b=bc, bn_scale=sc, bn_shift=hc)

    wm, bm = lin(dims['mRNA'], m_length, weight_dtype)
    sm, hm = bn(m_length)
    p['mRNA'] = dict(w=wm, b=bm, s=sm, h=hm)

    w1, b1 = lin(dims['miRNA'], 400, weight_dtype); s1, h1 = bn(400)
    w2, b2 = lin(400, m_length, weight_dtype); s2, h2 = bn(m_length)
    p['miRNA'] = dict(w1=w1, b1=b1, s1=s1, h1=h1, w2=w2, b2=b2, s2=s2, h2=h2)

    c1w, c1b = lin(dims['CNV'], 1300, weight_dtype); c1s, c1h = bn(1300)
    c2w, c2b = lin(1300, 700, weight_dtype); c2s, c2h = bn(700)
    c3w, c3b = lin(700, 300, weight_dtype); c3s, c3h = bn(300)
    c4w, c4b = lin(300, m_length, weight_dtype); c4s, c4h = bn(m_length)
    p['CNV'] = dict(w1=c1w, b1=c1b, s1=c1s, h1=c1h, w2=c2w, b2=c2b, s2=c2s, h2=c2h,
                    w3=c3w, b3=c3b, s3=c3s, h3=c3h, w4=c4w, b4=c4b, s4=c4s, h4=c4h)

    # Attention: per-modality Linear(L, L, bias=False); tiny -> keep f32.
    bound = 1.0 / np.sqrt(m_length)
    p['attn'] = {
        m: jax.random.uniform(kg(), (m_length, m_length), jnp.float32, -bound, bound).T
        for m in MODALITIES
    }

    # Heads: hazard (L->1) and label (L->2), packed into one lane-padded (L, 8) slab.
    hw, hb = lin(m_length, 1, jnp.float32)       # (L,1), (1,1)
    lw, lb = lin(m_length, 2, jnp.float32)       # (L,2), (1,2)
    p['label_w'] = lw
    p['label_b'] = lb
    p['head_w'] = jnp.concatenate([hw, lw, jnp.zeros((m_length, 5), jnp.float32)], axis=1)
    p['head_b'] = jnp.concatenate([hb, lb, jnp.zeros((1, 5), jnp.float32)], axis=1)
    return p


# -----------------------------------------------------------------------------
# Pure-JAX reference (f32 math on the same stored weights) for verification
# -----------------------------------------------------------------------------
def ref_forward(x, params):
    f32 = jnp.float32

    def dense(x_, w, b, s=None, h=None, relu=False):
        y = x_ @ w.astype(f32) + b
        if s is not None:
            y = y * s + h
        return jnp.maximum(y, 0.0) if relu else y

    pc = params['clinical']
    rep_c = dense(x['clinical'] * pc['bn_scale'] + pc['bn_shift'], pc['w'], pc['b'])
    pm = params['mRNA']
    rep_m = dense(x['mRNA'], pm['w'], pm['b'], pm['s'], pm['h'], relu=True)
    pmi = params['miRNA']
    h = dense(x['miRNA'], pmi['w1'], pmi['b1'], pmi['s1'], pmi['h1'], relu=True)
    rep_mi = dense(h, pmi['w2'], pmi['b2'], pmi['s2'], pmi['h2'], relu=True)
    pcv = params['CNV']
    h = dense(x['CNV'], pcv['w1'], pcv['b1'], pcv['s1'], pcv['h1'], relu=True)
    h = dense(h, pcv['w2'], pcv['b2'], pcv['s2'], pcv['h2'], relu=True)
    h = dense(h, pcv['w3'], pcv['b3'], pcv['s3'], pcv['h3'], relu=True)
    rep_cv = dense(h, pcv['w4'], pcv['b4'], pcv['s4'], pcv['h4'], relu=True)

    reps = {'clinical': rep_c, 'mRNA': rep_m, 'miRNA': rep_mi, 'CNV': rep_cv}
    feats = jnp.stack([reps[m] for m in MODALITIES], axis=0)
    aw = jnp.stack([jnp.tanh(reps[m] @ params['attn'][m]) for m in MODALITIES], axis=0)
    smx = jax.nn.softmax(aw, axis=0)
    fused = jnp.sum(feats * smx, axis=0)
    zero_cnt = jnp.sum((jnp.sum(feats, axis=2) == 0.0).astype(f32), axis=0)
    scaler = jnp.where(zero_cnt > 0.0, zero_cnt + 1.0, 1.0)
    fused = fused * scaler[:, None]

    head = fused @ params['head_w'] + params['head_b']
    hazard = head[:, 0:1]
    score = jax.nn.log_softmax(head[:, 1:3], axis=1)
    return {'hazard': hazard, 'score': score, 'fused': fused}, reps


# -----------------------------------------------------------------------------
# Main
# -----------------------------------------------------------------------------
if __name__ == "__main__":
    m_length = 32
    batch = 8
    dims = {'clinical': 4, 'mRNA': 64, 'miRNA': 48, 'CNV': 56}

    key = jax.random.PRNGKey(0)
    k_param, k_clin, k_mrna, k_mirna, k_cnv = jax.random.split(key, 5)

    params = init_params(k_param, m_length, dims, weight_dtype=jnp.bfloat16)
    x = {
        'clinical': jax.random.normal(k_clin, (batch, dims['clinical']), jnp.float32),
        'mRNA': jax.random.normal(k_mrna, (batch, dims['mRNA']), jnp.float32),
        'miRNA': jax.random.normal(k_mirna, (batch, dims['miRNA']), jnp.float32),
        'CNV': jax.random.normal(k_cnv, (batch, dims['CNV']), jnp.float32),
    }

    out, rep = net_forward_fused(x, params)
    jax.block_until_ready(out['hazard'])
    jax.block_until_ready(out['score'])

    # Verify against the pure-JAX reference.
    ref_out, ref_rep = ref_forward(x, params)
    np.testing.assert_allclose(np.asarray(out['hazard']), np.asarray(ref_out['hazard']),
                               rtol=5e-2, atol=5e-2)
    np.testing.assert_allclose(np.asarray(out['score']), np.asarray(ref_out['score']),
                               rtol=5e-2, atol=5e-2)
    np.testing.assert_allclose(np.asarray(out['fused']), np.asarray(ref_out['fused']),
                               rtol=5e-2, atol=5e-2)
    for m in MODALITIES:
        np.testing.assert_allclose(np.asarray(rep[m]), np.asarray(ref_rep[m]),
                                   rtol=5e-2, atol=5e-2)

    assert out['hazard'].shape == (batch, 1)
    assert out['score'].shape == (batch, 2)
    assert all(rep[m].shape == (batch, m_length) for m in MODALITIES)
    print("KERNEL_OK")
</pallas_src>

<mosaic_0001>
module attributes {stable_mosaic.version = 11 : i64} {
  func.func @_fused_net_kernel(%arg0: memref<8x4xf32, #tpu.memory_space<vmem>>, %arg1: memref<8x64xf32, #tpu.memory_space<vmem>>, %arg2: memref<8x48xf32, #tpu.memory_space<vmem>>, %arg3: memref<8x56xf32, #tpu.memory_space<vmem>>, %arg4: memref<1x4xf32, #tpu.memory_space<vmem>>, %arg5: memref<1x4xf32, #tpu.memory_space<vmem>>, %arg6: memref<4x32xbf16, #tpu.memory_space<vmem>>, %arg7: memref<1x32xf32, #tpu.memory_space<vmem>>, %arg8: memref<64x32xbf16, #tpu.memory_space<vmem>>, %arg9: memref<1x32xf32, #tpu.memory_space<vmem>>, %arg10: memref<1x32xf32, #tpu.memory_space<vmem>>, %arg11: memref<1x32xf32, #tpu.memory_space<vmem>>, %arg12: memref<48x400xbf16, #tpu.memory_space<vmem>>, %arg13: memref<1x400xf32, #tpu.memory_space<vmem>>, %arg14: memref<1x400xf32, #tpu.memory_space<vmem>>, %arg15: memref<1x400xf32, #tpu.memory_space<vmem>>, %arg16: memref<400x32xbf16, #tpu.memory_space<vmem>>, %arg17: memref<1x32xf32, #tpu.memory_space<vmem>>, %arg18: memref<1x32xf32, #tpu.memory_space<vmem>>, %arg19: memref<1x32xf32, #tpu.memory_space<vmem>>, %arg20: memref<56x1300xbf16, #tpu.memory_space<vmem>>, %arg21: memref<1x1300xf32, #tpu.memory_space<vmem>>, %arg22: memref<1x1300xf32, #tpu.memory_space<vmem>>, %arg23: memref<1x1300xf32, #tpu.memory_space<vmem>>, %arg24: memref<1300x700xbf16, #tpu.memory_space<vmem>>, %arg25: memref<1x700xf32, #tpu.memory_space<vmem>>, %arg26: memref<1x700xf32, #tpu.memory_space<vmem>>, %arg27: memref<1x700xf32, #tpu.memory_space<vmem>>, %arg28: memref<700x300xbf16, #tpu.memory_space<vmem>>, %arg29: memref<1x300xf32, #tpu.memory_space<vmem>>, %arg30: memref<1x300xf32, #tpu.memory_space<vmem>>, %arg31: memref<1x300xf32, #tpu.memory_space<vmem>>, %arg32: memref<300x32xbf16, #tpu.memory_space<vmem>>, %arg33: memref<1x32xf32, #tpu.memory_space<vmem>>, %arg34: memref<1x32xf32, #tpu.memory_space<vmem>>, %arg35: memref<1x32xf32, #tpu.memory_space<vmem>>, %arg36: memref<32x32xf32, #tpu.memory_space<vmem>>, %arg37: memref<32x32xf32, #tpu.memory_space<vmem>>, %arg38: memref<32x32xf32, #tpu.memory_space<vmem>>, %arg39: memref<32x32xf32, #tpu.memory_space<vmem>>, %arg40: memref<32x2xf32, #tpu.memory_space<vmem>>, %arg41: memref<1x2xf32, #tpu.memory_space<vmem>>, %arg42: memref<32x8xf32, #tpu.memory_space<vmem>>, %arg43: memref<1x8xf32, #tpu.memory_space<vmem>>, %arg44: memref<8x32xf32, #tpu.memory_space<vmem>>, %arg45: memref<8x32xf32, #tpu.memory_space<vmem>>, %arg46: memref<8x32xf32, #tpu.memory_space<vmem>>, %arg47: memref<8x32xf32, #tpu.memory_space<vmem>>, %arg48: memref<8x32xf32, #tpu.memory_space<vmem>>, %arg49: memref<8x8xf32, #tpu.memory_space<vmem>>) attributes {dimension_semantics = [], scalar_prefetch = 0 : i64, scratch_operands = 0 : i64, tpu.core_type = #tpu.core_type<tc>} {
    %c0 = arith.constant 0 : index
    %c0_0 = arith.constant 0 : index
    %0 = vector.load %arg0[%c0, %c0_0] : memref<8x4xf32, #tpu.memory_space<vmem>>, vector<8x4xf32>
    %c0_1 = arith.constant 0 : index
    %c0_2 = arith.constant 0 : index
    %1 = vector.load %arg4[%c0_1, %c0_2] : memref<1x4xf32, #tpu.memory_space<vmem>>, vector<1x4xf32>
    %2 = vector.broadcast %1 : vector<1x4xf32> to vector<8x4xf32>
    %3 = arith.mulf %0, %2 : vector<8x4xf32>
    %c0_3 = arith.constant 0 : index
    %c0_4 = arith.constant 0 : index
    %4 = vector.load %arg5[%c0_3, %c0_4] : memref<1x4xf32, #tpu.memory_space<vmem>>, vector<1x4xf32>
    %5 = vector.broadcast %4 : vector<1x4xf32> to vector<8x4xf32>
    %6 = arith.addf %3, %5 : vector<8x4xf32>
    %7 = arith.truncf %6 : vector<8x4xf32> to vector<8x4xbf16>
    %c0_5 = arith.constant 0 : index
    %c0_6 = arith.constant 0 : index
    %8 = vector.load %arg6[%c0_5, %c0_6] : memref<4x32xbf16, #tpu.memory_space<vmem>>, vector<4x32xbf16>
    %cst = arith.constant dense<0.000000e+00> : vector<8x32xf32>
    %9 = tpu.matmul %7, %8, %cst {dimension_numbers = #tpu.dot_dimension_numbers<[1], [0], [0], [1], [0, 0, 1, 1], [], []>} : vector<8x4xbf16>, vector<4x32xbf16>, vector<8x32xf32> -> vector<8x32xf32>
    %c0_7 = arith.constant 0 : index
    %c0_8 = arith.constant 0 : index
    %10 = vector.load %arg7[%c0_7, %c0_8] : memref<1x32xf32, #tpu.memory_space<vmem>>, vector<1x32xf32>
    %11 = vector.broadcast %10 : vector<1x32xf32> to vector<8x32xf32>
    %12 = arith.addf %9, %11 : vector<8x32xf32>
    %c0_9 = arith.constant 0 : index
    %c0_10 = arith.constant 0 : index
    %13 = vector.load %arg1[%c0_9, %c0_10] : memref<8x64xf32, #tpu.memory_space<vmem>>, vector<8x64xf32>
    %14 = arith.truncf %13 : vector<8x64xf32> to vector<8x64xbf16>
    %c0_11 = arith.constant 0 : index
    %c0_12 = arith.constant 0 : index
    %15 = vector.load %arg8[%c0_11, %c0_12] : memref<64x32xbf16, #tpu.memory_space<vmem>>, vector<64x32xbf16>
    %cst_13 = arith.constant dense<0.000000e+00> : vector<8x32xf32>
    %16 = tpu.matmul %14, %15, %cst_13 {dimension_numbers = #tpu.dot_dimension_numbers<[1], [0], [0], [1], [0, 0, 1, 1], [], []>} : vector<8x64xbf16>, vector<64x32xbf16>, vector<8x32xf32> -> vector<8x32xf32>
    %c0_14 = arith.constant 0 : index
    %c0_15 = arith.constant 0 : index
    %17 = vector.load %arg9[%c0_14, %c0_15] : memref<1x32xf32, #tpu.memory_space<vmem>>, vector<1x32xf32>
    %18 = vector.broadcast %17 : vector<1x32xf32> to vector<8x32xf32>
    %19 = arith.addf %16, %18 : vector<8x32xf32>
    %c0_16 = arith.constant 0 : index
    %c0_17 = arith.constant 0 : index
    %20 = vector.load %arg10[%c0_16, %c0_17] : memref<1x32xf32, #tpu.memory_space<vmem>>, vector<1x32xf32>
    %21 = vector.broadcast %20 : vector<1x32xf32> to vector<8x32xf32>
    %22 = arith.mulf %19, %21 : vector<8x32xf32>
    %c0_18 = arith.constant 0 : index
    %c0_19 = arith.constant 0 : index
    %23 = vector.load %arg11[%c0_18, %c0_19] : memref<1x32xf32, #tpu.memory_space<vmem>>, vector<1x32xf32>
    %24 = vector.broadcast %23 : vector<1x32xf32> to vector<8x32xf32>
    %25 = arith.addf %22, %24 : vector<8x32xf32>
    %cst_20 = arith.constant 0.000000e+00 : f32
    %26 = vector.broadcast %cst_20 : f32 to vector<8x32xf32>
    %27 = arith.maximumf %25, %26 : vector<8x32xf32>
    %c0_21 = arith.constant 0 : index
    %c0_22 = arith.constant 0 : index
    %28 = vector.load %arg2[%c0_21, %c0_22] : memref<8x48xf32, #tpu.memory_space<vmem>>, vector<8x48xf32>
    %29 = arith.truncf %28 : vector<8x48xf32> to vector<8x48xbf16>
    %c0_23 = arith.constant 0 : index
    %c0_24 = arith.constant 0 : index
    %30 = vector.load %arg12[%c0_23, %c0_24] : memref<48x400xbf16, #tpu.memory_space<vmem>>, vector<48x400xbf16>
    %cst_25 = arith.constant dense<0.000000e+00> : vector<8x400xf32>
    %31 = tpu.matmul %29, %30, %cst_25 {dimension_numbers = #tpu.dot_dimension_numbers<[1], [0], [0], [1], [0, 0, 1, 1], [], []>} : vector<8x48xbf16>, vector<48x400xbf16>, vector<8x400xf32> -> vector<8x400xf32>
    %c0_26 = arith.constant 0 : index
    %c0_27 = arith.constant 0 : index
    %32 = vector.load %arg13[%c0_26, %c0_27] : memref<1x400xf32, #tpu.memory_space<vmem>>, vector<1x400xf32>
    %33 = vector.broadcast %32 : vector<1x400xf32> to vector<8x400xf32>
    %34 = arith.addf %31, %33 : vector<8x400xf32>
    %c0_28 = arith.constant 0 : index
    %c0_29 = arith.constant 0 : index
    %35 = vector.load %arg14[%c0_28, %c0_29] : memref<1x400xf32, #tpu.memory_space<vmem>>, vector<1x400xf32>
    %36 = vector.broadcast %35 : vector<1x400xf32> to vector<8x400xf32>
    %37 = arith.mulf %34, %36 : vector<8x400xf32>
    %c0_30 = arith.constant 0 : index
    %c0_31 = arith.constant 0 : index
    %38 = vector.load %arg15[%c0_30, %c0_31] : memref<1x400xf32, #tpu.memory_space<vmem>>, vector<1x400xf32>
    %39 = vector.broadcast %38 : vector<1x400xf32> to vector<8x400xf32>
    %40 = arith.addf %37, %39 : vector<8x400xf32>
    %cst_32 = arith.constant 0.000000e+00 : f32
    %41 = vector.broadcast %cst_32 : f32 to vector<8x400xf32>
    %42 = arith.maximumf %40, %41 : vector<8x400xf32>
    %43 = arith.truncf %42 : vector<8x400xf32> to vector<8x400xbf16>
    %c0_33 = arith.constant 0 : index
    %c0_34 = arith.constant 0 : index
    %44 = vector.load %arg16[%c0_33, %c0_34] : memref<400x32xbf16, #tpu.memory_space<vmem>>, vector<400x32xbf16>
    %cst_35 = arith.constant dense<0.000000e+00> : vector<8x32xf32>
    %45 = tpu.matmul %43, %44, %cst_35 {dimension_numbers = #tpu.dot_dimension_numbers<[1], [0], [0], [1], [0, 0, 1, 1], [], []>} : vector<8x400xbf16>, vector<400x32xbf16>, vector<8x32xf32> -> vector<8x32xf32>
    %c0_36 = arith.constant 0 : index
    %c0_37 = arith.constant 0 : index
    %46 = vector.load %arg17[%c0_36, %c0_37] : memref<1x32xf32, #tpu.memory_space<vmem>>, vector<1x32xf32>
    %47 = vector.broadcast %46 : vector<1x32xf32> to vector<8x32xf32>
    %48 = arith.addf %45, %47 : vector<8x32xf32>
    %c0_38 = arith.constant 0 : index
    %c0_39 = arith.constant 0 : index
    %49 = vector.load %arg18[%c0_38, %c0_39] : memref<1x32xf32, #tpu.memory_space<vmem>>, vector<1x32xf32>
    %50 = vector.broadcast %49 : vector<1x32xf32> to vector<8x32xf32>
    %51 = arith.mulf %48, %50 : vector<8x32xf32>
    %c0_40 = arith.constant 0 : index
    %c0_41 = arith.constant 0 : index
    %52 = vector.load %arg19[%c0_40, %c0_41] : memref<1x32xf32, #tpu.memory_space<vmem>>, vector<1x32xf32>
    %53 = vector.broadcast %52 : vector<1x32xf32> to vector<8x32xf32>
    %54 = arith.addf %51, %53 : vector<8x32xf32>
    %cst_42 = arith.constant 0.000000e+00 : f32
    %55 = vector.broadcast %cst_42 : f32 to vector<8x32xf32>
    %56 = arith.maximumf %54, %55 : vector<8x32xf32>
    %c0_43 = arith.constant 0 : index
    %c0_44 = arith.constant 0 : index
    %57 = vector.load %arg3[%c0_43, %c0_44] : memref<8x56xf32, #tpu.memory_space<vmem>>, vector<8x56xf32>
    %58 = arith.truncf %57 : vector<8x56xf32> to vector<8x56xbf16>
    %c0_45 = arith.constant 0 : index
    %c0_46 = arith.constant 0 : index
    %59 = vector.load %arg20[%c0_45, %c0_46] : memref<56x1300xbf16, #tpu.memory_space<vmem>>, vector<56x1300xbf16>
    %cst_47 = arith.constant dense<0.000000e+00> : vector<8x1300xf32>
    %60 = tpu.matmul %58, %59, %cst_47 {dimension_numbers = #tpu.dot_dimension_numbers<[1], [0], [0], [1], [0, 0, 1, 1], [], []>} : vector<8x56xbf16>, vector<56x1300xbf16>, vector<8x1300xf32> -> vector<8x1300xf32>
    %c0_48 = arith.constant 0 : index
    %c0_49 = arith.constant 0 : index
    %61 = vector.load %arg21[%c0_48, %c0_49] : memref<1x1300xf32, #tpu.memory_space<vmem>>, vector<1x1300xf32>
    %62 = vector.broadcast %61 : vector<1x1300xf32> to vector<8x1300xf32>
    %63 = arith.addf %60, %62 : vector<8x1300xf32>
    %c0_50 = arith.constant 0 : index
    %c0_51 = arith.constant 0 : index
    %64 = vector.load %arg22[%c0_50, %c0_51] : memref<1x1300xf32, #tpu.memory_space<vmem>>, vector<1x1300xf32>
    %65 = vector.broadcast %64 : vector<1x1300xf32> to vector<8x1300xf32>
    %66 = arith.mulf %63, %65 : vector<8x1300xf32>
    %c0_52 = arith.constant 0 : index
    %c0_53 = arith.constant 0 : index
    %67 = vector.load %arg23[%c0_52, %c0_53] : memref<1x1300xf32, #tpu.memory_space<vmem>>, vector<1x1300xf32>
    %68 = vector.broadcast %67 : vector<1x1300xf32> to vector<8x1300xf32>
    %69 = arith.addf %66, %68 : vector<8x1300xf32>
    %cst_54 = arith.constant 0.000000e+00 : f32
    %70 = vector.broadcast %cst_54 : f32 to vector<8x1300xf32>
    %71 = arith.maximumf %69, %70 : vector<8x1300xf32>
    %72 = arith.truncf %71 : vector<8x1300xf32> to vector<8x1300xbf16>
    %c0_55 = arith.constant 0 : index
    %c0_56 = arith.constant 0 : index
    %73 = vector.load %arg24[%c0_55, %c0_56] : memref<1300x700xbf16, #tpu.memory_space<vmem>>, vector<1300x700xbf16>
    %cst_57 = arith.constant dense<0.000000e+00> : vector<8x700xf32>
    %74 = tpu.matmul %72, %73, %cst_57 {dimension_numbers = #tpu.dot_dimension_numbers<[1], [0], [0], [1], [0, 0, 1, 1], [], []>} : vector<8x1300xbf16>, vector<1300x700xbf16>, vector<8x700xf32> -> vector<8x700xf32>
    %c0_58 = arith.constant 0 : index
    %c0_59 = arith.constant 0 : index
    %75 = vector.load %arg25[%c0_58, %c0_59] : memref<1x700xf32, #tpu.memory_space<vmem>>, vector<1x700xf32>
    %76 = vector.broadcast %75 : vector<1x700xf32> to vector<8x700xf32>
    %77 = arith.addf %74, %76 : vector<8x700xf32>
    %c0_60 = arith.constant 0 : index
    %c0_61 = arith.constant 0 : index
    %78 = vector.load %arg26[%c0_60, %c0_61] : memref<1x700xf32, #tpu.memory_space<vmem>>, vector<1x700xf32>
    %79 = vector.broadcast %78 : vector<1x700xf32> to vector<8x700xf32>
    %80 = arith.mulf %77, %79 : vector<8x700xf32>
    %c0_62 = arith.constant 0 : index
    %c0_63 = arith.constant 0 : index
    %81 = vector.load %arg27[%c0_62, %c0_63] : memref<1x700xf32, #tpu.memory_space<vmem>>, vector<1x700xf32>
    %82 = vector.broadcast %81 : vector<1x700xf32> to vector<8x700xf32>
    %83 = arith.addf %80, %82 : vector<8x700xf32>
    %cst_64 = arith.constant 0.000000e+00 : f32
    %84 = vector.broadcast %cst_64 : f32 to vector<8x700xf32>
    %85 = arith.maximumf %83, %84 : vector<8x700xf32>
    %86 = arith.truncf %85 : vector<8x700xf32> to vector<8x700xbf16>
    %c0_65 = arith.constant 0 : index
    %c0_66 = arith.constant 0 : index
    %87 = vector.load %arg28[%c0_65, %c0_66] : memref<700x300xbf16, #tpu.memory_space<vmem>>, vector<700x300xbf16>
    %cst_67 = arith.constant dense<0.000000e+00> : vector<8x300xf32>
    %88 = tpu.matmul %86, %87, %cst_67 {dimension_numbers = #tpu.dot_dimension_numbers<[1], [0], [0], [1], [0, 0, 1, 1], [], []>} : vector<8x700xbf16>, vector<700x300xbf16>, vector<8x300xf32> -> vector<8x300xf32>
    %c0_68 = arith.constant 0 : index
    %c0_69 = arith.constant 0 : index
    %89 = vector.load %arg29[%c0_68, %c0_69] : memref<1x300xf32, #tpu.memory_space<vmem>>, vector<1x300xf32>
    %90 = vector.broadcast %89 : vector<1x300xf32> to vector<8x300xf32>
    %91 = arith.addf %88, %90 : vector<8x300xf32>
    %c0_70 = arith.constant 0 : index
    %c0_71 = arith.constant 0 : index
    %92 = vector.load %arg30[%c0_70, %c0_71] : memref<1x300xf32, #tpu.memory_space<vmem>>, vector<1x300xf32>
    %93 = vector.broadcast %92 : vector<1x300xf32> to vector<8x300xf32>
    %94 = arith.mulf %91, %93 : vector<8x300xf32>
    %c0_72 = arith.constant 0 : index
    %c0_73 = arith.constant 0 : index
    %95 = vector.load %arg31[%c0_72, %c0_73] : memref<1x300xf32, #tpu.memory_space<vmem>>, vector<1x300xf32>
    %96 = vector.broadcast %95 : vector<1x300xf32> to vector<8x300xf32>
    %97 = arith.addf %94, %96 : vector<8x300xf32>
    %cst_74 = arith.constant 0.000000e+00 : f32
    %98 = vector.broadcast %cst_74 : f32 to vector<8x300xf32>
    %99 = arith.maximumf %97, %98 : vector<8x300xf32>
    %100 = arith.truncf %99 : vector<8x300xf32> to vector<8x300xbf16>
    %c0_75 = arith.constant 0 : index
    %c0_76 = arith.constant 0 : index
    %101 = vector.load %arg32[%c0_75, %c0_76] : memref<300x32xbf16, #tpu.memory_space<vmem>>, vector<300x32xbf16>
    %cst_77 = arith.constant dense<0.000000e+00> : vector<8x32xf32>
    %102 = tpu.matmul %100, %101, %cst_77 {dimension_numbers = #tpu.dot_dimension_numbers<[1], [0], [0], [1], [0, 0, 1, 1], [], []>} : vector<8x300xbf16>, vector<300x32xbf16>, vector<8x32xf32> -> vector<8x32xf32>
    %c0_78 = arith.constant 0 : index
    %c0_79 = arith.constant 0 : index
    %103 = vector.load %arg33[%c0_78, %c0_79] : memref<1x32xf32, #tpu.memory_space<vmem>>, vector<1x32xf32>
    %104 = vector.broadcast %103 : vector<1x32xf32> to vector<8x32xf32>
    %105 = arith.addf %102, %104 : vector<8x32xf32>
    %c0_80 = arith.constant 0 : index
    %c0_81 = arith.constant 0 : index
    %106 = vector.load %arg34[%c0_80, %c0_81] : memref<1x32xf32, #tpu.memory_space<vmem>>, vector<1x32xf32>
    %107 = vector.broadcast %106 : vector<1x32xf32> to vector<8x32xf32>
    %108 = arith.mulf %105, %107 : vector<8x32xf32>
    %c0_82 = arith.constant 0 : index
    %c0_83 = arith.constant 0 : index
    %109 = vector.load %arg35[%c0_82, %c0_83] : memref<1x32xf32, #tpu.memory_space<vmem>>, vector<1x32xf32>
    %110 = vector.broadcast %109 : vector<1x32xf32> to vector<8x32xf32>
    %111 = arith.addf %108, %110 : vector<8x32xf32>
    %cst_84 = arith.constant 0.000000e+00 : f32
    %112 = vector.broadcast %cst_84 : f32 to vector<8x32xf32>
    %113 = arith.maximumf %111, %112 : vector<8x32xf32>
    %c0_85 = arith.constant 0 : index
    %c0_86 = arith.constant 0 : index
    %114 = vector.load %arg44[%c0_85, %c0_86] : memref<8x32xf32, #tpu.memory_space<vmem>>, vector<8x32xf32>
    tpu.vector_store %arg44[%c0_85, %c0_86], %12 {strides = array<i32>} : memref<8x32xf32, #tpu.memory_space<vmem>>, vector<8x32xf32>,
    %c0_87 = arith.constant 0 : index
    %c0_88 = arith.constant 0 : index
    %115 = vector.load %arg45[%c0_87, %c0_88] : memref<8x32xf32, #tpu.memory_space<vmem>>, vector<8x32xf32>
    tpu.vector_store %arg45[%c0_87, %c0_88], %27 {strides = array<i32>} : memref<8x32xf32, #tpu.memory_space<vmem>>, vector<8x32xf32>,
    %c0_89 = arith.constant 0 : index
    %c0_90 = arith.constant 0 : index
    %116 = vector.load %arg46[%c0_89, %c0_90] : memref<8x32xf32, #tpu.memory_space<vmem>>, vector<8x32xf32>
    tpu.vector_store %arg46[%c0_89, %c0_90], %56 {strides = array<i32>} : memref<8x32xf32, #tpu.memory_space<vmem>>, vector<8x32xf32>,
    %c0_91 = arith.constant 0 : index
    %c0_92 = arith.constant 0 : index
    %117 = vector.load %arg47[%c0_91, %c0_92] : memref<8x32xf32, #tpu.memory_space<vmem>>, vector<8x32xf32>
    tpu.vector_store %arg47[%c0_91, %c0_92], %113 {strides = array<i32>} : memref<8x32xf32, #tpu.memory_space<vmem>>, vector<8x32xf32>,
    %c0_93 = arith.constant 0 : index
    %c0_94 = arith.constant 0 : index
    %118 = vector.load %arg36[%c0_93, %c0_94] : memref<32x32xf32, #tpu.memory_space<vmem>>, vector<32x32xf32>
    %cst_95 = arith.constant dense<0.000000e+00> : vector<8x32xf32>
    %119 = tpu.matmul %12, %118, %cst_95 {dimension_numbers = #tpu.dot_dimension_numbers<[1], [0], [0], [1], [0, 0, 1, 1], [], []>} : vector<8x32xf32>, vector<32x32xf32>, vector<8x32xf32> -> vector<8x32xf32>
    %120 = math.tanh %119 : vector<8x32xf32>
    %c0_96 = arith.constant 0 : index
    %c0_97 = arith.constant 0 : index
    %121 = vector.load %arg37[%c0_96, %c0_97] : memref<32x32xf32, #tpu.memory_space<vmem>>, vector<32x32xf32>
    %cst_98 = arith.constant dense<0.000000e+00> : vector<8x32xf32>
    %122 = tpu.matmul %27, %121, %cst_98 {dimension_numbers = #tpu.dot_dimension_numbers<[1], [0], [0], [1], [0, 0, 1, 1], [], []>} : vector<8x32xf32>, vector<32x32xf32>, vector<8x32xf32> -> vector<8x32xf32>
    %123 = math.tanh %122 : vector<8x32xf32>
    %c0_99 = arith.constant 0 : index
    %c0_100 = arith.constant 0 : index
    %124 = vector.load %arg38[%c0_99, %c0_100] : memref<32x32xf32, #tpu.memory_space<vmem>>, vector<32x32xf32>
    %cst_101 = arith.constant dense<0.000000e+00> : vector<8x32xf32>
    %125 = tpu.matmul %56, %124, %cst_101 {dimension_numbers = #tpu.dot_dimension_numbers<[1], [0], [0], [1], [0, 0, 1, 1], [], []>} : vector<8x32xf32>, vector<32x32xf32>, vector<8x32xf32> -> vector<8x32xf32>
    %126 = math.tanh %125 : vector<8x32xf32>
    %c0_102 = arith.constant 0 : index
    %c0_103 = arith.constant 0 : index
    %127 = vector.load %arg39[%c0_102, %c0_103] : memref<32x32xf32, #tpu.memory_space<vmem>>, vector<32x32xf32>
    %cst_104 = arith.constant dense<0.000000e+00> : vector<8x32xf32>
    %128 = tpu.matmul %113, %127, %cst_104 {dimension_numbers = #tpu.dot_dimension_numbers<[1], [0], [0], [1], [0, 0, 1, 1], [], []>} : vector<8x32xf32>, vector<32x32xf32>, vector<8x32xf32> -> vector<8x32xf32>
    %129 = math.tanh %128 : vector<8x32xf32>
    %130 = arith.maximumf %120, %123 : vector<8x32xf32>
    %131 = arith.maximumf %126, %129 : vector<8x32xf32>
    %132 = arith.maximumf %130, %131 : vector<8x32xf32>
    %133 = arith.subf %120, %132 : vector<8x32xf32>
    %134 = math.exp %133 : vector<8x32xf32>
    %135 = arith.subf %123, %132 : vector<8x32xf32>
    %136 = math.exp %135 : vector<8x32xf32>
    %137 = arith.subf %126, %132 : vector<8x32xf32>
    %138 = math.exp %137 : vector<8x32xf32>
    %139 = arith.subf %129, %132 : vector<8x32xf32>
    %140 = math.exp %139 : vector<8x32xf32>
    %141 = arith.addf %134, %136 : vector<8x32xf32>
    %142 = arith.addf %141, %138 : vector<8x32xf32>
    %143 = arith.addf %142, %140 : vector<8x32xf32>
    %144 = arith.mulf %12, %134 : vector<8x32xf32>
    %145 = arith.mulf %27, %136 : vector<8x32xf32>
    %146 = arith.addf %144, %145 : vector<8x32xf32>
    %147 = arith.mulf %56, %138 : vector<8x32xf32>
    %148 = arith.addf %146, %147 : vector<8x32xf32>
    %149 = arith.mulf %113, %140 : vector<8x32xf32>
    %150 = arith.addf %148, %149 : vector<8x32xf32>
    %151 = arith.divf %150, %143 : vector<8x32xf32>
    %cst_105 = arith.constant dense<0.000000e+00> : vector<8xf32>
    %152 = vector.multi_reduction <add>, %12, %cst_105 [1] : vector<8x32xf32> to vector<8xf32>
    %153 = vector.shape_cast %152 : vector<8xf32> to vector<8x1xf32>
    %cst_106 = arith.constant 0.000000e+00 : f32
    %154 = vector.broadcast %cst_106 : f32 to vector<8x1xf32>
    %155 = arith.cmpf oeq, %153, %154 : vector<8x1xf32>
    %156 = arith.extui %155 : vector<8x1xi1> to vector<8x1xi32>
    %157 = arith.sitofp %156 : vector<8x1xi32> to vector<8x1xf32>
    %cst_107 = arith.constant dense<0.000000e+00> : vector<8xf32>
    %158 = vector.multi_reduction <add>, %27, %cst_107 [1] : vector<8x32xf32> to vector<8xf32>
    %159 = vector.shape_cast %158 : vector<8xf32> to vector<8x1xf32>
    %cst_108 = arith.constant 0.000000e+00 : f32
    %160 = vector.broadcast %cst_108 : f32 to vector<8x1xf32>
    %161 = arith.cmpf oeq, %159, %160 : vector<8x1xf32>
    %162 = arith.extui %161 : vector<8x1xi1> to vector<8x1xi32>
    %163 = arith.sitofp %162 : vector<8x1xi32> to vector<8x1xf32>
    %cst_109 = arith.constant dense<0.000000e+00> : vector<8xf32>
    %164 = vector.multi_reduction <add>, %56, %cst_109 [1] : vector<8x32xf32> to vector<8xf32>
    %165 = vector.shape_cast %164 : vector<8xf32> to vector<8x1xf32>
    %cst_110 = arith.constant 0.000000e+00 : f32
    %166 = vector.broadcast %cst_110 : f32 to vector<8x1xf32>
    %167 = arith.cmpf oeq, %165, %166 : vector<8x1xf32>
    %168 = arith.extui %167 : vector<8x1xi1> to vector<8x1xi32>
    %169 = arith.sitofp %168 : vector<8x1xi32> to vector<8x1xf32>
    %cst_111 = arith.constant dense<0.000000e+00> : vector<8xf32>
    %170 = vector.multi_reduction <add>, %113, %cst_111 [1] : vector<8x32xf32> to vector<8xf32>
    %171 = vector.shape_cast %170 : vector<8xf32> to vector<8x1xf32>
    %cst_112 = arith.constant 0.000000e+00 : f32
    %172 = vector.broadcast %cst_112 : f32 to vector<8x1xf32>
    %173 = arith.cmpf oeq, %171, %172 : vector<8x1xf32>
    %174 = arith.extui %173 : vector<8x1xi1> to vector<8x1xi32>
    %175 = arith.sitofp %174 : vector<8x1xi32> to vector<8x1xf32>
    %176 = arith.addf %157, %163 : vector<8x1xf32>
    %177 = arith.addf %176, %169 : vector<8x1xf32>
    %178 = arith.addf %177, %175 : vector<8x1xf32>
    %cst_113 = arith.constant 0.000000e+00 : f32
    %179 = vector.broadcast %cst_113 : f32 to vector<8x1xf32>
    %180 = arith.cmpf ogt, %178, %179 : vector<8x1xf32>
    %cst_114 = arith.constant 1.000000e+00 : f32
    %181 = vector.broadcast %cst_114 : f32 to vector<8x1xf32>
    %182 = arith.addf %178, %181 : vector<8x1xf32>
    %cst_115 = arith.constant 1.000000e+00 : f32
    %183 = vector.broadcast %cst_115 : f32 to vector<8x1xf32>
    %184 = arith.select %180, %182, %183 : vector<8x1xi1>, vector<8x1xf32>
    %185 = vector.broadcast %184 : vector<8x1xf32> to vector<8x32xf32>
    %186 = arith.mulf %151, %185 : vector<8x32xf32>
    %c0_116 = arith.constant 0 : index
    %c0_117 = arith.constant 0 : index
    %187 = vector.load %arg48[%c0_116, %c0_117] : memref<8x32xf32, #tpu.memory_space<vmem>>, vector<8x32xf32>
    tpu.vector_store %arg48[%c0_116, %c0_117], %186 {strides = array<i32>} : memref<8x32xf32, #tpu.memory_space<vmem>>, vector<8x32xf32>,
    %c0_118 = arith.constant 0 : index
    %c0_119 = arith.constant 0 : index
    %188 = vector.load %arg40[%c0_118, %c0_119] : memref<32x2xf32, #tpu.memory_space<vmem>>, vector<32x2xf32>
    %cst_120 = arith.constant dense<0.000000e+00> : vector<8x2xf32>
    %189 = tpu.matmul %186, %188, %cst_120 {dimension_numbers = #tpu.dot_dimension_numbers<[1], [0], [0], [1], [0, 0, 1, 1], [], []>} : vector<8x32xf32>, vector<32x2xf32>, vector<8x2xf32> -> vector<8x2xf32>
    %c0_121 = arith.constant 0 : index
    %c0_122 = arith.constant 0 : index
    %190 = vector.load %arg41[%c0_121, %c0_122] : memref<1x2xf32, #tpu.memory_space<vmem>>, vector<1x2xf32>
    %191 = vector.broadcast %190 : vector<1x2xf32> to vector<8x2xf32>
    %192 = arith.addf %189, %191 : vector<8x2xf32>
    %cst_123 = arith.constant dense<0xFF800000> : vector<8xf32>
    %193 = vector.multi_reduction <maximumf>, %192, %cst_123 [1] : vector<8x2xf32> to vector<8xf32>
    %194 = vector.shape_cast %193 : vector<8xf32> to vector<8x1xf32>
    %195 = vector.broadcast %194 : vector<8x1xf32> to vector<8x2xf32>
    %196 = arith.subf %192, %195 : vector<8x2xf32>
    %197 = math.exp %196 : vector<8x2xf32>
    %cst_124 = arith.constant dense<0.000000e+00> : vector<8xf32>
    %198 = vector.multi_reduction <add>, %197, %cst_124 [1] : vector<8x2xf32> to vector<8xf32>
    %199 = vector.shape_cast %198 : vector<8xf32> to vector<8x1xf32>
    %200 = math.log %199 : vector<8x1xf32>
    %201 = arith.addf %194, %200 : vector<8x1xf32>
    %c0_125 = arith.constant 0 : index
    %c0_126 = arith.constant 0 : index
    %202 = vector.load %arg42[%c0_125, %c0_126] : memref<32x8xf32, #tpu.memory_space<vmem>>, vector<32x8xf32>
    %cst_127 = arith.constant dense<0.000000e+00> : vector<8x8xf32>
    %203 = tpu.matmul %186, %202, %cst_127 {dimension_numbers = #tpu.dot_dimension_numbers<[1], [0], [0], [1], [0, 0, 1, 1], [], []>} : vector<8x32xf32>, vector<32x8xf32>, vector<8x8xf32> -> vector<8x8xf32>
    %c0_128 = arith.constant 0 : index
    %c0_129 = arith.constant 0 : index
    %204 = vector.load %arg43[%c0_128, %c0_129] : memref<1x8xf32, #tpu.memory_space<vmem>>, vector<1x8xf32>
    %205 = vector.broadcast %204 : vector<1x8xf32> to vector<8x8xf32>
    %206 = arith.addf %203, %205 : vector<8x8xf32>
    %207 = tpu.iota {dimensions = array<i32: 1>} : vector<8x8xi32>
    %c1_i32 = arith.constant 1 : i32
    %208 = vector.broadcast %c1_i32 : i32 to vector<8x8xi32>
    %209 = arith.cmpi sge, %207, %208 : vector<8x8xi32>
    %c2_i32 = arith.constant 2 : i32
    %210 = vector.broadcast %c2_i32 : i32 to vector<8x8xi32>
    %211 = arith.cmpi sle, %207, %210 : vector<8x8xi32>
    %212 = arith.andi %209, %211 : vector<8x8xi1>
    %213 = arith.extui %212 : vector<8x8xi1> to vector<8x8xi32>
    %214 = arith.sitofp %213 : vector<8x8xi32> to vector<8x8xf32>
    %215 = vector.broadcast %201 : vector<8x1xf32> to vector<8x8xf32>
    %216 = arith.mulf %215, %214 : vector<8x8xf32>
    %217 = arith.subf %206, %216 : vector<8x8xf32>
    %c0_130 = arith.constant 0 : index
    %c0_131 = arith.constant 0 : index
    %218 = vector.load %arg49[%c0_130, %c0_131] : memref<8x8xf32, #tpu.memory_space<vmem>>, vector<8x8xf32>
    tpu.vector_store %arg49[%c0_130, %c0_131], %217 {strides = array<i32>} : memref<8x8xf32, #tpu.memory_space<vmem>>, vector<8x8xf32>,
    return
  }
}

</mosaic_0001>

<bundles_post_ra>
// kernel: tpu_custom_call.1
= control target key start
LH: loop header
LB: loop body
LE: loop exit
PB: predicated region body
PF: predicated region fallthrough
CT: control target
= control target key end

     0   :  { %s10025_s6 = smov 1   ;;  %s10026_s10 = smov 2   ;;  %s11585_s0 = inlined_call_operand.smem [shape: u32[50], index: -1, kind: input, shape index: {}] }
   0x1   :  { %s10092_s5 = sld [smem:[%s11585_s0]]   ;;  %s10027_s14 = smov 3  }
   0x2   :  { %s10097_s9 = sld [smem:[%s11585_s0 + %s10025_s6]]   ;;  %s10028_s18 = smov 4  }
   0x3   :  { %s10102_s13 = sld [smem:[%s11585_s0 + %s10026_s10]]   ;;  %s10029_s22 = smov 5  }
   0x4   :  { %s10107_s17 = sld [smem:[%s11585_s0 + %s10027_s14]]   ;;  %s10030_s26 = smov 6  }
   0x5   :  { %s10112_s21 = sld [smem:[%s11585_s0 + %s10028_s18]]   ;;  %s10031_s30 = smov 7  }
   0x6   :  { %s10117_s25 = sld [smem:[%s11585_s0 + %s10029_s22]]   ;;  %s10032_s4 = smov 8  }
   0x7   :  { %s10122_s29 = sld [smem:[%s11585_s0 + %s10030_s26]]   ;;  %s10033_s10 = smov 9  }
   0x8   :  { %s10127_s3 = sld [smem:[%s11585_s0 + %s10031_s30]]   ;;  %s10034_s15 = smov 10  }
   0x9   :  { %s10132_s8 = sld [smem:[%s11585_s0 + %s10032_s4]]   ;;  %s10035_s20 = smov 11  }
   0xa   :  { %11600 = sst [smem:[#allocation16_spill]] %s10107_s17  ;;  %s10036_s26 = smov 12  }
   0xb   :  { %s10137_s14 = sld [smem:[%s11585_s0 + %s10033_s10]]   ;;  %s10037_s1 = smov 13  }
   0xc   :  { %s10142_s19 = sld [smem:[%s11585_s0 + %s10034_s15]]   ;;  %s10038_s7 = smov 14  }
   0xd   :  { %s10147_s24 = sld [smem:[%s11585_s0 + %s10035_s20]]   ;;  %s10039_s15 = smov 15  }
   0xe   :  { %s10152_s30 = sld [smem:[%s11585_s0 + %s10036_s26]]   ;;  %s10040_s22 = smov 16  }
   0xf   :  { %s10157_s6 = sld [smem:[%s11585_s0 + %s10037_s1]]   ;;  %s10041_s28 = smov 17  }
  0x10   :  { %s10162_s12 = sld [smem:[%s11585_s0 + %s10038_s7]]   ;;  %s10042_s7 = smov 18  }
  0x11   :  { %s10167_s20 = sld [smem:[%s11585_s0 + %s10039_s15]]   ;;  %s10043_s15 = smov 19  }
  0x12   :  { %s10172_s27 = sld [smem:[%s11585_s0 + %s10040_s22]]   ;;  %s10044_s22 = smov 20  }
  0x13   :  { %11601 = sst [smem:[#allocation17_spill]] %s10147_s24 }
  0x14   :  { %s10177_s4 = sld [smem:[%s11585_s0 + %s10041_s28]]   ;;  %s10045_s28 = smov 21  }
  0x15   :  { %s10182_s17 = sld [smem:[%s11585_s0 + %s10042_s7]]   ;;  %s10046_s7 = smov 22  }
  0x16   :  { %11602 = sst [smem:[#allocation18_spill]] %s10162_s12 }
  0x17   :  { %11603 = sst [smem:[#allocation19_spill]] %s10167_s20 }
  0x18   :  { %s10187_s20 = sld [smem:[%s11585_s0 + %s10043_s15]]   ;;  %s10047_s15 = smov 23  }
  0x19   :  { %s10192_s24 = sld [smem:[%s11585_s0 + %s10044_s22]]   ;;  %s10048_s22 = smov 24  }
  0x1a   :  { %11604 = sst [smem:[#allocation20_spill]] %s10177_s4 }
  0x1b   :  { %11605 = sst [smem:[#allocation21_spill]] %s10182_s17 }
  0x1c   :  { %s10197_s4 = sld [smem:[%s11585_s0 + %s10045_s28]]   ;;  %s10049_s28 = smov 25  }
  0x1d   :  { %s10202_s17 = sld [smem:[%s11585_s0 + %s10046_s7]]   ;;  %s10050_s7 = smov 26  }
  0x1e   :  { %11606 = sst [smem:[#allocation22_spill]] %s10187_s20 }
  0x1f   :  { %s10207_s20 = sld [smem:[%s11585_s0 + %s10047_s15]]   ;;  %s10051_s15 = smov 27  }
  0x20   :  { %s10212_s12 = sld [smem:[%s11585_s0 + %s10048_s22]]   ;;  %s10052_s22 = smov 28  }
  0x22   :  { %11607 = sst [smem:[#allocation23_spill]] %s10197_s4 }
  0x23   :  { %11608 = sst [smem:[#allocation24_spill]] %s10202_s17 }
  0x24   :  { %s10217_s4 = sld [smem:[%s11585_s0 + %s10049_s28]]   ;;  %s10053_s28 = smov 29  }
  0x25   :  { %11609 = sst [smem:[#allocation25_spill]] %s10207_s20 }
  0x26   :  { %11610 = sst [smem:[#allocation26_spill]] %s10212_s12 }
  0x27   :  { %s10222_s17 = sld [smem:[%s11585_s0 + %s10050_s7]]   ;;  %s10054_s7 = smov 30  }
  0x28   :  { %s10227_s20 = sld [smem:[%s11585_s0 + %s10051_s15]]   ;;  %s10055_s15 = smov 31  }
  0x29   :  { %s10232_s12 = sld [smem:[%s11585_s0 + %s10052_s22]]   ;;  %s10056_s22 = smov 32  }
  0x2a   :  { %11611 = sst [smem:[#allocation27_spill]] %s10217_s4 }
  0x2b   :  { %s10237_s4 = sld [smem:[%s11585_s0 + %s10053_s28]]   ;;  %s10057_s28 = smov 33  }
  0x2d   :  { %11612 = sst [smem:[#allocation28_spill]] %s10222_s17 }
  0x2e   :  { %11613 = sst [smem:[#allocation29_spill]] %s10227_s20 }
  0x2f   :  { %11614 = sst [smem:[#allocation30_spill]] %s10232_s12 }
  0x30   :  { %s10242_s17 = sld [smem:[%s11585_s0 + %s10054_s7]]   ;;  %s10058_s7 = smov 34  }
  0x31   :  { %11615 = sst [smem:[#allocation31_spill]] %s10237_s4 }
  0x32   :  { %s10247_s20 = sld [smem:[%s11585_s0 + %s10055_s15]]   ;;  %s10059_s15 = smov 35  }
  0x33   :  { %s10252_s12 = sld [smem:[%s11585_s0 + %s10056_s22]]   ;;  %s10060_s22 = smov 36  }
  0x34   :  { %s10257_s4 = sld [smem:[%s11585_s0 + %s10057_s28]]   ;;  %s10061_s28 = smov 37  }
  0x36   :  { %11616 = sst [smem:[#allocation32_spill]] %s10242_s17 }
  0x37   :  { %s10262_s17 = sld [smem:[%s11585_s0 + %s10058_s7]]   ;;  %s10062_s7 = smov 38  }
  0x38   :  { %11617 = sst [smem:[#allocation33_spill]] %s10247_s20 }
  0x39   :  { %11618 = sst [smem:[#allocation34_spill]] %s10252_s12 }
  0x3a   :  { %11619 = sst [smem:[#allocation35_spill]] %s10257_s4 }
  0x3b   :  { %s10267_s20 = sld [smem:[%s11585_s0 + %s10059_s15]]   ;;  %s10063_s15 = smov 39  }
  0x3c   :  { %s10272_s12 = sld [smem:[%s11585_s0 + %s10060_s22]]   ;;  %s10064_s22 = smov 40  }
  0x3d   :  { %11620 = sst [smem:[#allocation36_spill]] %s10262_s17 }
  0x3e   :  { %s10277_s4 = sld [smem:[%s11585_s0 + %s10061_s28]]   ;;  %s10065_s28 = smov 41  }
  0x3f   :  { %s10282_s17 = sld [smem:[%s11585_s0 + %s10062_s7]]   ;;  %s10066_s7 = smov 42  }
  0x41   :  { %11621 = sst [smem:[#allocation37_spill]] %s10267_s20 }
  0x42   :  { %11622 = sst [smem:[#allocation38_spill]] %s10272_s12 }
  0x43   :  { %s10287_s20 = sld [smem:[%s11585_s0 + %s10063_s15]]   ;;  %s10067_s15 = smov 43  }
  0x44   :  { %11623 = sst [smem:[#allocation39_spill]] %s10277_s4 }
  0x45   :  { %11624 = sst [smem:[#allocation40_spill]] %s10282_s17 }
  0x46   :  { %s10292_s12 = sld [smem:[%s11585_s0 + %s10064_s22]]   ;;  %s10068_s22 = smov 44  }
  0x47   :  { %s10297_s4 = sld [smem:[%s11585_s0 + %s10065_s28]]   ;;  %s10069_s28 = smov 45  }
  0x48   :  { %s10302_s17 = sld [smem:[%s11585_s0 + %s10066_s7]]   ;;  %s10070_s7 = smov 46  }
  0x49   :  { %11625 = sst [smem:[#allocation41_spill]] %s10287_s20 }
  0x4a   :  { %s10307_s20 = sld [smem:[%s11585_s0 + %s10067_s15]]   ;;  %s10071_s15 = smov 47  }
  0x4c   :  { %11626 = sst [smem:[#allocation42_spill]] %s10292_s12 }
  0x4d   :  { %11627 = sst [smem:[#allocation43_spill]] %s10297_s4 }
  0x4e   :  { %11628 = sst [smem:[#allocation44_spill]] %s10302_s17 }
  0x4f   :  { %s10312_s12 = sld [smem:[%s11585_s0 + %s10068_s22]]   ;;  %s10072_s22 = smov 48  }
  0x50   :  { %11629 = sst [smem:[#allocation45_spill]] %s10307_s20 }
  0x51   :  { %s10317_s4 = sld [smem:[%s11585_s0 + %s10069_s28]]   ;;  %s10073_s28 = smov 49  }
  0x52   :  { %s10322_s17 = sld [smem:[%s11585_s0 + %s10070_s7]]  }
  0x53   :  { %s10327_s20 = sld [smem:[%s11585_s0 + %s10071_s15]]  }
  0x55   :  { %11630 = sst [smem:[#allocation46_spill]] %s10312_s12 }
  0x56   :  { %s10332_s12 = sld [smem:[%s11585_s0 + %s10072_s22]]  }
  0x57   :  { %11631 = sst [smem:[#allocation47_spill]] %s10317_s4 }
  0x58   :  { %s10337_s4 = sld [smem:[%s11585_s0 + %s10073_s28]]  }
  0x59   :  { %105 = vsyncpa [#allocation3], 0 }
  0x5a   :  { %106 = vsyncpa [#allocation5], 0 }
  0x5b   :  { %107 = vsyncpa [#allocation8], 0  ;;  %v216_v0 = vld [vmem:[%s10122_s29] sm:$0x3]  ;;  %vm228_vm0 = vcmask 1041408   ;;  %v10074_v1 = vmov 0.0   ;;  %v390_v58 = vlaneseq }
  0x5c   :  { %8550 = vmatprep.subr.bf16.mxu0 %v10074_v1  ;;  %8556 = vmatprep.subr.bf16.mxu1 %v10074_v1  ;;  %v230_v2 = vsel %vm228_vm0, %v216_v0, 0  ;;  %v8827_v3 = vld [vmem:[%s10132_s8] sm:$0xff]   ;;  %vm10075_vm1 = vmmov 0   ;;  %v8831_v9 = vld [vmem:[%s10132_s8 + $0x8] sm:$0xff]   ;;  %vm224_vm2 = vcmask 31744   ;;  %v8835_v12 = vld [vmem:[%s10132_s8 + $0x10] sm:$0xff]  }
  0x5d   :  { %8551 = vmatpush3.bf16.msra.mxu0 %v230_v2  ;;  %8552 = vmatprep.mubr.msk.bf16.mxu0 %vm10075_vm1, %v10074_v1  ;;  %v8830_v4 = vld [vmem:[%s10152_s30 + $0x4] ss:$16 sps:$4 sm:$0xff]   ;;  %v7637_v6 = vld [vmem:[%s10112_s21] ss:$0 sm:$0xff]  ;;  %v8839_v16 = vld [vmem:[%s10132_s8 + $0x18] sm:$0xff]   ;;  %v10076_v20 = vmov 0  }
  0x5e   :  { %8557 = vmatpush3.bf16.msra.mxu1 %v8827_v3  ;;  %v198_v5 = vld [vmem:[%s10092_s5] sm:$0xff]  ;;  %8564 = vmatprep.mubr.msk.bf16.mxu1 %vm10075_vm1, %v10074_v1  ;;  %v8842_v23 = vld [vmem:[%s10152_s30 + $0xc] ss:$16 sps:$4 sm:$0xff]   ;;  %vm313_vm3 = vcmask 523264   ;;  %v8840_v26 = vld [vmem:[%s10152_s30 + $0x8] ss:$16 sps:$4 sm:$0xff]  }
  0x5f   :  { %v7638_v7 = vld [vmem:[%s10117_s25] ss:$0 sm:$0xff]  ;;  %8558 = vmatprep.subr.bf16.mxu1 %v10074_v1  ;;  %474 = vmatprep.subr.bf16.mxu0 %v8830_v4  ;;  %v206_v8 = vmul.f32 %v7637_v6, %v198_v5  ;;  %v8834_v14 = vld [vmem:[%s10152_s30 + $0x24] ss:$16 sps:$4 sm:$0xff]   ;;  %v8851_v27 = vld [vmem:[%s10172_s27 + $0x48] sm:$0xff]   ;;  %vm470_vm4 = vcmask 392192  }
  0x60   :  { %v8828_v10 = vld [vmem:[%s10152_s30] ss:$16 sps:$4 sm:$0xff]   ;;  %v8838_v18 = vld [vmem:[%s10152_s30 + $0x44] ss:$16 sps:$4 sm:$0xff]   ;;  %v8845_v29 = vld [vmem:[%s10152_s30 + $0x2c] ss:$16 sps:$4 sm:$0xff]  }
  0x61   :  { %v214_v11 = vadd.f32 %v7638_v7, %v206_v8  ;;  %v8832_v15 = vld [vmem:[%s10152_s30 + $0x20] ss:$16 sps:$4 sm:$0xff]   ;;  %v8852_v30 = vld [vmem:[%s10172_s27 + $0x8] sm:$0xff]   ;;  %v8856_v37 = vld [vmem:[%s10172_s27 + $0x58] sm:$0xff]   ;;  %s11632_s0 = sld [smem:[#allocation18_spill]]  ;;  %vm6941_vm5 = vcmask 261120  }
  0x62   :  { %8559 = vmatpush3.bf16.msra.mxu1 %v8831_v9  ;;  %v272_v17 = vld [vmem:[%s10097_s9] sm:$0xff]  ;;  %v8853_v31 = vld [vmem:[%s10172_s27 + $0x50] sm:$0xff]   ;;  %v8843_v32 = vld [vmem:[%s10152_s30 + $0x28] ss:$16 sps:$4 sm:$0xff]   ;;  %s11633_s5 = sld [smem:[#allocation17_spill]]  ;;  %s11634_s9 = sld [smem:[#allocation19_spill]] }
  0x63   :  { %v215_v13 = vpack.c.bf16 %v214_v11, %v214_v11  ;;  %8560 = vmatprep.subr.bf16.mxu1 %v10074_v1  ;;  %v8836_v19 = vld [vmem:[%s10152_s30 + $0x40] ss:$16 sps:$4 sm:$0xff]   ;;  %v273_v22 = vpack.c.bf16 %v272_v17, %v272_v17  ;;  %v8848_v33 = vld [vmem:[%s10152_s30 + $0x4c] ss:$16 sps:$4 sm:$0xff]   ;;  %v8846_v34 = vld [vmem:[%s10152_s30 + $0x48] ss:$16 sps:$4 sm:$0xff]  }
  0x64   :  { %v374_v21 = vld [vmem:[%s10102_s13] sm:$0xff]  ;;  %v8854_v35 = vld [vmem:[%s10172_s27 + $0x10] sm:$0xff]   ;;  %v8857_v38 = vld [vmem:[%s10172_s27 + $0x18] sm:$0xff]   ;;  %v10415_v62 = vshrl.u32 %v390_v58, 7  ;;  %s11635_s13 = sld [smem:[#allocation16_spill]]  ;;  %vm823_vm6 = vcmask 130048  }
  0x65   :  { %8553 = vmatmul.mubr.msk.bf16.vlgmr.msra.gmra.mrb[0].mxu0 %vm224_vm2, %v215_v13  ;;  %v8849_v24 = vld [vmem:[%s10172_s27 + $0x40] sm:$0xff]   ;;  %v375_v28 = vpack.c.bf16 %v374_v21, %v374_v21  ;;  %v8858_v39 = vld [vmem:[%s10172_s27 + $0x88] sm:$0xff]   ;;  %v8861_v42 = vld [vmem:[%s10172_s27 + $0x90] sm:$0xff]   ;;  %vm1227_vm7 = vcmask 1043456   ;;  %vm1223_vm8 = vcmask 457728   ;;  %s11636_s21 = sld [smem:[#allocation26_spill]] }
  0x66   :  { %475 = vmatpush1.bf16.msra.mxu0 %v8828_v10  ;;  %8561 = vmatpush3.bf16.msra.mxu1 %v8835_v12  ;;  %v8850_v25 = vld [vmem:[%s10172_s27] sm:$0xff]   ;;  %v8862_v43 = vld [vmem:[%s10172_s27 + $0x68] sm:$0xff]   ;;  %v8864_v45 = vld [vmem:[%s10172_s27 + $0x98] sm:$0xff]   ;;  %v10424_v5 = vsub.s32 0, %v10415_v62  ;;  %v10429_v8 = vsub.s32 1, %v10415_v62 }
  0x67   :  { %476 = vmatprep.subr.bf16.mxu0 %v8834_v14  ;;  %8562 = vmatprep.subr.bf16.mxu1 %v10074_v1  ;;  %v8855_v36 = vld [vmem:[%s10172_s27 + $0x80] sm:$0xff]   ;;  %v8863_v44 = vld [vmem:[%s10172_s27 + $0x28] sm:$0xff]   ;;  %v8865_v46 = vld [vmem:[%s10172_s27 + $0x70] sm:$0xff]  }
  0x68   :  { %506 = vmatprep.mubr.bf16.mxu0 %v10076_v20  ;;  %v8859_v40 = vld [vmem:[%s10172_s27 + $0x60] sm:$0xff]   ;;  %v8866_v47 = vld [vmem:[%s10172_s27 + $0x30] sm:$0xff]   ;;  %v8868_v49 = vld [vmem:[%s10172_s27 + $0x78] sm:$0xff]  }
  0x69   :  { %v8860_v41 = vld [vmem:[%s10172_s27 + $0x20] sm:$0xff]   ;;  %v8869_v50 = vld [vmem:[%s10172_s27 + $0x38] sm:$0xff]   ;;  %v8870_v51 = vld [vmem:[%s10172_s27 + $0xa8] sm:$0xff]  }
  0x6a   :  { %477 = vmatpush1.bf16.msra.mxu0 %v8832_v15  ;;  %8563 = vmatpush3.bf16.msra.mxu1 %v8839_v16  ;;  %v8867_v48 = vld [vmem:[%s10172_s27 + $0xa0] sm:$0xff]   ;;  %v8874_v53 = vld [vmem:[%s10172_s27 + $0xb0] sm:$0xff]   ;;  %v8878_v54 = vld [vmem:[%s10172_s27 + $0xb8] sm:$0xff]  }
  0x6b   :  { %478 = vmatprep.subr.bf16.mxu0 %v8838_v18  ;;  %8423 = vmatprep.subr.bf16.mxu1 %v8849_v24  ;;  %v8873_v52 = vld [vmem:[%s10192_s24 + $0x4] ss:$44 sps:$4 sm:$0xff]   ;;  %v8887_v56 = vld [vmem:[%s10192_s24 + $0xc] ss:$44 sps:$4 sm:$0xff]   ;;  %v7639_v57 = vld [vmem:[%s10127_s3] ss:$0 sm:$0xff] }
  0x6c   :  { %v8882_v55 = vld [vmem:[%s10172_s27 + $0xc0] sm:$0xff]  }
  0x6d   :  { %8565 = vmatmul.mubr.msk.bf16.vlgmr.msra.gmra.mrb[0].mxu1 %vm313_vm3, %v273_v22  ;;  %v7641_v3 = vld [vmem:[%s10137_s14] ss:$0 sm:$0xff] }
  0x6e   :  { %479 = vmatpush1.bf16.msra.mxu0 %v8836_v19  ;;  %8424 = vmatpush3.bf16.msra.mxu1 %v8850_v25  ;;  %v388_v4 = vld [vmem:[%s10157_s6] sm:$0xf] }
  0x6f   :  { %515 = vmatprep.subr.bf16.mxu0 %v8842_v23  ;;  %8425 = vmatprep.subr.bf16.mxu1 %v8851_v27  ;;  %v7647_v6 = vld [vmem:[%s10142_s19] ss:$0 sm:$0xff]  ;;  %v393_v13 = vrot.slane %v388_v4, %v10424_v5  ;;  %v397_v15 = vrot.slane %v388_v4, %v10429_v8 }
  0x70   :  { %v556_v7 = vld [vmem:[%s11632_s0] sm:$0xf] }
  0x71   :  { %7661 = vmatmul.mubr.msk.bf16.vlgmr.msra.gmra.mrb[4].mxu0 %vm470_vm4, %v375_v28  ;;  %v7648_v10 = vld [vmem:[%s11633_s5] ss:$0 sm:$0xff]  ;;  %v561_v18 = vrot.slane %v556_v7, %v10424_v5  ;;  %v565_v22 = vrot.slane %v556_v7, %v10429_v8 }
  0x72   :  { %516 = vmatpush1.bf16.msra.mxu0 %v8840_v26  ;;  %547 = vmatprep.mubr.bf16.mxu0 %v10076_v20  ;;  %v582_v11 = vld [vmem:[%s11634_s9] sm:$0xf] }
  0x73   :  { %517 = vmatprep.subr.bf16.mxu0 %v8845_v29  ;;  %8426 = vmatpush3.bf16.msra.mxu1 %v8852_v30  ;;  %v587_v25 = vrot.slane %v582_v11, %v10424_v5 }
  0x74   :  { %8427 = vmatprep.subr.bf16.mxu1 %v8853_v31 }
  0x76   :  { %518 = vmatpush1.bf16.msra.mxu0 %v8843_v32 }
  0x77   :  { %519 = vmatprep.subr.bf16.mxu0 %v8848_v33  ;;  %8428 = vmatpush3.bf16.msra.mxu1 %v8854_v35 }
  0x78   :  { %8429 = vmatprep.subr.bf16.mxu1 %v8856_v37 }
  0x7a   :  { %520 = vmatpush1.bf16.msra.mxu0 %v8846_v34 }
  0x7b   :  { %867 = vmatprep.subr.bf16.mxu0 %v10076_v20  ;;  %8430 = vmatpush3.bf16.msra.mxu1 %v8857_v38  ;;  %v10449_v38 = vsub.s32 3, %v10415_v62 }
  0x7c   :  { %8431 = vmatprep.subr.bf16.mxu1 %v8859_v40 }
  0x7d   :  { %7662 = vmatmul.mubr.msk.bf16.vlgmr.msra.gmra.mrb[8].mxu0 %vm470_vm4, %v375_v28  ;;  %v591_v28 = vrot.slane %v582_v11, %v10429_v8 }
  0x7e   :  { %868 = vmatpush1.bf16.msra.mxu0 %v8855_v36  ;;  %v10446_v36 = vsub.s32 2, %v10415_v62 }
  0x7f   :  { %869 = vmatprep.subr.bf16.mxu0 %v10076_v20  ;;  %8432 = vmatpush3.bf16.msra.mxu1 %v8860_v41 }
  0x80   :  { %8433 = vmatprep.subr.bf16.mxu1 %v8862_v43  ;;  %v401_v41 = vrot.slane %v388_v4, %v10446_v36  ;;  %v8877_v43 = vld [vmem:[%s10192_s24 + $0x5c] ss:$44 sps:$4 sm:$0xff]  }
  0x82   :  { %870 = vmatpush1.bf16.msra.mxu0 %v8858_v39 }
  0x83   :  { %871 = vmatprep.subr.bf16.mxu0 %v10076_v20  ;;  %8434 = vmatpush3.bf16.msra.mxu1 %v8863_v44 }
  0x84   :  { %8435 = vmatprep.subr.bf16.mxu1 %v8865_v46 }
  0x86   :  { %872 = vmatpush1.bf16.msra.mxu0 %v8861_v42  ;;  %v8871_v42 = vld [vmem:[%s10192_s24] ss:$44 sps:$4 sm:$0xff]  }
  0x87   :  { %873 = vmatprep.subr.bf16.mxu0 %v10076_v20  ;;  %8436 = vmatpush3.bf16.msra.mxu1 %v8866_v47  ;;  %v569_v47 = vrot.slane %v556_v7, %v10446_v36 }
  0x88   :  { %8437 = vmatprep.subr.bf16.mxu1 %v8868_v49  ;;  %v573_v49 = vrot.slane %v556_v7, %v10449_v38 }
  0x8a   :  { %874 = vmatpush1.bf16.msra.mxu0 %v8864_v45  ;;  %v405_v45 = vrot.slane %v388_v4, %v10449_v38 }
  0x8b   :  { %875 = vmatprep.subr.bf16.mxu0 %v10076_v20  ;;  %8438 = vmatpush3.bf16.msra.mxu1 %v8869_v50  ;;  %v8875_v50 = vld [vmem:[%s10192_s24 + $0x58] ss:$44 sps:$4 sm:$0xff]  }
  0x8c   :  { %1261 = vmatprep.subr.bf16.mxu1 %v8873_v52  ;;  %v595_v52 = vrot.slane %v582_v11, %v10446_v36 }
  0x8e   :  { %876 = vmatpush1.bf16.msra.mxu0 %v8867_v48 }
  0x8f   :  { %877 = vmatprep.subr.bf16.mxu0 %v10076_v20 }
  0x92   :  { %878 = vmatpush1.bf16.msra.mxu0 %v8870_v51 }
  0x93   :  { %879 = vmatprep.subr.bf16.mxu0 %v10076_v20 }
  0x96   :  { %880 = vmatpush1.bf16.msra.mxu0 %v8874_v53 }
  0x97   :  { %881 = vmatprep.subr.bf16.mxu0 %v10076_v20 }
  0x9a   :  { %882 = vmatpush1.bf16.msra.mxu0 %v8878_v54  ;;  %v8881_v54 = vld [vmem:[%s10192_s24 + $0xb4] ss:$44 sps:$4 sm:$0xff]  }
  0x9b   :  { %883 = vmatprep.subr.bf16.mxu0 %v10076_v20 }
  0x9e   :  { %884 = vmatpush1.bf16.msra.mxu0 %v8882_v55 }
  0x9f   :  { %1302 = vmatprep.subr.bf16.mxu0 %v8887_v56  ;;  %v599_v56 = vrot.slane %v582_v11, %v10449_v38 }
 0x138   :  { %v266_v59 = vpop.f32.mrb[0].mxu0 }
 0x139   :  { %v10412_v60 = vadd.f32 %v7639_v57, %v266_v59  ;;  %v8554_v61 = vpop.f32.mrb[1].mxu0  ;;  %v962_v57 = vld [vmem:[%s10192_s24 + $0x108] sm:$0xff] }
 0x13a   :  { %v269_v63 = vpop.f32.mrb[2].mxu0  ;;  %v7726_v7 = vcombine.high %v962_v57, %v962_v57 }
 0x13b   :  { %v8555_v0 = vpop.f32.mrb[3].mxu0  ;;  %v7285_v2 = vsel %vm6941_vm5, %v10412_v60, 0.0  ;;  %6942 = vst.msk [vmem:[#allocation2] sm:$0xff] %vm6941_vm5, %v10412_v60 }
 0x13c   :  { %7286 = vadd.xlane.f32.xlu0 %v7285_v2  ;;  %v8879_v2 = vld [vmem:[%s10192_s24 + $0xb0] ss:$44 sps:$4 sm:$0xff]  }
 0x140   :  { %v351_v9 = vpop.f32.mrb[0].mxu1 }
 0x141   :  { %v352_v12 = vadd.f32 %v7641_v3, %v351_v9  ;;  %v8566_v14 = vpop.f32.mrb[1].mxu1  ;;  %v7725_v9 = vcombine.low %v962_v57, %v962_v57  ;;  %v8928_v57 = vld [vmem:[%s10192_s24 + $0xd4] ss:$44 sps:$4 sm:$0xff]  }
 0x142   :  { %v354_v16 = vpop.f32.mrb[2].mxu1  ;;  %v8885_v14 = vld [vmem:[%s10192_s24 + $0x8] ss:$44 sps:$4 sm:$0xff]  }
 0x143   :  { %v364_v17 = vmul.f32 %v7647_v6, %v352_v12  ;;  %v8567_v19 = vpop.f32.mrb[3].mxu1  ;;  %v8890_v16 = vld [vmem:[%s10192_s24 + $0x64] ss:$44 sps:$4 sm:$0xff]  }
 0x144   :  { %v508_v21 = vpop.f32.mrb[4].mxu0  ;;  %v8888_v19 = vld [vmem:[%s10192_s24 + $0x60] ss:$44 sps:$4 sm:$0xff]  }
 0x145   :  { %v372_v23 = vadd.f32 %v7648_v10, %v364_v17  ;;  %v509_v24 = vadd.f32 %v508_v21, %v393_v13  ;;  %v510_v26 = vpop.f32.mrb[5].mxu0  ;;  %v924_v13 = vld [vmem:[%s11635_s13] sm:$0xff]  ;;  %v8896_v21 = vld [vmem:[%s10192_s24 + $0x10] ss:$44 sps:$4 sm:$0xff]  }
 0x146   :  { %v511_v27 = vadd.f32 %v510_v26, %v397_v15  ;;  %v512_v29 = vpop.f32.mrb[6].mxu0  ;;  %v1229_v15 = vsel %vm1227_vm7, %v7725_v9, 0  ;;  %v8898_v17 = vld [vmem:[%s10192_s24 + $0x14] ss:$44 sps:$4 sm:$0xff]   ;;  %v8939_v9 = vld [vmem:[%s11636_s21 + $0x30] ss:$24 sps:$4 sm:$0xff]  }
 0x147   :  { %v10439_v30 = vmax.f32 %v372_v23, 0.0  ;;  %v578_v31 = vmul.f32 %v561_v18, %v509_v24  ;;  %v513_v32 = vpop.f32.mrb[7].mxu0  ;;  %v10470_v18 = vpack.c.bf16 %v924_v13, %v924_v13  ;;  %v8901_v23 = vld [vmem:[%s10192_s24 + $0x6c] ss:$44 sps:$4 sm:$0xff]   ;;  %v963_v24 = vld [vmem:[%s10192_s24 + $0x110] sm:$0xff] }
 0x148   :  { %v579_v33 = vmul.f32 %v565_v22, %v511_v27  ;;  %v8893_v22 = vld [vmem:[%s10192_s24 + $0xbc] ss:$44 sps:$4 sm:$0xff]   ;;  %v7728_v27 = vcombine.high %v963_v24, %v963_v24  ;;  %v8904_v29 = vld [vmem:[%s10192_s24 + $0xc4] ss:$44 sps:$4 sm:$0xff]   ;;  %v8902_v32 = vld [vmem:[%s10192_s24 + $0xc0] ss:$44 sps:$4 sm:$0xff]  }
 0x149   :  { %6943 = vst.msk [vmem:[#allocation4] sm:$0xff] %vm6941_vm5, %v10439_v30  ;;  %v604_v34 = vadd.f32 %v587_v25, %v578_v31  ;;  %v7291_v35 = vsel %vm6941_vm5, %v10439_v30, 0.0  ;;  %v8891_v25 = vld [vmem:[%s10192_s24 + $0xb8] ss:$44 sps:$4 sm:$0xff]   ;;  %v8899_v26 = vld [vmem:[%s10192_s24 + $0x68] ss:$44 sps:$4 sm:$0xff]  }
 0x14a   :  { %v605_v37 = vadd.f32 %v591_v28, %v579_v33  ;;  %7292 = vadd.xlane.f32.xlu0 %v7291_v35  ;;  %v7727_v28 = vcombine.low %v963_v24, %v963_v24  ;;  %v964_v31 = vld [vmem:[%s10192_s24 + $0x118] sm:$0xff]  ;;  %v965_v33 = vld [vmem:[%s10192_s24 + $0x120] sm:$0xff]  ;;  %v8953_v13 = vld [vmem:[%s11636_s21 + $0x94] ss:$24 sps:$4 sm:$0xff]  }
 0x14b   :  { %v608_v39 = vmax.f32 %v604_v34, 0.0  ;;  %v966_v34 = vld [vmem:[%s10192_s24 + $0x128] sm:$0xff] }
 0x14c   :  { %v609_v40 = vmax.f32 %v605_v37, 0.0  ;;  %v1235_v35 = vsel %vm1227_vm7, %v7727_v28, 0  ;;  %v7730_v37 = vcombine.high %v964_v31, %v964_v31  ;;  %v8948_v24 = vld [vmem:[%s11636_s21 + $0x68] ss:$24 sps:$4 sm:$0xff]   ;;  %v8954_v28 = vld [vmem:[%s11636_s21 + $0x98] ss:$24 sps:$4 sm:$0xff]  }
 0x14d   :  { %v612_v46 = vpack.c.bf16 %v608_v39, %v608_v39  ;;  %v7729_v39 = vcombine.low %v964_v31, %v964_v31 }
 0x14e   :  { %v613_v44 = vpack.c.bf16 %v609_v40, %v609_v40  ;;  %v8909_v40 = vld [vmem:[%s10192_s24 + $0x1c] ss:$44 sps:$4 sm:$0xff]  }
 0x150   :  { %v549_v48 = vpop.f32.mrb[8].mxu0  ;;  %859 = vmatprep.mubr.bf16.mxu1 %v613_v44  ;;  %v8907_v44 = vld [vmem:[%s10192_s24 + $0x18] ss:$44 sps:$4 sm:$0xff]  }
 0x151   :  { %v550_v51 = vadd.f32 %v549_v48, %v401_v41  ;;  %v551_v53 = vpop.f32.mrb[9].mxu0  ;;  %860 = vmatmul.mubr.bf16.vlgmr.msra.gmra.mrb[4].mxu1 %v612_v46  ;;  %v7731_v41 = vcombine.low %v965_v33, %v965_v33  ;;  %v8912_v46 = vld [vmem:[%s10192_s24 + $0x74] ss:$44 sps:$4 sm:$0xff]   ;;  %v8910_v48 = vld [vmem:[%s10192_s24 + $0x70] ss:$44 sps:$4 sm:$0xff]  }
 0x152   :  { %v552_v55 = vadd.f32 %v551_v53, %v405_v45  ;;  %1262 = vmatpush1.bf16.msra.mxu1 %v8871_v42  ;;  %1293 = vmatprep.mubr.bf16.mxu1 %v10076_v20  ;;  %v553_v59 = vpop.f32.mrb[10].mxu0  ;;  %v7733_v42 = vcombine.low %v966_v34, %v966_v34  ;;  %v1241_v45 = vsel %vm1227_vm7, %v7729_v39, 0 }
 0x153   :  { %v580_v61 = vmul.f32 %v569_v47, %v550_v51  ;;  %1263 = vmatprep.subr.bf16.mxu1 %v8877_v43  ;;  %v554_v63 = vpop.f32.mrb[11].mxu0  ;;  %v8932_v43 = vld [vmem:[%s10192_s24 + $0x130] ss:$0 sps:$4 sm:$0xff]   ;;  %v1247_v51 = vsel %vm1227_vm7, %v7731_v41, 0  ;;  %v7732_v59 = vcombine.high %v965_v33, %v965_v33 }
 0x154   :  { %v581_v0 = vmul.f32 %v573_v49, %v552_v55  ;;  %v8920_v47 = vld [vmem:[%s10192_s24 + $0x24] ss:$44 sps:$4 sm:$0xff]   ;;  %v8918_v49 = vld [vmem:[%s10192_s24 + $0x20] ss:$44 sps:$4 sm:$0xff]   ;;  %v1253_v53 = vsel %vm1227_vm7, %v7733_v42, 0  ;;  %v7734_v63 = vcombine.high %v966_v34, %v966_v34 }
 0x155   :  { %v606_v3 = vadd.f32 %v595_v52, %v580_v61  ;;  %v8924_v52 = vld [vmem:[%s10192_s24 + $0x7c] ss:$44 sps:$4 sm:$0xff]  }
 0x156   :  { %v607_v4 = vadd.f32 %v599_v56, %v581_v0  ;;  %1264 = vmatpush1.bf16.msra.mxu1 %v8875_v50  ;;  %v8915_v50 = vld [vmem:[%s10192_s24 + $0xcc] ss:$44 sps:$4 sm:$0xff]   ;;  %v8913_v55 = vld [vmem:[%s10192_s24 + $0xc8] ss:$44 sps:$4 sm:$0xff]   ;;  %v8926_v61 = vld [vmem:[%s10192_s24 + $0xd0] ss:$44 sps:$4 sm:$0xff]  }
 0x157   :  { %v610_v6 = vmax.f32 %v606_v3, 0.0  ;;  %1265 = vmatprep.subr.bf16.mxu1 %v8881_v54  ;;  %v1259_v54 = vsel %vm1227_vm7, %v8932_v43, 0  ;;  %v8922_v56 = vld [vmem:[%s10192_s24 + $0x78] ss:$44 sps:$4 sm:$0xff]   ;;  %v8921_v0 = vld [vmem:[%s10192_s24 + $0x28] ss:$44 sps:$4 sm:$0xff]  }
 0x158   :  { %v611_v10 = vmax.f32 %v607_v4, 0.0  ;;  %v8925_v3 = vld [vmem:[%s10192_s24 + $0x80] ss:$44 sps:$4 sm:$0xff]  }
 0x159   :  { %v614_v11 = vpack.c.bf16 %v610_v6, %v610_v6  ;;  %v8933_v4 = vld [vmem:[%s11636_s21] ss:$24 sps:$4 sm:$0xff]   ;;  %v8941_v6 = vld [vmem:[%s11636_s21 + $0x34] ss:$24 sps:$4 sm:$0xff]  }
 0x15a   :  { %v615_v12 = vpack.c.bf16 %v611_v10, %v611_v10  ;;  %1266 = vmatpush1.bf16.msra.mxu1 %v8879_v2  ;;  %v8935_v2 = vld [vmem:[%s11636_s21 + $0x4] ss:$24 sps:$4 sm:$0xff]  }
 0x15b   :  { %7736 = vmatprep.subr.msk.bf16.mxu1 %vm1227_vm7, %v7726_v7  ;;  %v8929_v7 = vld [vmem:[%s10192_s24 + $0xd8] ss:$44 sps:$4 sm:$0xff]  }
 0x15c   :  { %7689 = vmatprep.mubr.msk.bf16.mxu0 %vm823_vm6, %v615_v12  ;;  %v8947_v10 = vld [vmem:[%s11636_s21 + $0x64] ss:$24 sps:$4 sm:$0xff]  }
 0x15d   :  { %900 = vmatmul.mubr.bf16.vlgmr.msra.gmra.mrb[12].mxu0 %v614_v11  ;;  %v8945_v11 = vld [vmem:[%s11636_s21 + $0x60] ss:$24 sps:$4 sm:$0xff]   ;;  %v8938_v12 = vld [vmem:[%s11636_s21 + $0xc] ss:$24 sps:$4 sm:$0xff]  }
 0x15e   :  { %1268 = vmatpush1.bf16.msra.mxu1 %v1229_v15  ;;  %1303 = vmatpush1.bf16.msra.mxu0 %v8885_v14  ;;  %v8936_v14 = vld [vmem:[%s11636_s21 + $0x8] ss:$24 sps:$4 sm:$0xff]  }
 0x15f   :  { %1304 = vmatprep.subr.bf16.mxu0 %v8890_v16  ;;  %1334 = vmatprep.mubr.bf16.mxu0 %v10076_v20  ;;  %v8951_v15 = vld [vmem:[%s11636_s21 + $0x90] ss:$24 sps:$4 sm:$0xff]   ;;  %v8944_v16 = vld [vmem:[%s11636_s21 + $0x3c] ss:$24 sps:$4 sm:$0xff]  }
 0x160   :  { %1343 = vmatprep.subr.bf16.mxu1 %v8898_v17  ;;  %v8959_v17 = vld [vmem:[%s11636_s21 + $0xc4] ss:$24 sps:$4 sm:$0xff]  }
 0x161   :  { %7737 = vmatmul.mubr.msk.bf16.vlgmr.msra.gmra.mrb[8].mxu1 %vm1223_vm8, %v10470_v18 }
 0x162   :  { %1305 = vmatpush1.bf16.msra.mxu0 %v8888_v19  ;;  %1344 = vmatpush1.bf16.msra.mxu1 %v8896_v21  ;;  %v8942_v19 = vld [vmem:[%s11636_s21 + $0x38] ss:$24 sps:$4 sm:$0xff]  }
 0x163   :  { %1306 = vmatprep.subr.bf16.mxu0 %v8893_v22  ;;  %1345 = vmatprep.subr.bf16.mxu1 %v8901_v23  ;;  %v8957_v21 = vld [vmem:[%s11636_s21 + $0xc0] ss:$24 sps:$4 sm:$0xff]   ;;  %v8950_v22 = vld [vmem:[%s11636_s21 + $0x6c] ss:$24 sps:$4 sm:$0xff]  }
 0x164   :  { %1375 = vmatprep.mubr.bf16.mxu1 %v10076_v20  ;;  %v8965_v23 = vld [vmem:[%s11636_s21 + $0xf4] ss:$24 sps:$4 sm:$0xff]  }
 0x166   :  { %1307 = vmatpush1.bf16.msra.mxu0 %v8891_v25  ;;  %1346 = vmatpush1.bf16.msra.mxu1 %v8899_v26  ;;  %v8963_v25 = vld [vmem:[%s11636_s21 + $0xf0] ss:$24 sps:$4 sm:$0xff]   ;;  %v8956_v26 = vld [vmem:[%s11636_s21 + $0x9c] ss:$24 sps:$4 sm:$0xff]  }
 0x167   :  { %7738 = vmatprep.subr.msk.bf16.mxu0 %vm1227_vm7, %v7728_v27  ;;  %1347 = vmatprep.subr.bf16.mxu1 %v8904_v29  ;;  %v8971_v27 = vld [vmem:[%s11636_s21 + $0x124] ss:$24 sps:$4 sm:$0xff]  }
 0x16a   :  { %1309 = vmatpush1.bf16.msra.mxu0 %v1235_v35  ;;  %1348 = vmatpush1.bf16.msra.mxu1 %v8902_v32 }
 0x16b   :  { %7740 = vmatprep.subr.msk.bf16.mxu1 %vm1227_vm7, %v7730_v37  ;;  %1384 = vmatprep.subr.bf16.mxu0 %v8909_v40 }
 0x16d   :  { %7739 = vmatmul.mubr.msk.bf16.vlgmr.msra.gmra.mrb[16].mxu0 %vm1223_vm8, %v10470_v18 }
 0x16e   :  { %1350 = vmatpush1.bf16.msra.mxu1 %v1241_v45  ;;  %1385 = vmatpush1.bf16.msra.mxu0 %v8907_v44 }
 0x16f   :  { %1386 = vmatprep.subr.bf16.mxu0 %v8912_v46  ;;  %1425 = vmatprep.subr.bf16.mxu1 %v8920_v47 }
 0x170   :  { %1416 = vmatprep.mubr.bf16.mxu0 %v10076_v20 }
 0x171   :  { %7741 = vmatmul.mubr.msk.bf16.vlgmr.msra.gmra.mrb[12].mxu1 %vm1223_vm8, %v10470_v18 }
 0x172   :  { %1387 = vmatpush1.bf16.msra.mxu0 %v8910_v48  ;;  %1426 = vmatpush1.bf16.msra.mxu1 %v8918_v49 }
 0x173   :  { %1388 = vmatprep.subr.bf16.mxu0 %v8915_v50  ;;  %1427 = vmatprep.subr.bf16.mxu1 %v8924_v52 }
 0x174   :  { %1457 = vmatprep.mubr.bf16.mxu1 %v10076_v20 }
 0x176   :  { %1389 = vmatpush1.bf16.msra.mxu0 %v8913_v55  ;;  %1428 = vmatpush1.bf16.msra.mxu1 %v8922_v56 }
 0x177   :  { %7742 = vmatprep.subr.msk.bf16.mxu0 %vm1227_vm7, %v7732_v59  ;;  %1429 = vmatprep.subr.bf16.mxu1 %v8928_v57 }
 0x17a   :  { %1391 = vmatpush1.bf16.msra.mxu0 %v1247_v51  ;;  %1430 = vmatpush1.bf16.msra.mxu1 %v8926_v61 }
 0x17b   :  { %8568 = vmatprep.subr.bf16.mxu0 %v10074_v1  ;;  %7744 = vmatprep.subr.msk.bf16.mxu1 %vm1227_vm7, %v7734_v63 }
 0x17d   :  { %7743 = vmatmul.mubr.msk.bf16.vlgmr.msra.gmra.mrb[20].mxu0 %vm1223_vm8, %v10470_v18 }
 0x17e   :  { %8569 = vmatpush3.bf16.msra.mxu0 %v8921_v0  ;;  %1432 = vmatpush1.bf16.msra.mxu1 %v1253_v53 }
 0x17f   :  { %8570 = vmatprep.subr.bf16.mxu0 %v10074_v1  ;;  %8576 = vmatprep.mubr.msk.bf16.mxu0 %vm10075_vm1, %v10074_v1 }
 0x180   :  { %4656 = vmatprep.subr.bf16.mxu1 %v8935_v2 }
 0x181   :  { %7745 = vmatmul.mubr.msk.bf16.vlgmr.msra.gmra.mrb[16].mxu1 %vm1223_vm8, %v10470_v18 }
 0x182   :  { %8571 = vmatpush3.bf16.msra.mxu0 %v8925_v3  ;;  %4657 = vmatpush1.bf16.msra.mxu1 %v8933_v4 }
 0x183   :  { %8572 = vmatprep.subr.bf16.mxu0 %v10074_v1  ;;  %4658 = vmatprep.subr.bf16.mxu1 %v8941_v6 }
 0x186   :  { %8573 = vmatpush3.bf16.msra.mxu0 %v8929_v7  ;;  %4659 = vmatpush1.bf16.msra.mxu1 %v8939_v9 }
 0x187   :  { %8574 = vmatprep.subr.bf16.mxu0 %v10074_v1  ;;  %4660 = vmatprep.subr.bf16.mxu1 %v8947_v10 }
 0x18a   :  { %8575 = vmatpush3.bf16.msra.mxu0 %v1259_v54  ;;  %4661 = vmatpush1.bf16.msra.mxu1 %v8945_v11 }
 0x18b   :  { %4902 = vmatprep.subr.bf16.mxu0 %v8938_v12  ;;  %4662 = vmatprep.subr.bf16.mxu1 %v8953_v13 }
 0x18d   :  { %8577 = vmatmul.mubr.msk.bf16.vlgmr.msra.gmra.mrb[24].mxu0 %vm1223_vm8, %v10470_v18  ;;  %v8969_v18 = vld [vmem:[%s11636_s21 + $0x120] ss:$24 sps:$4 sm:$0xff]  }
 0x18e   :  { %4903 = vmatpush1.bf16.msra.mxu0 %v8936_v14  ;;  %4663 = vmatpush1.bf16.msra.mxu1 %v8951_v15 }
 0x18f   :  { %4904 = vmatprep.subr.bf16.mxu0 %v8944_v16  ;;  %4664 = vmatprep.subr.bf16.mxu1 %v8959_v17 }
 0x192   :  { %4905 = vmatpush1.bf16.msra.mxu0 %v8942_v19  ;;  %4665 = vmatpush1.bf16.msra.mxu1 %v8957_v21 }
 0x193   :  { %4906 = vmatprep.subr.bf16.mxu0 %v8950_v22  ;;  %4666 = vmatprep.subr.bf16.mxu1 %v8965_v23 }
 0x196   :  { %4907 = vmatpush1.bf16.msra.mxu0 %v8948_v24  ;;  %4667 = vmatpush1.bf16.msra.mxu1 %v8963_v25 }
 0x197   :  { %108 = vsyncpa [#allocation11], 0  ;;  %4908 = vmatprep.subr.bf16.mxu0 %v8956_v26  ;;  %v8962_v29 = vld [vmem:[%s11636_s21 + $0xcc] ss:$24 sps:$4 sm:$0xff]   ;;  %4668 = vmatprep.subr.bf16.mxu1 %v8971_v27  ;;  %v8960_v32 = vld [vmem:[%s11636_s21 + $0xc8] ss:$24 sps:$4 sm:$0xff]  }
 0x198   :  { %v8977_v31 = vld [vmem:[%s11636_s21 + $0x154] ss:$24 sps:$4 sm:$0xff]   ;;  %v8975_v33 = vld [vmem:[%s11636_s21 + $0x150] ss:$24 sps:$4 sm:$0xff]   ;;  %v8983_v35 = vld [vmem:[%s11636_s21 + $0x184] ss:$24 sps:$4 sm:$0xff]  }
 0x199   :  { %v8968_v34 = vld [vmem:[%s11636_s21 + $0xfc] ss:$24 sps:$4 sm:$0xff]   ;;  %v8966_v37 = vld [vmem:[%s11636_s21 + $0xf8] ss:$24 sps:$4 sm:$0xff]   ;;  %v8974_v40 = vld [vmem:[%s11636_s21 + $0x12c] ss:$24 sps:$4 sm:$0xff]  }
 0x19a   :  { %4909 = vmatpush1.bf16.msra.mxu0 %v8954_v28  ;;  %4669 = vmatpush1.bf16.msra.mxu1 %v8969_v18  ;;  %v8981_v39 = vld [vmem:[%s11636_s21 + $0x180] ss:$24 sps:$4 sm:$0xff]   ;;  %v8989_v41 = vld [vmem:[%s11636_s21 + $0x1b4] ss:$24 sps:$4 sm:$0xff]   ;;  %v8987_v43 = vld [vmem:[%s11636_s21 + $0x1b0] ss:$24 sps:$4 sm:$0xff]  }
 0x19b   :  { %4910 = vmatprep.subr.bf16.mxu0 %v8962_v29  ;;  %4670 = vmatprep.subr.bf16.mxu1 %v8977_v31  ;;  %v8972_v42 = vld [vmem:[%s11636_s21 + $0x128] ss:$24 sps:$4 sm:$0xff]   ;;  %v8980_v44 = vld [vmem:[%s11636_s21 + $0x15c] ss:$24 sps:$4 sm:$0xff]   ;;  %v8978_v45 = vld [vmem:[%s11636_s21 + $0x158] ss:$24 sps:$4 sm:$0xff]  }
 0x19c   :  { %v8995_v46 = vld [vmem:[%s11636_s21 + $0x1e4] ss:$24 sps:$4 sm:$0xff]   ;;  %v8993_v48 = vld [vmem:[%s11636_s21 + $0x1e0] ss:$24 sps:$4 sm:$0xff]   ;;  %v9001_v49 = vld [vmem:[%s11636_s21 + $0x214] ss:$24 sps:$4 sm:$0xff]  }
 0x19d   :  { %v8986_v47 = vld [vmem:[%s11636_s21 + $0x18c] ss:$24 sps:$4 sm:$0xff]   ;;  %v8984_v50 = vld [vmem:[%s11636_s21 + $0x188] ss:$24 sps:$4 sm:$0xff]   ;;  %v8992_v52 = vld [vmem:[%s11636_s21 + $0x1bc] ss:$24 sps:$4 sm:$0xff]  }
 0x19e   :  { %4911 = vmatpush1.bf16.msra.mxu0 %v8960_v32  ;;  %4671 = vmatpush1.bf16.msra.mxu1 %v8975_v33  ;;  %v8999_v51 = vld [vmem:[%s11636_s21 + $0x210] ss:$24 sps:$4 sm:$0xff]   ;;  %v9007_v53 = vld [vmem:[%s11636_s21 + $0x244] ss:$24 sps:$4 sm:$0xff]   ;;  %v9005_v55 = vld [vmem:[%s11636_s21 + $0x240] ss:$24 sps:$4 sm:$0xff]  }
 0x19f   :  { %4912 = vmatprep.subr.bf16.mxu0 %v8968_v34  ;;  %4672 = vmatprep.subr.bf16.mxu1 %v8983_v35  ;;  %v8990_v54 = vld [vmem:[%s11636_s21 + $0x1b8] ss:$24 sps:$4 sm:$0xff]   ;;  %v8998_v56 = vld [vmem:[%s11636_s21 + $0x1ec] ss:$24 sps:$4 sm:$0xff]   ;;  %v8996_v57 = vld [vmem:[%s11636_s21 + $0x1e8] ss:$24 sps:$4 sm:$0xff]  }
 0x1a0   :  { %v9013_v59 = vld [vmem:[%s11636_s21 + $0x274] ss:$24 sps:$4 sm:$0xff]   ;;  %v9011_v63 = vld [vmem:[%s11636_s21 + $0x270] ss:$24 sps:$4 sm:$0xff]   ;;  %v9019_v2 = vld [vmem:[%s11636_s21 + $0x2a4] ss:$24 sps:$4 sm:$0xff]  }
 0x1a1   :  { %v9004_v61 = vld [vmem:[%s11636_s21 + $0x21c] ss:$24 sps:$4 sm:$0xff]   ;;  %v9002_v0 = vld [vmem:[%s11636_s21 + $0x218] ss:$24 sps:$4 sm:$0xff]   ;;  %v9010_v3 = vld [vmem:[%s11636_s21 + $0x24c] ss:$24 sps:$4 sm:$0xff]  }
 0x1a2   :  { %4913 = vmatpush1.bf16.msra.mxu0 %v8966_v37  ;;  %4673 = vmatpush1.bf16.msra.mxu1 %v8981_v39  ;;  %v9017_v4 = vld [vmem:[%s11636_s21 + $0x2a0] ss:$24 sps:$4 sm:$0xff]   ;;  %v9025_v7 = vld [vmem:[%s11636_s21 + $0x2d4] ss:$24 sps:$4 sm:$0xff]   ;;  %v9023_v10 = vld [vmem:[%s11636_s21 + $0x2d0] ss:$24 sps:$4 sm:$0xff]  }
 0x1a3   :  { %4914 = vmatprep.subr.bf16.mxu0 %v8974_v40  ;;  %4674 = vmatprep.subr.bf16.mxu1 %v8989_v41  ;;  %v9008_v6 = vld [vmem:[%s11636_s21 + $0x248] ss:$24 sps:$4 sm:$0xff]   ;;  %v9016_v9 = vld [vmem:[%s11636_s21 + $0x27c] ss:$24 sps:$4 sm:$0xff]   ;;  %v9014_v11 = vld [vmem:[%s11636_s21 + $0x278] ss:$24 sps:$4 sm:$0xff]  }
 0x1a4   :  { %v9031_v12 = vld [vmem:[%s11636_s21 + $0x304] ss:$24 sps:$4 sm:$0xff]   ;;  %s11637_s25 = sld [smem:[#allocation20_spill]]  ;;  %s11638_s29 = sld [smem:[#allocation23_spill]]  ;;  %v9020_v14 = vld [vmem:[%s11636_s21 + $0x2a8] ss:$24 sps:$4 sm:$0xff]  }
 0x1a5   :  { %v9022_v13 = vld [vmem:[%s11636_s21 + $0x2ac] ss:$24 sps:$4 sm:$0xff]   ;;  %v9028_v15 = vld [vmem:[%s11636_s21 + $0x2dc] ss:$24 sps:$4 sm:$0xff]   ;;  %s11639_s3 = sld [smem:[#allocation21_spill]]  ;;  %s11640_s8 = sld [smem:[#allocation24_spill]] }
 0x1a6   :  { %4915 = vmatpush1.bf16.msra.mxu0 %v8972_v42  ;;  %4675 = vmatpush1.bf16.msra.mxu1 %v8987_v43  ;;  %v9026_v16 = vld [vmem:[%s11636_s21 + $0x2d8] ss:$24 sps:$4 sm:$0xff]   ;;  %v9034_v17 = vld [vmem:[%s11636_s21 + $0x30c] ss:$24 sps:$4 sm:$0xff]   ;;  %s11641_s14 = sld [smem:[#allocation22_spill]]  ;;  %s11642_s19 = sld [smem:[#allocation25_spill]] }
 0x1a7   :  { %4916 = vmatprep.subr.bf16.mxu0 %v8980_v44  ;;  %4676 = vmatprep.subr.bf16.mxu1 %v8995_v46  ;;  %vm4634_vm9 = vcmask 162816   ;;  %s11643_s24 = sld [smem:[#allocation30_spill]]  ;;  %s11644_s30 = sld [smem:[#allocation27_spill]]  ;;  %vm6380_vm10 = vcmask 1045504   ;;  %vm6376_vm11 = vcmask 490496   ;;  %vm6837_vm12 = vcmask 359424  }
 0x1a8   :  { %s11645_s6 = sld [smem:[#allocation28_spill]]  ;;  %s11646_s27 = sld [smem:[#allocation29_spill]]  ;;  %vm7401_vm2 = vcmask 15360  }
 0x1a9   :  { %s11647_s7 = sld [smem:[#allocation34_spill]]  ;;  %s11648_s10 = sld [smem:[#allocation31_spill]] }
 0x1aa   :  { %4917 = vmatpush1.bf16.msra.mxu0 %v8978_v45  ;;  %4677 = vmatpush1.bf16.msra.mxu1 %v8993_v48  ;;  %v7663_v25 = vld [vmem:[%s11637_s25] ss:$0 sm:$0xff]  ;;  %s11649_s11 = sld [smem:[#allocation32_spill]]  ;;  %s11650_s15 = sld [smem:[#allocation33_spill]] }
 0x1ab   :  { %4918 = vmatprep.subr.bf16.mxu0 %v8986_v47  ;;  %4678 = vmatprep.subr.bf16.mxu1 %v9001_v49  ;;  %v10599_v26 = vld [vmem:[%s11638_s29] sm:$0xff]  ;;  %s11651_s16 = sld [smem:[#allocation38_spill]]  ;;  %s11652_s18 = sld [smem:[#allocation40_spill]] }
 0x1ac   :  { %v7690_v18 = vld [vmem:[%s11639_s3] ss:$0 sm:$0xff]  ;;  %v975_v32 = vrot.slane %v10599_v26, %v10424_v5  ;;  %v979_v37 = vrot.slane %v10599_v26, %v10429_v8  ;;  %s11653_s22 = sld [smem:[#allocation39_spill]]  ;;  %s11654_s23 = sld [smem:[#allocation41_spill]] }
 0x1ad   :  { %v10603_v29 = vld [vmem:[%s11640_s8] sm:$0xff]  ;;  %s11655_s26 = sld [smem:[#allocation35_spill]]  ;;  %s11656_s28 = sld [smem:[#allocation36_spill]] }
 0x1ae   :  { %4919 = vmatpush1.bf16.msra.mxu0 %v8984_v50  ;;  %4679 = vmatpush1.bf16.msra.mxu1 %v8999_v51  ;;  %v7691_v34 = vld [vmem:[%s11641_s14] ss:$0 sm:$0xff]  ;;  %v1513_v41 = vrot.slane %v10603_v29, %v10424_v5  ;;  %v1517_v44 = vrot.slane %v10603_v29, %v10429_v8  ;;  %s11657_s1 = sld [smem:[#allocation37_spill]]  ;;  %s11658_s2 = sld [smem:[#allocation42_spill]] }
 0x1af   :  { %4920 = vmatprep.subr.bf16.mxu0 %v8992_v52  ;;  %4680 = vmatprep.subr.bf16.mxu1 %v9007_v53  ;;  %v10609_v35 = vld [vmem:[%s11642_s19] sm:$0xff]  ;;  %s11659_s0 = sld [smem:[#allocation44_spill]]  ;;  %s11660_s5 = sld [smem:[#allocation43_spill]] }
 0x1b0   :  { %v1583_v47 = vrot.slane %v10609_v35, %v10424_v5  ;;  %v1587_v50 = vrot.slane %v10609_v35, %v10429_v8  ;;  %s10078_s9 = smov [#allocation4]  }
 0x1b1   :  { %s7522_s13 = sshll.u32 %s10078_s9, 4  ;;  %s7523_s13 = int_to_ptr.vmem [resolvable:$true] %s7522_s13 }
 0x1b2   :  { %4921 = vmatpush1.bf16.msra.mxu0 %v8990_v54  ;;  %4681 = vmatpush1.bf16.msra.mxu1 %v9005_v55  ;;  %p9890_p1 = scmp.lt.s32.totalorder %s7523_s13, %s7523_s13 }
 0x1b3   :  { %4922 = vmatprep.subr.bf16.mxu0 %v8998_v56  ;;  %4682 = vmatprep.subr.bf16.mxu1 %v9013_v59 }
 0x1b6   :  { %4923 = vmatpush1.bf16.msra.mxu0 %v8996_v57  ;;  %4683 = vmatpush1.bf16.msra.mxu1 %v9011_v63 }
 0x1b7   :  { %4924 = vmatprep.subr.bf16.mxu0 %v9004_v61  ;;  %4684 = vmatprep.subr.bf16.mxu1 %v9019_v2  ;;  %v9029_v2 = vld [vmem:[%s11636_s21 + $0x300] ss:$24 sps:$4 sm:$0xff]  }
 0x1ba   :  { %4925 = vmatpush1.bf16.msra.mxu0 %v9002_v0  ;;  %4685 = vmatpush1.bf16.msra.mxu1 %v9017_v4  ;;  %v987_v4 = vrot.slane %v10599_v26, %v10449_v38 }
 0x1bb   :  { %4926 = vmatprep.subr.bf16.mxu0 %v9010_v3  ;;  %4686 = vmatprep.subr.bf16.mxu1 %v9025_v7  ;;  %v9032_v3 = vld [vmem:[%s11636_s21 + $0x308] ss:$24 sps:$4 sm:$0xff]   ;;  %v9037_v7 = vld [vmem:[%s11636_s21 + $0x334] ss:$24 sps:$4 sm:$0xff]  }
 0x1be   :  { %4927 = vmatpush1.bf16.msra.mxu0 %v9008_v6  ;;  %4687 = vmatpush1.bf16.msra.mxu1 %v9023_v10 }
 0x1bf   :  { %4928 = vmatprep.subr.bf16.mxu0 %v9016_v9  ;;  %4697 = vmatprep.subr.bf16.mxu1 %v9031_v12  ;;  %v9040_v9 = vld [vmem:[%s11636_s21 + $0x33c] ss:$24 sps:$4 sm:$0xff]  }
 0x1c2   :  { %4929 = vmatpush1.bf16.msra.mxu0 %v9014_v11  ;;  %v1525_v11 = vrot.slane %v10603_v29, %v10449_v38 }
 0x1c3   :  { %4930 = vmatprep.subr.bf16.mxu0 %v9022_v13  ;;  %v9035_v13 = vld [vmem:[%s11636_s21 + $0x330] ss:$24 sps:$4 sm:$0xff]  }
 0x1c6   :  { %4931 = vmatpush1.bf16.msra.mxu0 %v9020_v14  ;;  %v9038_v14 = vld [vmem:[%s11636_s21 + $0x338] ss:$24 sps:$4 sm:$0xff]  }
 0x1c7   :  { %4932 = vmatprep.subr.bf16.mxu0 %v9028_v15 }
 0x1ca   :  { %4933 = vmatpush1.bf16.msra.mxu0 %v9026_v16  ;;  %v1595_v16 = vrot.slane %v10609_v35, %v10449_v38 }
 0x1cb   :  { %4943 = vmatprep.subr.bf16.mxu0 %v9034_v17 }
 0x224   :  { %v8439_v19 = vpop.f32.mrb[4].mxu1 }
 0x225   :  { %v8440_v21 = vpop.f32.mrb[5].mxu1 }
 0x226   :  { %v8441_v22 = vadd.f32 %v8440_v21, %v8439_v19  ;;  %v8442_v23 = vpop.f32.mrb[6].mxu1  ;;  %v9043_v19 = vld [vmem:[%s11636_s21 + $0x364] ss:$24 sps:$4 sm:$0xff]  }
 0x227   :  { %v8443_v24 = vpop.f32.mrb[7].mxu1  ;;  %v9046_v21 = vld [vmem:[%s11636_s21 + $0x36c] ss:$24 sps:$4 sm:$0xff]  }
 0x228   :  { %v862_v27 = vadd.f32 %v8441_v22, %v7663_v25 }
 0x230   :  { %v901_v28 = vpop.f32.mrb[12].mxu0 }
 0x231   :  { %v902_v31 = vadd.f32 %v901_v28, %v862_v27  ;;  %v903_v33 = vpop.f32.mrb[13].mxu0  ;;  %v9041_v27 = vld [vmem:[%s11636_s21 + $0x360] ss:$24 sps:$4 sm:$0xff]  }
 0x232   :  { %v904_v39 = vpop.f32.mrb[14].mxu0  ;;  %v9044_v28 = vld [vmem:[%s11636_s21 + $0x368] ss:$24 sps:$4 sm:$0xff]   ;;  %v9052_v33 = vld [vmem:[%s11636_s21 + $0x39c] ss:$24 sps:$4 sm:$0xff]  }
 0x233   :  { %v914_v40 = vmul.f32 %v7690_v18, %v902_v31  ;;  %v905_v42 = vpop.f32.mrb[15].mxu0  ;;  %v9047_v39 = vld [vmem:[%s11636_s21 + $0x390] ss:$24 sps:$4 sm:$0xff]  }
 0x234   :  { %v1295_v43 = vpop.f32.mrb[8].mxu1  ;;  %v9055_v42 = vld [vmem:[%s11636_s21 + $0x3c4] ss:$24 sps:$4 sm:$0xff]  }
 0x235   :  { %v922_v45 = vadd.f32 %v7691_v34, %v914_v40  ;;  %v1296_v46 = vadd.f32 %v1295_v43, %v975_v32  ;;  %v1297_v48 = vpop.f32.mrb[9].mxu1  ;;  %v9049_v32 = vld [vmem:[%s11636_s21 + $0x394] ss:$24 sps:$4 sm:$0xff]   ;;  %v9050_v40 = vld [vmem:[%s11636_s21 + $0x398] ss:$24 sps:$4 sm:$0xff]  }
 0x236   :  { %v1298_v49 = vadd.f32 %v1297_v48, %v979_v37  ;;  %v1299_v51 = vpop.f32.mrb[10].mxu1  ;;  %v9058_v43 = vld [vmem:[%s11636_s21 + $0x3cc] ss:$24 sps:$4 sm:$0xff]   ;;  %v9059_v48 = vld [vmem:[%s11636_s21 + $0x3f0] ss:$24 sps:$4 sm:$0xff]  }
 0x237   :  { %v10621_v52 = vmax.f32 %v922_v45, 0.0  ;;  %v1565_v53 = vmul.f32 %v1513_v41, %v1296_v46  ;;  %v1300_v54 = vpop.f32.mrb[11].mxu1  ;;  %v9056_v45 = vld [vmem:[%s11636_s21 + $0x3c8] ss:$24 sps:$4 sm:$0xff]   ;;  %v9061_v46 = vld [vmem:[%s11636_s21 + $0x3f4] ss:$24 sps:$4 sm:$0xff]  }
 0x238   :  { %v1566_v55 = vmul.f32 %v1517_v44, %v1298_v49  ;;  %v9053_v44 = vld [vmem:[%s11636_s21 + $0x3c0] ss:$24 sps:$4 sm:$0xff]   ;;  %v9070_v51 = vld [vmem:[%s11636_s21 + $0x42c] ss:$24 sps:$4 sm:$0xff]  }
 0x239   :  { %6944 = vst.msk [vmem:[#allocation6] sm:$0xff] %vm6941_vm5, %v10621_v52  ;;  %v1635_v56 = vadd.f32 %v1583_v47, %v1565_v53  ;;  %v7297_v57 = vsel %vm6941_vm5, %v10621_v52, 0.0  ;;  %v9064_v47 = vld [vmem:[%s11636_s21 + $0x3fc] ss:$24 sps:$4 sm:$0xff]   ;;  %v9062_v49 = vld [vmem:[%s11636_s21 + $0x3f8] ss:$24 sps:$4 sm:$0xff]  }
 0x23a   :  { %v1636_v59 = vadd.f32 %v1587_v50, %v1566_v55  ;;  %7298 = vadd.xlane.f32.xlu1 %v7297_v57  ;;  %v9067_v50 = vld [vmem:[%s11636_s21 + $0x424] ss:$24 sps:$4 sm:$0xff]   ;;  %v9065_v55 = vld [vmem:[%s11636_s21 + $0x420] ss:$24 sps:$4 sm:$0xff]  }
 0x23b   :  { %v1646_v61 = vmax.f32 %v1635_v56, 0.0  ;;  %v9068_v56 = vld [vmem:[%s11636_s21 + $0x428] ss:$24 sps:$4 sm:$0xff]  }
 0x23c   :  { %v1647_v63 = vmax.f32 %v1636_v59, 0.0  ;;  %v9073_v59 = vld [vmem:[%s11636_s21 + $0x454] ss:$24 sps:$4 sm:$0xff]  }
 0x23d   :  { %v10633_v6 = vpack.c.bf16 %v1646_v61, %v1646_v61  ;;  %v9076_v61 = vld [vmem:[%s11636_s21 + $0x45c] ss:$24 sps:$4 sm:$0xff]  }
 0x23e   :  { %v10627_v0 = vpack.c.bf16 %v1647_v63, %v1647_v63 }
 0x240   :  { %4688 = vmatprep.mubr.bf16.mxu1 %v10627_v0  ;;  %4934 = vmatprep.mubr.bf16.mxu0 %v10627_v0  ;;  %v10639_v10 = vpop.f32.mrb[16].mxu0 }
 0x241   :  { %4689 = vmatmul.mubr.bf16.vlgmr.msra.gmra.mrb[20].mxu1 %v10633_v6  ;;  %4935 = vmatmul.mubr.bf16.vlgmr.msra.gmra.mrb[28].mxu0 %v10633_v6  ;;  %v1338_v12 = vpop.f32.mrb[17].mxu0 }
 0x242   :  { %4698 = vmatpush1.bf16.msra.mxu1 %v9029_v2  ;;  %4944 = vmatpush1.bf16.msra.mxu0 %v9032_v3  ;;  %v1339_v15 = vadd.f32 %v1338_v12, %v987_v4  ;;  %v1340_v17 = vpop.f32.mrb[18].mxu0  ;;  %v9071_v2 = vld [vmem:[%s11636_s21 + $0x450] ss:$24 sps:$4 sm:$0xff]   ;;  %v9079_v4 = vld [vmem:[%s11636_s21 + $0x484] ss:$24 sps:$4 sm:$0xff]  }
 0x243   :  { %4699 = vmatprep.subr.bf16.mxu1 %v9037_v7  ;;  %4945 = vmatprep.subr.bf16.mxu0 %v9040_v9  ;;  %v1341_v22 = vpop.f32.mrb[19].mxu0  ;;  %v9074_v3 = vld [vmem:[%s11636_s21 + $0x458] ss:$24 sps:$4 sm:$0xff]   ;;  %v9082_v7 = vld [vmem:[%s11636_s21 + $0x48c] ss:$24 sps:$4 sm:$0xff]  }
 0x244   :  { %v1568_v23 = vmul.f32 %v1525_v11, %v1339_v15  ;;  %v10651_v24 = vpop.f32.mrb[12].mxu1  ;;  %v9077_v9 = vld [vmem:[%s11636_s21 + $0x480] ss:$24 sps:$4 sm:$0xff]   ;;  %v9085_v12 = vld [vmem:[%s11636_s21 + $0x4b4] ss:$24 sps:$4 sm:$0xff]  }
 0x245   :  { %v10653_v25 = vpop.f32.mrb[13].mxu1  ;;  %v9080_v11 = vld [vmem:[%s11636_s21 + $0x488] ss:$24 sps:$4 sm:$0xff]   ;;  %v9086_v15 = vld [vmem:[%s11636_s21 + $0x4b8] ss:$24 sps:$4 sm:$0xff]  }
 0x246   :  { %4700 = vmatpush1.bf16.msra.mxu1 %v9035_v13  ;;  %4946 = vmatpush1.bf16.msra.mxu0 %v9038_v14  ;;  %v1638_v18 = vadd.f32 %v1595_v16, %v1568_v23  ;;  %v1381_v31 = vpop.f32.mrb[14].mxu1  ;;  %v9088_v13 = vld [vmem:[%s11636_s21 + $0x4bc] ss:$24 sps:$4 sm:$0xff]   ;;  %v9083_v14 = vld [vmem:[%s11636_s21 + $0x4b0] ss:$24 sps:$4 sm:$0xff]  }
 0x247   :  { %4701 = vmatprep.subr.bf16.mxu1 %v9043_v19  ;;  %4947 = vmatprep.subr.bf16.mxu0 %v9046_v21  ;;  %v1382_v34 = vpop.f32.mrb[15].mxu1  ;;  %v9091_v16 = vld [vmem:[%s11636_s21 + $0x4e4] ss:$24 sps:$4 sm:$0xff]   ;;  %v9089_v19 = vld [vmem:[%s11636_s21 + $0x4e0] ss:$24 sps:$4 sm:$0xff]  }
 0x248   :  { %v1649_v37 = vmax.f32 %v1638_v18, 0.0  ;;  %v9094_v17 = vld [vmem:[%s11636_s21 + $0x4ec] ss:$24 sps:$4 sm:$0xff]   ;;  %v9092_v21 = vld [vmem:[%s11636_s21 + $0x4e8] ss:$24 sps:$4 sm:$0xff]  }
 0x249   :  { %v9097_v22 = vld [vmem:[%s11636_s21 + $0x514] ss:$24 sps:$4 sm:$0xff]   ;;  %v9095_v18 = vld [vmem:[%s11636_s21 + $0x510] ss:$24 sps:$4 sm:$0xff]  }
 0x24a   :  { %4702 = vmatpush1.bf16.msra.mxu1 %v9041_v27  ;;  %4948 = vmatpush1.bf16.msra.mxu0 %v9044_v28  ;;  %v10661_v41 = vpack.c.bf16 %v1649_v37, %v1649_v37  ;;  %v9100_v23 = vld [vmem:[%s11636_s21 + $0x51c] ss:$24 sps:$4 sm:$0xff]   ;;  %v10700_v27 = vsub.s32 5, %v10415_v62  ;;  %v983_v28 = vrot.slane %v10599_v26, %v10446_v36  ;;  %v9098_v31 = vld [vmem:[%s11636_s21 + $0x518] ss:$24 sps:$4 sm:$0xff]  }
 0x24b   :  { %4703 = vmatprep.subr.bf16.mxu1 %v9049_v32  ;;  %4949 = vmatprep.subr.bf16.mxu0 %v9052_v33  ;;  %v9103_v32 = vld [vmem:[%s11636_s21 + $0x544] ss:$24 sps:$4 sm:$0xff]  }
 0x24c   :  { %4729 = vmatprep.mubr.bf16.mxu1 %v10661_v41  ;;  %4975 = vmatprep.mubr.bf16.mxu0 %v10661_v41  ;;  %v9106_v33 = vld [vmem:[%s11636_s21 + $0x54c] ss:$24 sps:$4 sm:$0xff]   ;;  %v995_v34 = vrot.slane %v10599_v26, %v10700_v27  ;;  %v1337_v37 = vadd.f32 %v10639_v10, %v983_v28  ;;  %v1533_v10 = vrot.slane %v10603_v29, %v10700_v27 }
 0x24e   :  { %4704 = vmatpush1.bf16.msra.mxu1 %v9047_v39  ;;  %4950 = vmatpush1.bf16.msra.mxu0 %v9050_v40  ;;  %v1521_v39 = vrot.slane %v10603_v29, %v10446_v36  ;;  %v9101_v40 = vld [vmem:[%s11636_s21 + $0x540] ss:$24 sps:$4 sm:$0xff]  }
 0x24f   :  { %4705 = vmatprep.subr.bf16.mxu1 %v9055_v42  ;;  %4951 = vmatprep.subr.bf16.mxu0 %v9058_v43  ;;  %v9104_v42 = vld [vmem:[%s11636_s21 + $0x548] ss:$24 sps:$4 sm:$0xff]   ;;  %v9109_v43 = vld [vmem:[%s11636_s21 + $0x574] ss:$24 sps:$4 sm:$0xff]  }
 0x252   :  { %4706 = vmatpush1.bf16.msra.mxu1 %v9053_v44  ;;  %4952 = vmatpush1.bf16.msra.mxu0 %v9056_v45  ;;  %v9112_v44 = vld [vmem:[%s11636_s21 + $0x57c] ss:$24 sps:$4 sm:$0xff]   ;;  %v10717_v45 = vpop.f32.mrb[20].mxu0 }
 0x253   :  { %4707 = vmatprep.subr.bf16.mxu1 %v9061_v46  ;;  %4953 = vmatprep.subr.bf16.mxu0 %v9064_v47  ;;  %v1380_v46 = vadd.f32 %v10653_v25, %v995_v34  ;;  %v1567_v47 = vmul.f32 %v1521_v39, %v1337_v37  ;;  %v9115_v25 = vld [vmem:[%s11636_s21 + $0x5a4] ss:$24 sps:$4 sm:$0xff]   ;;  %v9137_v34 = vld [vmem:[%s11636_s21 + $0x660] ss:$24 sps:$4 sm:$0xff]   ;;  %v9145_v39 = vld [vmem:[%s11636_s21 + $0x694] ss:$24 sps:$4 sm:$0xff]  }
 0x254   :  { %v10675_v53 = vpop.f32.mrb[16].mxu1  ;;  %v9140_v37 = vld [vmem:[%s11636_s21 + $0x668] ss:$24 sps:$4 sm:$0xff]  }
 0x255   :  { %v10677_v54 = vpop.f32.mrb[17].mxu1 }
 0x256   :  { %4708 = vmatpush1.bf16.msra.mxu1 %v9059_v48  ;;  %4954 = vmatpush1.bf16.msra.mxu0 %v9062_v49  ;;  %v1463_v57 = vpop.f32.mrb[18].mxu1  ;;  %v1591_v48 = vrot.slane %v10609_v35, %v10446_v36  ;;  %v9107_v49 = vld [vmem:[%s11636_s21 + $0x570] ss:$24 sps:$4 sm:$0xff]  }
 0x257   :  { %4709 = vmatprep.subr.bf16.mxu1 %v9067_v50  ;;  %4955 = vmatprep.subr.bf16.mxu0 %v9070_v51  ;;  %v1464_v63 = vpop.f32.mrb[19].mxu1  ;;  %v9110_v50 = vld [vmem:[%s11636_s21 + $0x578] ss:$24 sps:$4 sm:$0xff]   ;;  %v10726_v51 = vpop.f32.mrb[21].mxu0  ;;  %v1570_v57 = vmul.f32 %v1533_v10, %v1380_v46  ;;  %v9154_v46 = vld [vmem:[%s11636_s21 + $0x6cc] ss:$24 sps:$4 sm:$0xff]  }
 0x258   :  { %v1637_v63 = vadd.f32 %v1591_v48, %v1567_v47  ;;  %v9149_v10 = vld [vmem:[%s11636_s21 + $0x6c0] ss:$24 sps:$4 sm:$0xff]   ;;  %v9157_v48 = vld [vmem:[%s11636_s21 + $0x6f4] ss:$24 sps:$4 sm:$0xff]  }
 0x259   :  { %v9152_v47 = vld [vmem:[%s11636_s21 + $0x6c8] ss:$24 sps:$4 sm:$0xff]  }
 0x25a   :  { %4710 = vmatpush1.bf16.msra.mxu1 %v9065_v55  ;;  %4956 = vmatpush1.bf16.msra.mxu0 %v9068_v56  ;;  %v9118_v55 = vld [vmem:[%s11636_s21 + $0x5ac] ss:$24 sps:$4 sm:$0xff]   ;;  %v1422_v56 = vpop.f32.mrb[22].mxu0 }
 0x25b   :  { %4711 = vmatprep.subr.bf16.mxu1 %v9073_v59  ;;  %4957 = vmatprep.subr.bf16.mxu0 %v9076_v61  ;;  %v1603_v59 = vrot.slane %v10609_v35, %v10700_v27  ;;  %v1423_v61 = vpop.f32.mrb[23].mxu0  ;;  %v9166_v56 = vld [vmem:[%s11636_s21 + $0x72c] ss:$24 sps:$4 sm:$0xff]  }
 0x25c   :  { %v9169_v61 = vld [vmem:[%s11636_s21 + $0x754] ss:$24 sps:$4 sm:$0xff]  }
 0x25e   :  { %4712 = vmatpush1.bf16.msra.mxu1 %v9071_v2  ;;  %4958 = vmatpush1.bf16.msra.mxu0 %v9074_v3  ;;  %v9113_v2 = vld [vmem:[%s11636_s21 + $0x5a0] ss:$24 sps:$4 sm:$0xff]  }
 0x25f   :  { %4713 = vmatprep.subr.bf16.mxu1 %v9079_v4  ;;  %4959 = vmatprep.subr.bf16.mxu0 %v9082_v7  ;;  %v9116_v3 = vld [vmem:[%s11636_s21 + $0x5a8] ss:$24 sps:$4 sm:$0xff]   ;;  %v9121_v4 = vld [vmem:[%s11636_s21 + $0x5d4] ss:$24 sps:$4 sm:$0xff]  }
 0x260   :  { %v9124_v7 = vld [vmem:[%s11636_s21 + $0x5dc] ss:$24 sps:$4 sm:$0xff]  }
 0x262   :  { %4714 = vmatpush1.bf16.msra.mxu1 %v9077_v9  ;;  %4960 = vmatpush1.bf16.msra.mxu0 %v9080_v11  ;;  %v1640_v9 = vadd.f32 %v1603_v59, %v1570_v57  ;;  %v1648_v11 = vmax.f32 %v1637_v63, 0.0  ;;  %v9161_v57 = vld [vmem:[%s11636_s21 + $0x720] ss:$24 sps:$4 sm:$0xff]   ;;  %v9172_v63 = vld [vmem:[%s11636_s21 + $0x75c] ss:$24 sps:$4 sm:$0xff]  }
 0x263   :  { %4715 = vmatprep.subr.bf16.mxu1 %v9085_v12  ;;  %4961 = vmatprep.subr.bf16.mxu0 %v9088_v13  ;;  %v9119_v12 = vld [vmem:[%s11636_s21 + $0x5d0] ss:$24 sps:$4 sm:$0xff]  }
 0x264   :  { %v9122_v13 = vld [vmem:[%s11636_s21 + $0x5d8] ss:$24 sps:$4 sm:$0xff]   ;;  %v9164_v59 = vld [vmem:[%s11636_s21 + $0x728] ss:$24 sps:$4 sm:$0xff]  }
 0x266   :  { %4716 = vmatpush1.bf16.msra.mxu1 %v9083_v14  ;;  %4962 = vmatpush1.bf16.msra.mxu0 %v9086_v15  ;;  %v9127_v14 = vld [vmem:[%s11636_s21 + $0x604] ss:$24 sps:$4 sm:$0xff]  }
 0x267   :  { %4717 = vmatprep.subr.bf16.mxu1 %v9091_v16  ;;  %4963 = vmatprep.subr.bf16.mxu0 %v9094_v17  ;;  %v9130_v15 = vld [vmem:[%s11636_s21 + $0x60c] ss:$24 sps:$4 sm:$0xff]   ;;  %v1651_v16 = vmax.f32 %v1640_v9, 0.0  ;;  %v10740_v17 = vpack.c.bf16 %v1648_v11, %v1648_v11  ;;  %v9173_v9 = vld [vmem:[%s11636_s21 + $0x780] ss:$24 sps:$4 sm:$0xff]  }
 0x268   :  { %v9176_v11 = vld [vmem:[%s11636_s21 + $0x788] ss:$24 sps:$4 sm:$0xff]  }
 0x269   :  { %v10746_v28 = vpack.c.bf16 %v1651_v16, %v1651_v16  ;;  %v9187_v16 = vld [vmem:[%s11636_s21 + $0x7e4] ss:$24 sps:$4 sm:$0xff]  }
 0x26a   :  { %4718 = vmatpush1.bf16.msra.mxu1 %v9089_v19  ;;  %4964 = vmatpush1.bf16.msra.mxu0 %v9092_v21  ;;  %v9125_v19 = vld [vmem:[%s11636_s21 + $0x600] ss:$24 sps:$4 sm:$0xff]  }
 0x26b   :  { %4719 = vmatprep.subr.bf16.mxu1 %v9097_v22  ;;  %4965 = vmatprep.subr.bf16.mxu0 %v9100_v23  ;;  %v9128_v21 = vld [vmem:[%s11636_s21 + $0x608] ss:$24 sps:$4 sm:$0xff]   ;;  %v9133_v22 = vld [vmem:[%s11636_s21 + $0x634] ss:$24 sps:$4 sm:$0xff]  }
 0x26c   :  { %v9136_v23 = vld [vmem:[%s11636_s21 + $0x63c] ss:$24 sps:$4 sm:$0xff]  }
 0x26e   :  { %4720 = vmatpush1.bf16.msra.mxu1 %v9095_v18  ;;  %4966 = vmatpush1.bf16.msra.mxu0 %v9098_v31  ;;  %v9131_v18 = vld [vmem:[%s11636_s21 + $0x630] ss:$24 sps:$4 sm:$0xff]  }
 0x26f   :  { %4721 = vmatprep.subr.bf16.mxu1 %v9103_v32  ;;  %4967 = vmatprep.subr.bf16.mxu0 %v9106_v33  ;;  %v9134_v31 = vld [vmem:[%s11636_s21 + $0x638] ss:$24 sps:$4 sm:$0xff]   ;;  %v9139_v32 = vld [vmem:[%s11636_s21 + $0x664] ss:$24 sps:$4 sm:$0xff]  }
 0x270   :  { %v9142_v33 = vld [vmem:[%s11636_s21 + $0x66c] ss:$24 sps:$4 sm:$0xff]  }
 0x272   :  { %4722 = vmatpush1.bf16.msra.mxu1 %v9101_v40  ;;  %4968 = vmatpush1.bf16.msra.mxu0 %v9104_v42  ;;  %v9148_v40 = vld [vmem:[%s11636_s21 + $0x69c] ss:$24 sps:$4 sm:$0xff]   ;;  %v9143_v42 = vld [vmem:[%s11636_s21 + $0x690] ss:$24 sps:$4 sm:$0xff]  }
 0x273   :  { %4723 = vmatprep.subr.bf16.mxu1 %v9109_v43  ;;  %4969 = vmatprep.subr.bf16.mxu0 %v9112_v44  ;;  %v9146_v43 = vld [vmem:[%s11636_s21 + $0x698] ss:$24 sps:$4 sm:$0xff]   ;;  %v9151_v44 = vld [vmem:[%s11636_s21 + $0x6c4] ss:$24 sps:$4 sm:$0xff]  }
 0x276   :  { %4724 = vmatpush1.bf16.msra.mxu1 %v9107_v49  ;;  %4970 = vmatpush1.bf16.msra.mxu0 %v9110_v50  ;;  %v9160_v49 = vld [vmem:[%s11636_s21 + $0x6fc] ss:$24 sps:$4 sm:$0xff]   ;;  %v9155_v50 = vld [vmem:[%s11636_s21 + $0x6f0] ss:$24 sps:$4 sm:$0xff]  }
 0x277   :  { %4725 = vmatprep.subr.bf16.mxu1 %v9115_v25  ;;  %4971 = vmatprep.subr.bf16.mxu0 %v9118_v55  ;;  %v9158_v25 = vld [vmem:[%s11636_s21 + $0x6f8] ss:$24 sps:$4 sm:$0xff]   ;;  %v9163_v55 = vld [vmem:[%s11636_s21 + $0x724] ss:$24 sps:$4 sm:$0xff]  }
 0x27a   :  { %4726 = vmatpush1.bf16.msra.mxu1 %v9113_v2  ;;  %4972 = vmatpush1.bf16.msra.mxu0 %v9116_v3  ;;  %v9167_v2 = vld [vmem:[%s11636_s21 + $0x750] ss:$24 sps:$4 sm:$0xff]  }
 0x27b   :  { %4727 = vmatprep.subr.bf16.mxu1 %v9121_v4  ;;  %4973 = vmatprep.subr.bf16.mxu0 %v9124_v7  ;;  %v9170_v3 = vld [vmem:[%s11636_s21 + $0x758] ss:$24 sps:$4 sm:$0xff]   ;;  %v9175_v4 = vld [vmem:[%s11636_s21 + $0x784] ss:$24 sps:$4 sm:$0xff]  }
 0x27c   :  { %v9178_v7 = vld [vmem:[%s11636_s21 + $0x78c] ss:$24 sps:$4 sm:$0xff]  }
 0x27e   :  { %4728 = vmatpush1.bf16.msra.mxu1 %v9119_v12  ;;  %4974 = vmatpush1.bf16.msra.mxu0 %v9122_v13  ;;  %v9181_v12 = vld [vmem:[%s11636_s21 + $0x7b4] ss:$24 sps:$4 sm:$0xff]  }
 0x27f   :  { %4738 = vmatprep.subr.bf16.mxu1 %v9127_v14  ;;  %4984 = vmatprep.subr.bf16.mxu0 %v9130_v15  ;;  %v9184_v13 = vld [vmem:[%s11636_s21 + $0x7bc] ss:$24 sps:$4 sm:$0xff]   ;;  %v9179_v14 = vld [vmem:[%s11636_s21 + $0x7b0] ss:$24 sps:$4 sm:$0xff]  }
 0x280   :  { %v9182_v15 = vld [vmem:[%s11636_s21 + $0x7b8] ss:$24 sps:$4 sm:$0xff]  }
 0x281   :  { %4730 = vmatmul.mubr.bf16.vlgmr.msra.gmra.mrb[20].mxu1 %v10740_v17  ;;  %4976 = vmatmul.mubr.bf16.vlgmr.msra.gmra.mrb[28].mxu0 %v10740_v17 }
 0x282   :  { %4739 = vmatpush1.bf16.msra.mxu1 %v9125_v19  ;;  %4985 = vmatpush1.bf16.msra.mxu0 %v9128_v21  ;;  %v9190_v19 = vld [vmem:[%s11636_s21 + $0x7ec] ss:$24 sps:$4 sm:$0xff]   ;;  %v10789_v21 = vsub.s32 4, %v10415_v62 }
 0x283   :  { %4740 = vmatprep.subr.bf16.mxu1 %v9133_v22  ;;  %4986 = vmatprep.subr.bf16.mxu0 %v9136_v23  ;;  %v9185_v22 = vld [vmem:[%s11636_s21 + $0x7e0] ss:$24 sps:$4 sm:$0xff]  }
 0x284   :  { %4770 = vmatprep.mubr.bf16.mxu1 %v10746_v28  ;;  %5016 = vmatprep.mubr.bf16.mxu0 %v10746_v28  ;;  %v9188_v23 = vld [vmem:[%s11636_s21 + $0x7e8] ss:$24 sps:$4 sm:$0xff]  }
 0x286   :  { %4741 = vmatpush1.bf16.msra.mxu1 %v9131_v18  ;;  %4987 = vmatpush1.bf16.msra.mxu0 %v9134_v31  ;;  %v9193_v18 = vld [vmem:[%s11636_s21 + $0x814] ss:$24 sps:$4 sm:$0xff]  }
 0x287   :  { %4742 = vmatprep.subr.bf16.mxu1 %v9139_v32  ;;  %4988 = vmatprep.subr.bf16.mxu0 %v9142_v33  ;;  %v9196_v31 = vld [vmem:[%s11636_s21 + $0x81c] ss:$24 sps:$4 sm:$0xff]   ;;  %v1002_v32 = vsub.s32 7, %v10415_v62  ;;  %v991_v33 = vrot.slane %v10599_v26, %v10789_v21 }
 0x28a   :  { %4743 = vmatpush1.bf16.msra.mxu1 %v9137_v34  ;;  %4989 = vmatpush1.bf16.msra.mxu0 %v9140_v37  ;;  %v9191_v34 = vld [vmem:[%s11636_s21 + $0x810] ss:$24 sps:$4 sm:$0xff]  }
 0x28b   :  { %4744 = vmatprep.subr.bf16.mxu1 %v9145_v39  ;;  %4990 = vmatprep.subr.bf16.mxu0 %v9148_v40  ;;  %v9194_v37 = vld [vmem:[%s11636_s21 + $0x818] ss:$24 sps:$4 sm:$0xff]   ;;  %v9199_v39 = vld [vmem:[%s11636_s21 + $0x844] ss:$24 sps:$4 sm:$0xff]  }
 0x28c   :  { %v9202_v40 = vld [vmem:[%s11636_s21 + $0x84c] ss:$24 sps:$4 sm:$0xff]  }
 0x28e   :  { %4745 = vmatpush1.bf16.msra.mxu1 %v9143_v42  ;;  %4991 = vmatpush1.bf16.msra.mxu0 %v9146_v43  ;;  %v1003_v42 = vrot.slane %v10599_v26, %v1002_v32  ;;  %v1378_v43 = vadd.f32 %v10651_v24, %v991_v33 }
 0x28f   :  { %4746 = vmatprep.subr.bf16.mxu1 %v9151_v44  ;;  %4992 = vmatprep.subr.bf16.mxu0 %v9154_v46  ;;  %v1529_v44 = vrot.slane %v10603_v29, %v10789_v21  ;;  %v9197_v46 = vld [vmem:[%s11636_s21 + $0x840] ss:$24 sps:$4 sm:$0xff]  }
 0x291   :  { %v1569_v24 = vmul.f32 %v1529_v44, %v1378_v43  ;;  %v9235_v43 = vld [vmem:[%s11636_s21 + $0x964] ss:$24 sps:$4 sm:$0xff]  }
 0x292   :  { %4747 = vmatpush1.bf16.msra.mxu1 %v9149_v10  ;;  %4993 = vmatpush1.bf16.msra.mxu0 %v9152_v47  ;;  %v9200_v10 = vld [vmem:[%s11636_s21 + $0x848] ss:$24 sps:$4 sm:$0xff]   ;;  %v9205_v47 = vld [vmem:[%s11636_s21 + $0x874] ss:$24 sps:$4 sm:$0xff]  }
 0x293   :  { %4748 = vmatprep.subr.bf16.mxu1 %v9157_v48  ;;  %4994 = vmatprep.subr.bf16.mxu0 %v9160_v49  ;;  %v9208_v48 = vld [vmem:[%s11636_s21 + $0x87c] ss:$24 sps:$4 sm:$0xff]   ;;  %v1421_v49 = vadd.f32 %v10726_v51, %v1003_v42  ;;  %v9238_v44 = vld [vmem:[%s11636_s21 + $0x96c] ss:$24 sps:$4 sm:$0xff]  }
 0x296   :  { %4749 = vmatpush1.bf16.msra.mxu1 %v9155_v50  ;;  %4995 = vmatpush1.bf16.msra.mxu0 %v9158_v25  ;;  %v1541_v50 = vrot.slane %v10603_v29, %v1002_v32  ;;  %v1599_v25 = vrot.slane %v10609_v35, %v10789_v21 }
 0x297   :  { %4750 = vmatprep.subr.bf16.mxu1 %v9163_v55  ;;  %4996 = vmatprep.subr.bf16.mxu0 %v9166_v56  ;;  %v9203_v55 = vld [vmem:[%s11636_s21 + $0x870] ss:$24 sps:$4 sm:$0xff]  }
 0x298   :  { %v9206_v56 = vld [vmem:[%s11636_s21 + $0x878] ss:$24 sps:$4 sm:$0xff]   ;;  %v1572_v51 = vmul.f32 %v1541_v50, %v1421_v49 }
 0x299   :  { %v9239_v49 = vld [vmem:[%s11636_s21 + $0x990] ss:$24 sps:$4 sm:$0xff]  }
 0x29a   :  { %4751 = vmatpush1.bf16.msra.mxu1 %v9161_v57  ;;  %4997 = vmatpush1.bf16.msra.mxu0 %v9164_v59  ;;  %v9211_v57 = vld [vmem:[%s11636_s21 + $0x8a4] ss:$24 sps:$4 sm:$0xff]   ;;  %v9242_v50 = vld [vmem:[%s11636_s21 + $0x998] ss:$24 sps:$4 sm:$0xff]  }
 0x29b   :  { %4752 = vmatprep.subr.bf16.mxu1 %v9169_v61  ;;  %4998 = vmatprep.subr.bf16.mxu0 %v9172_v63  ;;  %v9214_v59 = vld [vmem:[%s11636_s21 + $0x8ac] ss:$24 sps:$4 sm:$0xff]   ;;  %v1611_v61 = vrot.slane %v10609_v35, %v1002_v32  ;;  %v1639_v63 = vadd.f32 %v1599_v25, %v1569_v24  ;;  %v10833_v32 = vpop.f32.mrb[24].mxu0 }
 0x29c   :  { %v9247_v24 = vld [vmem:[%s11636_s21 + $0x9c4] ss:$24 sps:$4 sm:$0xff]  }
 0x29d   :  { %v9250_v25 = vld [vmem:[%s11636_s21 + $0x9cc] ss:$24 sps:$4 sm:$0xff]  }
 0x29e   :  { %4753 = vmatpush1.bf16.msra.mxu1 %v9167_v2  ;;  %4999 = vmatpush1.bf16.msra.mxu0 %v9170_v3  ;;  %v9209_v2 = vld [vmem:[%s11636_s21 + $0x8a0] ss:$24 sps:$4 sm:$0xff]  }
 0x29f   :  { %4754 = vmatprep.subr.bf16.mxu1 %v9175_v4  ;;  %5000 = vmatprep.subr.bf16.mxu0 %v9178_v7  ;;  %v9212_v3 = vld [vmem:[%s11636_s21 + $0x8a8] ss:$24 sps:$4 sm:$0xff]   ;;  %v9217_v4 = vld [vmem:[%s11636_s21 + $0x8d4] ss:$24 sps:$4 sm:$0xff]  }
 0x2a0   :  { %v9220_v7 = vld [vmem:[%s11636_s21 + $0x8dc] ss:$24 sps:$4 sm:$0xff]  }
 0x2a2   :  { %4755 = vmatpush1.bf16.msra.mxu1 %v9173_v9  ;;  %5001 = vmatpush1.bf16.msra.mxu0 %v9176_v11  ;;  %v1642_v9 = vadd.f32 %v1611_v61, %v1572_v51  ;;  %v1650_v11 = vmax.f32 %v1639_v63, 0.0  ;;  %v9251_v51 = vld [vmem:[%s11636_s21 + $0x9f0] ss:$24 sps:$4 sm:$0xff]   ;;  %v9259_v63 = vld [vmem:[%s11636_s21 + $0xa24] ss:$24 sps:$4 sm:$0xff]  }
 0x2a3   :  { %4756 = vmatprep.subr.bf16.mxu1 %v9181_v12  ;;  %5002 = vmatprep.subr.bf16.mxu0 %v9184_v13  ;;  %v9215_v12 = vld [vmem:[%s11636_s21 + $0x8d0] ss:$24 sps:$4 sm:$0xff]  }
 0x2a4   :  { %v9218_v13 = vld [vmem:[%s11636_s21 + $0x8d8] ss:$24 sps:$4 sm:$0xff]  }
 0x2a5   :  { %v9254_v61 = vld [vmem:[%s11636_s21 + $0x9f8] ss:$24 sps:$4 sm:$0xff]  }
 0x2a6   :  { %4757 = vmatpush1.bf16.msra.mxu1 %v9179_v14  ;;  %5003 = vmatpush1.bf16.msra.mxu0 %v9182_v15  ;;  %v9223_v14 = vld [vmem:[%s11636_s21 + $0x904] ss:$24 sps:$4 sm:$0xff]  }
 0x2a7   :  { %4758 = vmatprep.subr.bf16.mxu1 %v9187_v16  ;;  %5004 = vmatprep.subr.bf16.mxu0 %v9190_v19  ;;  %v9226_v15 = vld [vmem:[%s11636_s21 + $0x90c] ss:$24 sps:$4 sm:$0xff]   ;;  %v1653_v16 = vmax.f32 %v1642_v9, 0.0  ;;  %v10827_v19 = vpack.c.bf16 %v1650_v11, %v1650_v11  ;;  %v9268_v9 = vld [vmem:[%s11636_s21 + $0xa5c] ss:$24 sps:$4 sm:$0xff]  }
 0x2a8   :  { %v9263_v11 = vld [vmem:[%s11636_s21 + $0xa50] ss:$24 sps:$4 sm:$0xff]  }
 0x2a9   :  { %v10835_v33 = vpack.c.bf16 %v1653_v16, %v1653_v16  ;;  %v9272_v16 = vld [vmem:[%s11636_s21 + $0xa88] ss:$24 sps:$4 sm:$0xff]  }
 0x2aa   :  { %4759 = vmatpush1.bf16.msra.mxu1 %v9185_v22  ;;  %5005 = vmatpush1.bf16.msra.mxu0 %v9188_v23  ;;  %v9221_v22 = vld [vmem:[%s11636_s21 + $0x900] ss:$24 sps:$4 sm:$0xff]  }
 0x2ab   :  { %4760 = vmatprep.subr.bf16.mxu1 %v9193_v18  ;;  %5006 = vmatprep.subr.bf16.mxu0 %v9196_v31  ;;  %v9224_v23 = vld [vmem:[%s11636_s21 + $0x908] ss:$24 sps:$4 sm:$0xff]   ;;  %v9229_v18 = vld [vmem:[%s11636_s21 + $0x934] ss:$24 sps:$4 sm:$0xff]  }
 0x2ac   :  { %v9232_v31 = vld [vmem:[%s11636_s21 + $0x93c] ss:$24 sps:$4 sm:$0xff]  }
 0x2ae   :  { %4761 = vmatpush1.bf16.msra.mxu1 %v9191_v34  ;;  %5007 = vmatpush1.bf16.msra.mxu0 %v9194_v37  ;;  %v8578_v34 = vpop.f32.mrb[25].mxu0 }
 0x2af   :  { %4762 = vmatprep.subr.bf16.mxu1 %v9199_v39  ;;  %5008 = vmatprep.subr.bf16.mxu0 %v9202_v40  ;;  %v1503_v37 = vpop.f32.mrb[26].mxu0  ;;  %v9227_v39 = vld [vmem:[%s11636_s21 + $0x930] ss:$24 sps:$4 sm:$0xff]   ;;  %v9283_v34 = vld [vmem:[%s11636_s21 + $0xae4] ss:$24 sps:$4 sm:$0xff]  }
 0x2b0   :  { %v9230_v40 = vld [vmem:[%s11636_s21 + $0x938] ss:$24 sps:$4 sm:$0xff]   ;;  %v8579_v42 = vpop.f32.mrb[27].mxu0  ;;  %v9286_v37 = vld [vmem:[%s11636_s21 + $0xaec] ss:$24 sps:$4 sm:$0xff]  }
 0x2b1   :  { %v9284_v42 = vld [vmem:[%s11636_s21 + $0xae8] ss:$24 sps:$4 sm:$0xff]  }
 0x2b2   :  { %4763 = vmatpush1.bf16.msra.mxu1 %v9197_v46  ;;  %5009 = vmatpush1.bf16.msra.mxu0 %v9200_v10  ;;  %v9233_v46 = vld [vmem:[%s11636_s21 + $0x960] ss:$24 sps:$4 sm:$0xff]  }
 0x2b3   :  { %4764 = vmatprep.subr.bf16.mxu1 %v9205_v47  ;;  %5010 = vmatprep.subr.bf16.mxu0 %v9208_v48  ;;  %v9236_v10 = vld [vmem:[%s11636_s21 + $0x968] ss:$24 sps:$4 sm:$0xff]   ;;  %v9241_v47 = vld [vmem:[%s11636_s21 + $0x994] ss:$24 sps:$4 sm:$0xff]  }
 0x2b4   :  { %v9244_v48 = vld [vmem:[%s11636_s21 + $0x99c] ss:$24 sps:$4 sm:$0xff]  }
 0x2b6   :  { %4765 = vmatpush1.bf16.msra.mxu1 %v9203_v55  ;;  %5011 = vmatpush1.bf16.msra.mxu0 %v9206_v56  ;;  %v9245_v55 = vld [vmem:[%s11636_s21 + $0x9c0] ss:$24 sps:$4 sm:$0xff]  }
 0x2b7   :  { %4766 = vmatprep.subr.bf16.mxu1 %v9211_v57  ;;  %5012 = vmatprep.subr.bf16.mxu0 %v9214_v59  ;;  %v9248_v56 = vld [vmem:[%s11636_s21 + $0x9c8] ss:$24 sps:$4 sm:$0xff]   ;;  %v9253_v57 = vld [vmem:[%s11636_s21 + $0x9f4] ss:$24 sps:$4 sm:$0xff]  }
 0x2b8   :  { %v9256_v59 = vld [vmem:[%s11636_s21 + $0x9fc] ss:$24 sps:$4 sm:$0xff]  }
 0x2ba   :  { %4767 = vmatpush1.bf16.msra.mxu1 %v9209_v2  ;;  %5013 = vmatpush1.bf16.msra.mxu0 %v9212_v3  ;;  %v9262_v2 = vld [vmem:[%s11636_s21 + $0xa2c] ss:$24 sps:$4 sm:$0xff]   ;;  %v9257_v3 = vld [vmem:[%s11636_s21 + $0xa20] ss:$24 sps:$4 sm:$0xff]  }
 0x2bb   :  { %4768 = vmatprep.subr.bf16.mxu1 %v9217_v4  ;;  %5014 = vmatprep.subr.bf16.mxu0 %v9220_v7  ;;  %v9260_v4 = vld [vmem:[%s11636_s21 + $0xa28] ss:$24 sps:$4 sm:$0xff]   ;;  %v9265_v7 = vld [vmem:[%s11636_s21 + $0xa54] ss:$24 sps:$4 sm:$0xff]  }
 0x2be   :  { %4769 = vmatpush1.bf16.msra.mxu1 %v9215_v12  ;;  %5015 = vmatpush1.bf16.msra.mxu0 %v9218_v13  ;;  %v9266_v12 = vld [vmem:[%s11636_s21 + $0xa58] ss:$24 sps:$4 sm:$0xff]   ;;  %v9271_v13 = vld [vmem:[%s11636_s21 + $0xa84] ss:$24 sps:$4 sm:$0xff]  }
 0x2bf   :  { %4779 = vmatprep.subr.bf16.mxu1 %v9223_v14  ;;  %5025 = vmatprep.subr.bf16.mxu0 %v9226_v15  ;;  %v9274_v14 = vld [vmem:[%s11636_s21 + $0xa8c] ss:$24 sps:$4 sm:$0xff]   ;;  %v9269_v15 = vld [vmem:[%s11636_s21 + $0xa80] ss:$24 sps:$4 sm:$0xff]  }
 0x2c1   :  { %4771 = vmatmul.mubr.bf16.vlgmr.msra.gmra.mrb[20].mxu1 %v10827_v19  ;;  %5017 = vmatmul.mubr.bf16.vlgmr.msra.gmra.mrb[28].mxu0 %v10827_v19 }
 0x2c2   :  { %4780 = vmatpush1.bf16.msra.mxu1 %v9221_v22  ;;  %5026 = vmatpush1.bf16.msra.mxu0 %v9224_v23  ;;  %v9277_v22 = vld [vmem:[%s11636_s21 + $0xab4] ss:$24 sps:$4 sm:$0xff]  }
 0x2c3   :  { %4781 = vmatprep.subr.bf16.mxu1 %v9229_v18  ;;  %5027 = vmatprep.subr.bf16.mxu0 %v9232_v31  ;;  %v9280_v23 = vld [vmem:[%s11636_s21 + $0xabc] ss:$24 sps:$4 sm:$0xff]   ;;  %v9275_v18 = vld [vmem:[%s11636_s21 + $0xab0] ss:$24 sps:$4 sm:$0xff]  }
 0x2c4   :  { %4811 = vmatprep.mubr.bf16.mxu1 %v10835_v33  ;;  %5057 = vmatprep.mubr.bf16.mxu0 %v10835_v33  ;;  %v9278_v31 = vld [vmem:[%s11636_s21 + $0xab8] ss:$24 sps:$4 sm:$0xff]  }
 0x2c6   :  { %4782 = vmatpush1.bf16.msra.mxu1 %v9227_v39  ;;  %5028 = vmatpush1.bf16.msra.mxu0 %v9230_v40  ;;  %v998_v39 = vsub.s32 6, %v10415_v62  ;;  %v9281_v40 = vld [vmem:[%s11636_s21 + $0xae0] ss:$24 sps:$4 sm:$0xff]   ;;  %v9287_v62 = vld [vmem:[%s11636_s21 + $0xb10] ss:$24 sps:$4 sm:$0xff]  }
 0x2c7   :  { %4783 = vmatprep.subr.bf16.mxu1 %v9235_v43  ;;  %5029 = vmatprep.subr.bf16.mxu0 %v9238_v44  ;;  %v9289_v43 = vld [vmem:[%s11636_s21 + $0xb14] ss:$24 sps:$4 sm:$0xff]  }
 0x2c8   :  { %v9292_v44 = vld [vmem:[%s11636_s21 + $0xb1c] ss:$24 sps:$4 sm:$0xff]  }
 0x2ca   :  { %4784 = vmatpush1.bf16.msra.mxu1 %v9233_v46  ;;  %5030 = vmatpush1.bf16.msra.mxu0 %v9236_v10  ;;  %v10883_v46 = vld [vmem:[%s11638_s29 + $0x8] sm:$0x7]  ;;  %v999_v10 = vrot.slane %v10599_v26, %v998_v39  ;;  %v1537_v26 = vrot.slane %v10603_v29, %v998_v39  ;;  %s9885_s29 = scalar_lea.vmem %s7523_s13, 128 }
 0x2cb   :  { %4785 = vmatprep.subr.bf16.mxu1 %v9241_v47  ;;  %5031 = vmatprep.subr.bf16.mxu0 %v9244_v48  ;;  %v9290_v47 = vld [vmem:[%s11636_s21 + $0xb18] ss:$24 sps:$4 sm:$0xff]   ;;  %v9295_v48 = vld [vmem:[%s11636_s21 + $0xb44] ss:$24 sps:$4 sm:$0xff]   ;;  %p9886_p0 = scmp.ne.s32.totalorder %s7523_s13, %s9885_s29  ;;  %p9891_p2 = scmp.lt.s32.totalorder %s9885_s29, %s9885_s29 }
 0x2cd   :  { %p9892_p3 = por %p9891_p2, %p9890_p1 }
 0x2ce   :  { %4786 = vmatpush1.bf16.msra.mxu1 %v9239_v49  ;;  %5032 = vmatpush1.bf16.msra.mxu0 %v9242_v50  ;;  %v9298_v49 = vld [vmem:[%s11636_s21 + $0xb4c] ss:$24 sps:$4 sm:$0xff]   ;;  %v1011_v50 = vrot.slane %v10883_v46, %v10429_v8 }
 0x2cf   :  { %4787 = vmatprep.subr.bf16.mxu1 %v9247_v24  ;;  %5033 = vmatprep.subr.bf16.mxu0 %v9250_v25  ;;  %v10893_v24 = vld [vmem:[%s11640_s8 + $0x8] sm:$0x7]  ;;  %v1419_v25 = vadd.f32 %v10717_v45, %v999_v10  ;;  %p9893_p4 = pnand %p9892_p3, %p9886_p0 }
 0x2d0   :  { %v10905_v45 = vld [vmem:[%s11642_s19 + $0x8] sm:$0x7] }
 0x2d1   :  { %v1571_v29 = vmul.f32 %v1537_v26, %v1419_v25  ;;  %v9323_v10 = vld [vmem:[%s11636_s21 + $0xc30] ss:$24 sps:$4 sm:$0xff]   ;;  %v9337_v25 = vld [vmem:[%s11636_s21 + $0xc94] ss:$24 sps:$4 sm:$0xff]  }
 0x2d2   :  { %4788 = vmatpush1.bf16.msra.mxu1 %v9245_v55  ;;  %5034 = vmatpush1.bf16.msra.mxu0 %v9248_v56  ;;  %v9293_v55 = vld [vmem:[%s11636_s21 + $0xb40] ss:$24 sps:$4 sm:$0xff]   ;;  %v9340_v26 = vld [vmem:[%s11636_s21 + $0xc9c] ss:$24 sps:$4 sm:$0xff]  }
 0x2d3   :  { %4789 = vmatprep.subr.bf16.mxu1 %v9253_v57  ;;  %5035 = vmatprep.subr.bf16.mxu0 %v9256_v59  ;;  %v9296_v56 = vld [vmem:[%s11636_s21 + $0xb48] ss:$24 sps:$4 sm:$0xff]   ;;  %v9301_v57 = vld [vmem:[%s11636_s21 + $0xb74] ss:$24 sps:$4 sm:$0xff]  }
 0x2d4   :  { %v9304_v59 = vld [vmem:[%s11636_s21 + $0xb7c] ss:$24 sps:$4 sm:$0xff]  }
 0x2d6   :  { %4790 = vmatpush1.bf16.msra.mxu1 %v9251_v51  ;;  %5036 = vmatpush1.bf16.msra.mxu0 %v9254_v61  ;;  %v1462_v51 = vadd.f32 %v10677_v54, %v1011_v50  ;;  %v1549_v61 = vrot.slane %v10893_v24, %v10429_v8  ;;  %v9310_v54 = vld [vmem:[%s11636_s21 + $0xbac] ss:$24 sps:$4 sm:$0xff]   ;;  %v9332_v50 = vld [vmem:[%s11636_s21 + $0xc68] ss:$24 sps:$4 sm:$0xff]  }
 0x2d7   :  { %4791 = vmatprep.subr.bf16.mxu1 %v9259_v63  ;;  %5037 = vmatprep.subr.bf16.mxu0 %v9262_v2  ;;  %v1607_v63 = vrot.slane %v10609_v35, %v998_v39  ;;  %v9299_v2 = vld [vmem:[%s11636_s21 + $0xb70] ss:$24 sps:$4 sm:$0xff]   ;;  %v9305_v35 = vld [vmem:[%s11636_s21 + $0xba0] ss:$24 sps:$4 sm:$0xff]  }
 0x2d8   :  { %v9317_v39 = vld [vmem:[%s11636_s21 + $0xc00] ss:$24 sps:$4 sm:$0xff]  }
 0x2da   :  { %4792 = vmatpush1.bf16.msra.mxu1 %v9257_v3  ;;  %5038 = vmatpush1.bf16.msra.mxu0 %v9260_v4  ;;  %v9302_v3 = vld [vmem:[%s11636_s21 + $0xb78] ss:$24 sps:$4 sm:$0xff]   ;;  %v9307_v4 = vld [vmem:[%s11636_s21 + $0xba4] ss:$24 sps:$4 sm:$0xff]  }
 0x2db   :  { %4793 = vmatprep.subr.bf16.mxu1 %v9265_v7  ;;  %5039 = vmatprep.subr.bf16.mxu0 %v9268_v9  ;;  %v1574_v7 = vmul.f32 %v1549_v61, %v1462_v51  ;;  %v1619_v9 = vrot.slane %v10905_v45, %v10429_v8  ;;  %v9341_v51 = vld [vmem:[%s11636_s21 + $0xcc0] ss:$24 sps:$4 sm:$0xff]  }
 0x2dc   :  { %v9344_v61 = vld [vmem:[%s11636_s21 + $0xcc8] ss:$24 sps:$4 sm:$0xff]  }
 0x2de   :  { %4794 = vmatpush1.bf16.msra.mxu1 %v9263_v11  ;;  %5040 = vmatpush1.bf16.msra.mxu0 %v9266_v12  ;;  %v1641_v11 = vadd.f32 %v1607_v63, %v1571_v29  ;;  %v9308_v12 = vld [vmem:[%s11636_s21 + $0xba8] ss:$24 sps:$4 sm:$0xff]   ;;  %v9349_v29 = vld [vmem:[%s11636_s21 + $0xcf4] ss:$24 sps:$4 sm:$0xff]  }
 0x2df   :  { %4795 = vmatprep.subr.bf16.mxu1 %v9271_v13  ;;  %5041 = vmatprep.subr.bf16.mxu0 %v9274_v14  ;;  %v9313_v13 = vld [vmem:[%s11636_s21 + $0xbd4] ss:$24 sps:$4 sm:$0xff]  }
 0x2e0   :  { %v9316_v14 = vld [vmem:[%s11636_s21 + $0xbdc] ss:$24 sps:$4 sm:$0xff]  }
 0x2e1   :  { %v9352_v63 = vld [vmem:[%s11636_s21 + $0xcfc] ss:$24 sps:$4 sm:$0xff]  }
 0x2e2   :  { %4796 = vmatpush1.bf16.msra.mxu1 %v9269_v15  ;;  %5042 = vmatpush1.bf16.msra.mxu0 %v9272_v16  ;;  %v1644_v15 = vadd.f32 %v1619_v9, %v1574_v7  ;;  %v1652_v16 = vmax.f32 %v1641_v11, 0.0  ;;  %v9353_v7 = vld [vmem:[%s11636_s21 + $0xd20] ss:$24 sps:$4 sm:$0xff]   ;;  %v9361_v11 = vld [vmem:[%s11636_s21 + $0xd54] ss:$24 sps:$4 sm:$0xff]  }
 0x2e3   :  { %4797 = vmatprep.subr.bf16.mxu1 %v9277_v22  ;;  %5043 = vmatprep.subr.bf16.mxu0 %v9280_v23  ;;  %v9311_v22 = vld [vmem:[%s11636_s21 + $0xbd0] ss:$24 sps:$4 sm:$0xff]  }
 0x2e4   :  { %v9314_v23 = vld [vmem:[%s11636_s21 + $0xbd8] ss:$24 sps:$4 sm:$0xff]   ;;  %v9356_v9 = vld [vmem:[%s11636_s21 + $0xd28] ss:$24 sps:$4 sm:$0xff]  }
 0x2e6   :  { %4798 = vmatpush1.bf16.msra.mxu1 %v9275_v18  ;;  %5044 = vmatpush1.bf16.msra.mxu0 %v9278_v31  ;;  %v9319_v18 = vld [vmem:[%s11636_s21 + $0xc04] ss:$24 sps:$4 sm:$0xff]  }
 0x2e7   :  { %4799 = vmatprep.subr.bf16.mxu1 %v9283_v34  ;;  %5045 = vmatprep.subr.bf16.mxu0 %v9286_v37  ;;  %v9322_v31 = vld [vmem:[%s11636_s21 + $0xc0c] ss:$24 sps:$4 sm:$0xff]   ;;  %v1655_v34 = vmax.f32 %v1644_v15, 0.0  ;;  %v10922_v37 = vpack.c.bf16 %v1652_v16, %v1652_v16  ;;  %v9365_v16 = vld [vmem:[%s11636_s21 + $0xd80] ss:$24 sps:$4 sm:$0xff]  }
 0x2e8   :  { %v9370_v15 = vld [vmem:[%s11636_s21 + $0xd8c] ss:$24 sps:$4 sm:$0xff]  }
 0x2ea   :  { %4800 = vmatpush1.bf16.msra.mxu1 %v9281_v40  ;;  %5046 = vmatpush1.bf16.msra.mxu0 %v9284_v42  ;;  %v9320_v40 = vld [vmem:[%s11636_s21 + $0xc08] ss:$24 sps:$4 sm:$0xff]   ;;  %v10926_v42 = vpack.c.bf16 %v1655_v34, %v1655_v34  ;;  %v9374_v34 = vld [vmem:[%s11636_s21 + $0xdb8] ss:$24 sps:$4 sm:$0xff]  }
 0x2eb   :  { %4801 = vmatprep.subr.bf16.mxu1 %v9289_v43  ;;  %5047 = vmatprep.subr.bf16.mxu0 %v9292_v44  ;;  %v9325_v43 = vld [vmem:[%s11636_s21 + $0xc34] ss:$24 sps:$4 sm:$0xff]  }
 0x2ec   :  { %v9328_v44 = vld [vmem:[%s11636_s21 + $0xc3c] ss:$24 sps:$4 sm:$0xff]  }
 0x2ee   :  { %4802 = vmatpush1.bf16.msra.mxu1 %v9287_v62  ;;  %5048 = vmatpush1.bf16.msra.mxu0 %v9290_v47  ;;  %v9326_v62 = vld [vmem:[%s11636_s21 + $0xc38] ss:$24 sps:$4 sm:$0xff]   ;;  %v9331_v47 = vld [vmem:[%s11636_s21 + $0xc64] ss:$24 sps:$4 sm:$0xff]  }
 0x2ef   :  { %4803 = vmatprep.subr.bf16.mxu1 %v9295_v48  ;;  %5049 = vmatprep.subr.bf16.mxu0 %v9298_v49  ;;  %v9334_v48 = vld [vmem:[%s11636_s21 + $0xc6c] ss:$24 sps:$4 sm:$0xff]   ;;  %v9329_v49 = vld [vmem:[%s11636_s21 + $0xc60] ss:$24 sps:$4 sm:$0xff]  }
 0x2f2   :  { %4804 = vmatpush1.bf16.msra.mxu1 %v9293_v55  ;;  %5050 = vmatpush1.bf16.msra.mxu0 %v9296_v56  ;;  %v9335_v55 = vld [vmem:[%s11636_s21 + $0xc90] ss:$24 sps:$4 sm:$0xff]  }
 0x2f3   :  { %4805 = vmatprep.subr.bf16.mxu1 %v9301_v57  ;;  %5051 = vmatprep.subr.bf16.mxu0 %v9304_v59  ;;  %v9338_v56 = vld [vmem:[%s11636_s21 + $0xc98] ss:$24 sps:$4 sm:$0xff]   ;;  %v9343_v57 = vld [vmem:[%s11636_s21 + $0xcc4] ss:$24 sps:$4 sm:$0xff]  }
 0x2f4   :  { %v9346_v59 = vld [vmem:[%s11636_s21 + $0xccc] ss:$24 sps:$4 sm:$0xff]  }
 0x2f6   :  { %4806 = vmatpush1.bf16.msra.mxu1 %v9299_v2  ;;  %5052 = vmatpush1.bf16.msra.mxu0 %v9302_v3  ;;  %v9347_v2 = vld [vmem:[%s11636_s21 + $0xcf0] ss:$24 sps:$4 sm:$0xff]  }
 0x2f7   :  { %4807 = vmatprep.subr.bf16.mxu1 %v9307_v4  ;;  %5053 = vmatprep.subr.bf16.mxu0 %v9310_v54  ;;  %v9350_v3 = vld [vmem:[%s11636_s21 + $0xcf8] ss:$24 sps:$4 sm:$0xff]   ;;  %v9355_v4 = vld [vmem:[%s11636_s21 + $0xd24] ss:$24 sps:$4 sm:$0xff]  }
 0x2f8   :  { %v9358_v54 = vld [vmem:[%s11636_s21 + $0xd2c] ss:$24 sps:$4 sm:$0xff]  }
 0x2fa   :  { %4808 = vmatpush1.bf16.msra.mxu1 %v9305_v35  ;;  %5054 = vmatpush1.bf16.msra.mxu0 %v9308_v12  ;;  %v9364_v35 = vld [vmem:[%s11636_s21 + $0xd5c] ss:$24 sps:$4 sm:$0xff]   ;;  %v9359_v12 = vld [vmem:[%s11636_s21 + $0xd50] ss:$24 sps:$4 sm:$0xff]  }
 0x2fb   :  { %4809 = vmatprep.subr.bf16.mxu1 %v9313_v13  ;;  %5055 = vmatprep.subr.bf16.mxu0 %v9316_v14  ;;  %v9362_v13 = vld [vmem:[%s11636_s21 + $0xd58] ss:$24 sps:$4 sm:$0xff]   ;;  %v9367_v14 = vld [vmem:[%s11636_s21 + $0xd84] ss:$24 sps:$4 sm:$0xff]  }
 0x2fe   :  { %4810 = vmatpush1.bf16.msra.mxu1 %v9311_v22  ;;  %5056 = vmatpush1.bf16.msra.mxu0 %v9314_v23  ;;  %v9368_v22 = vld [vmem:[%s11636_s21 + $0xd88] ss:$24 sps:$4 sm:$0xff]   ;;  %v9373_v23 = vld [vmem:[%s11636_s21 + $0xdb4] ss:$24 sps:$4 sm:$0xff]  }
 0x2ff   :  { %4820 = vmatprep.subr.bf16.mxu1 %v9319_v18  ;;  %5066 = vmatprep.subr.bf16.mxu0 %v9322_v31  ;;  %v9376_v18 = vld [vmem:[%s11636_s21 + $0xdbc] ss:$24 sps:$4 sm:$0xff]   ;;  %v9371_v31 = vld [vmem:[%s11636_s21 + $0xdb0] ss:$24 sps:$4 sm:$0xff]  }
 0x301   :  { %4812 = vmatmul.mubr.bf16.vlgmr.msra.gmra.mrb[20].mxu1 %v10922_v37  ;;  %5058 = vmatmul.mubr.bf16.vlgmr.msra.gmra.mrb[28].mxu0 %v10922_v37 }
 0x302   :  { %4821 = vmatpush1.bf16.msra.mxu1 %v9317_v39  ;;  %4852 = vmatprep.mubr.bf16.mxu1 %v10926_v42  ;;  %v9379_v39 = vld [vmem:[%s11636_s21 + $0xde4] ss:$24 sps:$4 sm:$0xff]  }
 0x303   :  { %5067 = vmatpush1.bf16.msra.mxu0 %v9320_v40  ;;  %5098 = vmatprep.mubr.bf16.mxu0 %v10926_v42  ;;  %v9382_v40 = vld [vmem:[%s11636_s21 + $0xdec] ss:$24 sps:$4 sm:$0xff]  }
 0x304   :  { %4822 = vmatprep.subr.bf16.mxu1 %v9325_v43  ;;  %5068 = vmatprep.subr.bf16.mxu0 %v9328_v44  ;;  %v9377_v43 = vld [vmem:[%s11636_s21 + $0xde0] ss:$24 sps:$4 sm:$0xff]  }
 0x305   :  { %v9380_v44 = vld [vmem:[%s11636_s21 + $0xde8] ss:$24 sps:$4 sm:$0xff]  }
 0x306   :  { %4823 = vmatpush1.bf16.msra.mxu1 %v9323_v10  ;;  %v9385_v10 = vld [vmem:[%s11636_s21 + $0xe14] ss:$24 sps:$4 sm:$0xff]  }
 0x307   :  { %5069 = vmatpush1.bf16.msra.mxu0 %v9326_v62  ;;  %4824 = vmatprep.subr.bf16.mxu1 %v9331_v47  ;;  %v9388_v62 = vld [vmem:[%s11636_s21 + $0xe1c] ss:$24 sps:$4 sm:$0xff]   ;;  %v9383_v47 = vld [vmem:[%s11636_s21 + $0xe10] ss:$24 sps:$4 sm:$0xff]  }
 0x308   :  { %5070 = vmatprep.subr.bf16.mxu0 %v9334_v48  ;;  %v1007_v48 = vrot.slane %v10883_v46, %v10424_v5 }
 0x30a   :  { %4825 = vmatpush1.bf16.msra.mxu1 %v9329_v49  ;;  %v9386_v49 = vld [vmem:[%s11636_s21 + $0xe18] ss:$24 sps:$4 sm:$0xff]  }
 0x30b   :  { %5071 = vmatpush1.bf16.msra.mxu0 %v9332_v50  ;;  %4826 = vmatprep.subr.bf16.mxu1 %v9337_v25  ;;  %v9391_v50 = vld [vmem:[%s11636_s21 + $0xe44] ss:$24 sps:$4 sm:$0xff]  }
 0x30c   :  { %5072 = vmatprep.subr.bf16.mxu0 %v9340_v26  ;;  %v9394_v25 = vld [vmem:[%s11636_s21 + $0xe4c] ss:$24 sps:$4 sm:$0xff]   ;;  %v9389_v26 = vld [vmem:[%s11636_s21 + $0xe40] ss:$24 sps:$4 sm:$0xff]  }
 0x30e   :  { %4827 = vmatpush1.bf16.msra.mxu1 %v9335_v55  ;;  %v1460_v55 = vadd.f32 %v10675_v53, %v1007_v48  ;;  %v9398_v53 = vld [vmem:[%s11636_s21 + $0xe78] ss:$24 sps:$4 sm:$0xff]  }
 0x30f   :  { %5073 = vmatpush1.bf16.msra.mxu0 %v9338_v56  ;;  %4828 = vmatprep.subr.bf16.mxu1 %v9343_v57  ;;  %v1545_v56 = vrot.slane %v10893_v24, %v10424_v5  ;;  %v9392_v57 = vld [vmem:[%s11636_s21 + $0xe48] ss:$24 sps:$4 sm:$0xff]  }
 0x310   :  { %5074 = vmatprep.subr.bf16.mxu0 %v9346_v59  ;;  %v9397_v59 = vld [vmem:[%s11636_s21 + $0xe74] ss:$24 sps:$4 sm:$0xff]  }
 0x312   :  { %4829 = vmatpush1.bf16.msra.mxu1 %v9341_v51  ;;  %v9400_v51 = vld [vmem:[%s11636_s21 + $0xe7c] ss:$24 sps:$4 sm:$0xff]  }
 0x313   :  { %5075 = vmatpush1.bf16.msra.mxu0 %v9344_v61  ;;  %4830 = vmatprep.subr.bf16.mxu1 %v9349_v29  ;;  %v9395_v61 = vld [vmem:[%s11636_s21 + $0xe70] ss:$24 sps:$4 sm:$0xff]   ;;  %v1573_v29 = vmul.f32 %v1545_v56, %v1460_v55  ;;  %v9426_v55 = vld [vmem:[%s11636_s21 + $0x40] ss:$24 sps:$4 sm:$0xff]   ;;  %v9431_v56 = vld [vmem:[%s11636_s21 + $0x74] ss:$24 sps:$4 sm:$0xff]  }
 0x314   :  { %5076 = vmatprep.subr.bf16.mxu0 %v9352_v63  ;;  %v1615_v63 = vrot.slane %v10905_v45, %v10424_v5 }
 0x316   :  { %4831 = vmatpush1.bf16.msra.mxu1 %v9347_v2  ;;  %v9403_v2 = vld [vmem:[%s11636_s21 + $0xea4] ss:$24 sps:$4 sm:$0xff]  }
 0x317   :  { %5077 = vmatpush1.bf16.msra.mxu0 %v9350_v3  ;;  %4832 = vmatprep.subr.bf16.mxu1 %v9355_v4  ;;  %v9406_v3 = vld [vmem:[%s11636_s21 + $0xeac] ss:$24 sps:$4 sm:$0xff]   ;;  %v1015_v4 = vrot.slane %v10883_v46, %v10446_v36  ;;  %v1553_v46 = vrot.slane %v10893_v24, %v10446_v36  ;;  %v9416_v24 = vld [vmem:[%s11636_s21 + $0xf08] ss:$24 sps:$4 sm:$0xff]  }
 0x318   :  { %5078 = vmatprep.subr.bf16.mxu0 %v9358_v54  ;;  %v9401_v54 = vld [vmem:[%s11636_s21 + $0xea0] ss:$24 sps:$4 sm:$0xff]  }
 0x31a   :  { %4833 = vmatpush1.bf16.msra.mxu1 %v9353_v7  ;;  %v1643_v7 = vadd.f32 %v1615_v63, %v1573_v29  ;;  %v9435_v29 = vld [vmem:[%s11636_s21 + $0xd0] ss:$24 sps:$4 sm:$0xff]   ;;  %v9438_v63 = vld [vmem:[%s11636_s21 + $0x100] ss:$24 sps:$4 sm:$0xff]  }
 0x31b   :  { %5079 = vmatpush1.bf16.msra.mxu0 %v9356_v9  ;;  %4834 = vmatprep.subr.bf16.mxu1 %v9361_v11  ;;  %v9404_v9 = vld [vmem:[%s11636_s21 + $0xea8] ss:$24 sps:$4 sm:$0xff]   ;;  %v9409_v11 = vld [vmem:[%s11636_s21 + $0xed4] ss:$24 sps:$4 sm:$0xff]  }
 0x31c   :  { %5080 = vmatprep.subr.bf16.mxu0 %v9364_v35  ;;  %v9412_v35 = vld [vmem:[%s11636_s21 + $0xedc] ss:$24 sps:$4 sm:$0xff]  }
 0x31e   :  { %4835 = vmatpush1.bf16.msra.mxu1 %v9359_v12  ;;  %v1501_v12 = vadd.f32 %v10833_v32, %v1015_v4  ;;  %v2155_v32 = vld [vmem:[%s11636_s21 + $0xf38] sm:$0x33] }
 0x31f   :  { %5081 = vmatpush1.bf16.msra.mxu0 %v9362_v13  ;;  %4836 = vmatprep.subr.bf16.mxu1 %v9367_v14  ;;  %v9407_v13 = vld [vmem:[%s11636_s21 + $0xed0] ss:$24 sps:$4 sm:$0xff]   ;;  %v1654_v14 = vmax.f32 %v1643_v7, 0.0  ;;  %v9444_v4 = vld [vmem:[%s11636_s21 + $0x160] ss:$24 sps:$4 sm:$0xff]  }
 0x320   :  { %5082 = vmatprep.subr.bf16.mxu0 %v9370_v15  ;;  %v9410_v15 = vld [vmem:[%s11636_s21 + $0xed8] ss:$24 sps:$4 sm:$0xff]  }
 0x321   :  { %v9447_v7 = vld [vmem:[%s11636_s21 + $0x190] ss:$24 sps:$4 sm:$0xff]  }
 0x322   :  { %4837 = vmatpush1.bf16.msra.mxu1 %v9365_v16  ;;  %v9415_v16 = vld [vmem:[%s11636_s21 + $0xf04] ss:$24 sps:$4 sm:$0xff]  }
 0x323   :  { %5083 = vmatpush1.bf16.msra.mxu0 %v9368_v22  ;;  %4838 = vmatprep.subr.bf16.mxu1 %v9373_v23  ;;  %v9418_v22 = vld [vmem:[%s11636_s21 + $0xf0c] ss:$24 sps:$4 sm:$0xff]   ;;  %v2154_v23 = vld [vmem:[%s11636_s21 + $0xf30] sm:$0x33] }
 0x324   :  { %5084 = vmatprep.subr.bf16.mxu0 %v9376_v18  ;;  %v1575_v18 = vmul.f32 %v1553_v46, %v1501_v12  ;;  %v9450_v12 = vld [vmem:[%s11636_s21 + $0x1c0] ss:$24 sps:$4 sm:$0xff]   ;;  %v9455_v46 = vld [vmem:[%s11636_s21 + $0x1f4] ss:$24 sps:$4 sm:$0xff]  }
 0x326   :  { %4839 = vmatpush1.bf16.msra.mxu1 %v9371_v31  ;;  %v1623_v31 = vrot.slane %v10905_v45, %v10446_v36 }
 0x327   :  { %5085 = vmatpush1.bf16.msra.mxu0 %v9374_v34  ;;  %4840 = vmatprep.subr.bf16.mxu1 %v9379_v39  ;;  %v9413_v34 = vld [vmem:[%s11636_s21 + $0xf00] ss:$24 sps:$4 sm:$0xff]   ;;  %v11011_v39 = vpack.c.bf16 %v1654_v14, %v1654_v14  ;;  %v9554_v14 = vld [vmem:[%s11643_s24 + $0x1c] ss:$12 sps:$4 sm:$0xff]  }
 0x328   :  { %5086 = vmatprep.subr.bf16.mxu0 %v9382_v40  ;;  %v8234_v40 = vcombine.high %v2154_v23, %v2154_v23 }
 0x32a   :  { %4841 = vmatpush1.bf16.msra.mxu1 %v9377_v43  ;;  %v8233_v43 = vcombine.low %v2154_v23, %v2154_v23  ;;  %v9560_v23 = vld [vmem:[%s11643_s24 + $0x34] ss:$12 sps:$4 sm:$0xff]  }
 0x32b   :  { %5087 = vmatpush1.bf16.msra.mxu0 %v9380_v44  ;;  %4842 = vmatprep.subr.bf16.mxu1 %v9385_v10  ;;  %v8236_v44 = vcombine.high %v2155_v32, %v2155_v32  ;;  %v8235_v10 = vcombine.low %v2155_v32, %v2155_v32  ;;  %v9564_v32 = vld [vmem:[%s11643_s24 + $0x48] ss:$12 sps:$4 sm:$0xff]  }
 0x32c   :  { %5088 = vmatprep.subr.bf16.mxu0 %v9388_v62  ;;  %v1645_v62 = vadd.f32 %v1623_v31, %v1575_v18  ;;  %v4639_v45 = vsel %vm228_vm0, %v8233_v43, 0  ;;  %v9456_v18 = vld [vmem:[%s11636_s21 + $0x220] ss:$24 sps:$4 sm:$0xff]   ;;  %v9461_v31 = vld [vmem:[%s11636_s21 + $0x254] ss:$24 sps:$4 sm:$0xff]  }
 0x32d   :  { %v4645_v48 = vsel %vm228_vm0, %v8235_v10, 0  ;;  %v9570_v43 = vld [vmem:[%s11643_s24 + $0x60] ss:$12 sps:$4 sm:$0xff]  }
 0x32e   :  { %4843 = vmatpush1.bf16.msra.mxu1 %v9383_v47  ;;  %v9425_v47 = vld [vmem:[%s11636_s21 + $0x14] ss:$24 sps:$4 sm:$0xff]   ;;  %v9462_v10 = vld [vmem:[%s11636_s21 + $0x280] ss:$24 sps:$4 sm:$0xff]  }
 0x32f   :  { %5089 = vmatpush1.bf16.msra.mxu0 %v9386_v49  ;;  %4844 = vmatprep.subr.bf16.mxu1 %v9391_v50  ;;  %v1656_v49 = vmax.f32 %v1645_v62, 0.0  ;;  %v9467_v62 = vld [vmem:[%s11636_s21 + $0x2b4] ss:$24 sps:$4 sm:$0xff]  }
 0x330   :  { %5090 = vmatprep.subr.bf16.mxu0 %v9394_v25  ;;  %v9423_v25 = vld [vmem:[%s11636_s21 + $0x10] ss:$24 sps:$4 sm:$0xff]  }
 0x331   :  { %v11023_v50 = vpack.c.bf16 %v1656_v49, %v1656_v49  ;;  %v9470_v49 = vld [vmem:[%s11636_s21 + $0x2e4] ss:$24 sps:$4 sm:$0xff]  }
 0x332   :  { %4845 = vmatpush1.bf16.msra.mxu1 %v9389_v26  ;;  %v9428_v26 = vld [vmem:[%s11636_s21 + $0x44] ss:$24 sps:$4 sm:$0xff]  }
 0x333   :  { %5091 = vmatpush1.bf16.msra.mxu0 %v9392_v57  ;;  %4846 = vmatprep.subr.bf16.mxu1 %v9397_v59  ;;  %v9429_v57 = vld [vmem:[%s11636_s21 + $0x70] ss:$24 sps:$4 sm:$0xff]   ;;  %v9434_v59 = vld [vmem:[%s11636_s21 + $0xa4] ss:$24 sps:$4 sm:$0xff]  }
 0x334   :  { %5092 = vmatprep.subr.bf16.mxu0 %v9400_v51  ;;  %v9432_v51 = vld [vmem:[%s11636_s21 + $0xa0] ss:$24 sps:$4 sm:$0xff]  }
 0x336   :  { %4847 = vmatpush1.bf16.msra.mxu1 %v9395_v61  ;;  %v9437_v61 = vld [vmem:[%s11636_s21 + $0xd4] ss:$24 sps:$4 sm:$0xff]  }
 0x337   :  { %5093 = vmatpush1.bf16.msra.mxu0 %v9398_v53  ;;  %4848 = vmatprep.subr.bf16.mxu1 %v9403_v2  ;;  %v9443_v53 = vld [vmem:[%s11636_s21 + $0x134] ss:$24 sps:$4 sm:$0xff]   ;;  %v9441_v2 = vld [vmem:[%s11636_s21 + $0x130] ss:$24 sps:$4 sm:$0xff]  }
 0x338   :  { %5094 = vmatprep.subr.bf16.mxu0 %v9406_v3  ;;  %v9446_v3 = vld [vmem:[%s11636_s21 + $0x164] ss:$24 sps:$4 sm:$0xff]  }
 0x33a   :  { %4849 = vmatpush1.bf16.msra.mxu1 %v9401_v54  ;;  %v9449_v54 = vld [vmem:[%s11636_s21 + $0x194] ss:$24 sps:$4 sm:$0xff]  }
 0x33b   :  { %5095 = vmatpush1.bf16.msra.mxu0 %v9404_v9  ;;  %4850 = vmatprep.subr.bf16.mxu1 %v9409_v11  ;;  %v9452_v9 = vld [vmem:[%s11636_s21 + $0x1c4] ss:$24 sps:$4 sm:$0xff]   ;;  %v9546_v11 = vld [vmem:[%s11643_s24] ss:$12 sps:$4 sm:$0xff]  }
 0x33c   :  { %5096 = vmatprep.subr.bf16.mxu0 %v9412_v35  ;;  %v9548_v35 = vld [vmem:[%s11643_s24 + $0x4] ss:$12 sps:$4 sm:$0xff]  }
 0x33e   :  { %4851 = vmatpush1.bf16.msra.mxu1 %v9407_v13  ;;  %v9552_v13 = vld [vmem:[%s11643_s24 + $0x18] ss:$12 sps:$4 sm:$0xff]  }
 0x33f   :  { %5097 = vmatpush1.bf16.msra.mxu0 %v9410_v15  ;;  %4861 = vmatprep.subr.bf16.mxu1 %v9415_v16  ;;  %v9453_v15 = vld [vmem:[%s11636_s21 + $0x1f0] ss:$24 sps:$4 sm:$0xff]   ;;  %v9458_v16 = vld [vmem:[%s11636_s21 + $0x224] ss:$24 sps:$4 sm:$0xff]  }
 0x340   :  { %5107 = vmatprep.subr.bf16.mxu0 %v9418_v22  ;;  %v9558_v22 = vld [vmem:[%s11643_s24 + $0x30] ss:$12 sps:$4 sm:$0xff]  }
 0x341   :  { %4853 = vmatmul.mubr.bf16.vlgmr.msra.gmra.mrb[20].mxu1 %v11011_v39 }
 0x342   :  { %5099 = vmatmul.mubr.bf16.vlgmr.msra.gmra.mrb[28].mxu0 %v11011_v39  ;;  %4862 = vmatpush1.bf16.msra.mxu1 %v9413_v34  ;;  %v9566_v34 = vld [vmem:[%s11643_s24 + $0x4c] ss:$12 sps:$4 sm:$0xff]  }
 0x343   :  { %5108 = vmatpush1.bf16.msra.mxu0 %v9416_v24  ;;  %8239 = vmatprep.subr.msk.bf16.mxu1 %vm228_vm0, %v8234_v40  ;;  %v9459_v24 = vld [vmem:[%s11636_s21 + $0x250] ss:$24 sps:$4 sm:$0xff]   ;;  %v9464_v40 = vld [vmem:[%s11636_s21 + $0x284] ss:$24 sps:$4 sm:$0xff]  }
 0x344   :  { %8241 = vmatprep.subr.msk.bf16.mxu0 %vm228_vm0, %v8236_v44  ;;  %4893 = vmatprep.mubr.bf16.mxu1 %v10076_v20  ;;  %v9572_v44 = vld [vmem:[%s11643_s24 + $0x64] ss:$12 sps:$4 sm:$0xff]  }
 0x345   :  { %5139 = vmatprep.mubr.bf16.mxu0 %v10076_v20 }
 0x346   :  { %4864 = vmatpush1.bf16.msra.mxu1 %v4639_v45  ;;  %v9576_v45 = vld [vmem:[%s11643_s24 + $0x78] ss:$12 sps:$4 sm:$0xff]  }
 0x347   :  { %5110 = vmatpush1.bf16.msra.mxu0 %v4645_v48  ;;  %5148 = vmatprep.subr.bf16.mxu1 %v9425_v47  ;;  %v9578_v47 = vld [vmem:[%s11643_s24 + $0x7c] ss:$12 sps:$4 sm:$0xff]  }
 0x348   :  { %6390 = vmatprep.subr.bf16.mxu0 %v9548_v35  ;;  %v9465_v48 = vld [vmem:[%s11636_s21 + $0x2b0] ss:$24 sps:$4 sm:$0xff]   ;;  %v9614_v35 = vld [vmem:[%s11643_s24 + $0x10c] ss:$12 sps:$4 sm:$0xff]  }
 0x34d   :  { %8240 = vmatmul.mubr.msk.bf16.vlgmr.msra.gmra.mrb[20].mxu1 %vm4634_vm9, %v11023_v50 }
 0x34e   :  { %8242 = vmatmul.mubr.msk.bf16.vlgmr.msra.gmra.mrb[28].mxu0 %vm4634_vm9, %v11023_v50  ;;  %5149 = vmatpush1.bf16.msra.mxu1 %v9423_v25  ;;  %v9582_v25 = vld [vmem:[%s11643_s24 + $0x90] ss:$12 sps:$4 sm:$0xff]  }
 0x34f   :  { %5180 = vmatprep.mubr.bf16.mxu1 %v10627_v0  ;;  %5150 = vmatprep.subr.bf16.mxu1 %v9428_v26  ;;  %v9440_v0 = vld [vmem:[%s11636_s21 + $0x104] ss:$24 sps:$4 sm:$0xff]   ;;  %v9584_v26 = vld [vmem:[%s11643_s24 + $0x94] ss:$12 sps:$4 sm:$0xff]  }
 0x350   :  { %6391 = vmatpush1.bf16.msra.mxu0 %v9546_v11  ;;  %v9612_v11 = vld [vmem:[%s11643_s24 + $0x108] ss:$12 sps:$4 sm:$0xff]  }
 0x351   :  { %6392 = vmatprep.subr.bf16.mxu0 %v9554_v14  ;;  %v9620_v14 = vld [vmem:[%s11643_s24 + $0x124] ss:$12 sps:$4 sm:$0xff]  }
 0x352   :  { %5151 = vmatpush1.bf16.msra.mxu1 %v9426_v55  ;;  %v9468_v55 = vld [vmem:[%s11636_s21 + $0x2e0] ss:$24 sps:$4 sm:$0xff]  }
 0x353   :  { %5152 = vmatprep.subr.bf16.mxu1 %v9431_v56  ;;  %v9473_v56 = vld [vmem:[%s11636_s21 + $0x314] ss:$24 sps:$4 sm:$0xff]  }
 0x354   :  { %6393 = vmatpush1.bf16.msra.mxu0 %v9552_v13  ;;  %v9618_v13 = vld [vmem:[%s11643_s24 + $0x120] ss:$12 sps:$4 sm:$0xff]  }
 0x355   :  { %6394 = vmatprep.subr.bf16.mxu0 %v9560_v23  ;;  %v9624_v23 = vld [vmem:[%s11643_s24 + $0x138] ss:$12 sps:$4 sm:$0xff]  }
 0x356   :  { %5153 = vmatpush1.bf16.msra.mxu1 %v9429_v57  ;;  %v9588_v57 = vld [vmem:[%s11643_s24 + $0xa8] ss:$12 sps:$4 sm:$0xff]  }
 0x357   :  { %5154 = vmatprep.subr.bf16.mxu1 %v9434_v59  ;;  %v9590_v59 = vld [vmem:[%s11643_s24 + $0xac] ss:$12 sps:$4 sm:$0xff]  }
 0x358   :  { %6395 = vmatpush1.bf16.msra.mxu0 %v9558_v22  ;;  %v9626_v22 = vld [vmem:[%s11643_s24 + $0x13c] ss:$12 sps:$4 sm:$0xff]  }
 0x359   :  { %6396 = vmatprep.subr.bf16.mxu0 %v9566_v34  ;;  %v9630_v34 = vld [vmem:[%s11643_s24 + $0x150] ss:$12 sps:$4 sm:$0xff]  }
 0x35a   :  { %5155 = vmatpush1.bf16.msra.mxu1 %v9432_v51  ;;  %v9471_v51 = vld [vmem:[%s11636_s21 + $0x310] ss:$24 sps:$4 sm:$0xff]  }
 0x35b   :  { %5156 = vmatprep.subr.bf16.mxu1 %v9437_v61  ;;  %v9476_v61 = vld [vmem:[%s11636_s21 + $0x344] ss:$24 sps:$4 sm:$0xff]  }
 0x35c   :  { %6397 = vmatpush1.bf16.msra.mxu0 %v9564_v32  ;;  %v9632_v32 = vld [vmem:[%s11643_s24 + $0x154] ss:$12 sps:$4 sm:$0xff]  }
 0x35d   :  { %6398 = vmatprep.subr.bf16.mxu0 %v9572_v44  ;;  %v9636_v44 = vld [vmem:[%s11643_s24 + $0x168] ss:$12 sps:$4 sm:$0xff]  }
 0x35e   :  { %5157 = vmatpush1.bf16.msra.mxu1 %v9435_v29  ;;  %v9596_v29 = vld [vmem:[%s11643_s24 + $0xc4] ss:$12 sps:$4 sm:$0xff]  }
 0x35f   :  { %5158 = vmatprep.subr.bf16.mxu1 %v9440_v0  ;;  %v9594_v0 = vld [vmem:[%s11643_s24 + $0xc0] ss:$12 sps:$4 sm:$0xff]  }
 0x360   :  { %6399 = vmatpush1.bf16.msra.mxu0 %v9570_v43  ;;  %v9638_v43 = vld [vmem:[%s11643_s24 + $0x16c] ss:$12 sps:$4 sm:$0xff]  }
 0x361   :  { %6400 = vmatprep.subr.bf16.mxu0 %v9578_v47  ;;  %v9498_v47 = vld [vmem:[%s11636_s21 + $0x4c0] ss:$24 sps:$4 sm:$0xff]  }
 0x362   :  { %5159 = vmatpush1.bf16.msra.mxu1 %v9438_v63  ;;  %v9474_v63 = vld [vmem:[%s11636_s21 + $0x340] ss:$24 sps:$4 sm:$0xff]  }
 0x363   :  { %5160 = vmatprep.subr.bf16.mxu1 %v9443_v53  ;;  %v9479_v53 = vld [vmem:[%s11636_s21 + $0x374] ss:$24 sps:$4 sm:$0xff]  }
 0x364   :  { %6401 = vmatpush1.bf16.msra.mxu0 %v9576_v45  ;;  %v9644_v45 = vld [vmem:[%s11643_s24 + $0x184] ss:$12 sps:$4 sm:$0xff]  }
 0x365   :  { %6402 = vmatprep.subr.bf16.mxu0 %v9584_v26  ;;  %v9504_v26 = vld [vmem:[%s11636_s21 + $0x520] ss:$24 sps:$4 sm:$0xff]  }
 0x366   :  { %5161 = vmatpush1.bf16.msra.mxu1 %v9441_v2  ;;  %v9600_v2 = vld [vmem:[%s11643_s24 + $0xd8] ss:$12 sps:$4 sm:$0xff]  }
 0x367   :  { %5162 = vmatprep.subr.bf16.mxu1 %v9446_v3  ;;  %v9602_v3 = vld [vmem:[%s11643_s24 + $0xdc] ss:$12 sps:$4 sm:$0xff]  }
 0x368   :  { %6403 = vmatpush1.bf16.msra.mxu0 %v9582_v25  ;;  %v9506_v25 = vld [vmem:[%s11636_s21 + $0x524] ss:$24 sps:$4 sm:$0xff]  }
 0x369   :  { %6404 = vmatprep.subr.bf16.mxu0 %v9590_v59  ;;  %v9510_v59 = vld [vmem:[%s11636_s21 + $0x580] ss:$24 sps:$4 sm:$0xff]  }
 0x36a   :  { %5163 = vmatpush1.bf16.msra.mxu1 %v9444_v4  ;;  %v9477_v4 = vld [vmem:[%s11636_s21 + $0x370] ss:$24 sps:$4 sm:$0xff]  }
 0x36b   :  { %5164 = vmatprep.subr.bf16.mxu1 %v9449_v54  ;;  %v9606_v54 = vld [vmem:[%s11643_s24 + $0xf0] ss:$12 sps:$4 sm:$0xff]  }
 0x36c   :  { %6405 = vmatpush1.bf16.msra.mxu0 %v9588_v57  ;;  %v9512_v57 = vld [vmem:[%s11636_s21 + $0x584] ss:$24 sps:$4 sm:$0xff]  }
 0x36d   :  { %6406 = vmatprep.subr.bf16.mxu0 %v9596_v29  ;;  %v9518_v29 = vld [vmem:[%s11636_s21 + $0x5e4] ss:$24 sps:$4 sm:$0xff]  }
 0x36e   :  { %5165 = vmatpush1.bf16.msra.mxu1 %v9447_v7  ;;  %v9480_v7 = vld [vmem:[%s11636_s21 + $0x3a0] ss:$24 sps:$4 sm:$0xff]  }
 0x36f   :  { %5166 = vmatprep.subr.bf16.mxu1 %v9452_v9  ;;  %v9485_v9 = vld [vmem:[%s11636_s21 + $0x3d4] ss:$24 sps:$4 sm:$0xff]  }
 0x370   :  { %6407 = vmatpush1.bf16.msra.mxu0 %v9594_v0  ;;  %v9516_v0 = vld [vmem:[%s11636_s21 + $0x5e0] ss:$24 sps:$4 sm:$0xff]  }
 0x371   :  { %6408 = vmatprep.subr.bf16.mxu0 %v9602_v3  ;;  %v9522_v3 = vld [vmem:[%s11636_s21 + $0x640] ss:$24 sps:$4 sm:$0xff]  }
 0x372   :  { %5167 = vmatpush1.bf16.msra.mxu1 %v9450_v12  ;;  %v9483_v12 = vld [vmem:[%s11636_s21 + $0x3d0] ss:$24 sps:$4 sm:$0xff]  }
 0x373   :  { %5168 = vmatprep.subr.bf16.mxu1 %v9455_v46  ;;  %v9488_v46 = vld [vmem:[%s11636_s21 + $0x404] ss:$24 sps:$4 sm:$0xff]  }
 0x374   :  { %6409 = vmatpush1.bf16.msra.mxu0 %v9600_v2  ;;  %v9524_v2 = vld [vmem:[%s11636_s21 + $0x644] ss:$24 sps:$4 sm:$0xff]  }
 0x376   :  { %5169 = vmatpush1.bf16.msra.mxu1 %v9453_v15  ;;  %v9486_v15 = vld [vmem:[%s11636_s21 + $0x400] ss:$24 sps:$4 sm:$0xff]  }
 0x377   :  { %5170 = vmatprep.subr.bf16.mxu1 %v9458_v16  ;;  %v9491_v16 = vld [vmem:[%s11636_s21 + $0x434] ss:$24 sps:$4 sm:$0xff]  }
 0x37a   :  { %5171 = vmatpush1.bf16.msra.mxu1 %v9456_v18  ;;  %v9489_v18 = vld [vmem:[%s11636_s21 + $0x430] ss:$24 sps:$4 sm:$0xff]  }
 0x37b   :  { %5172 = vmatprep.subr.bf16.mxu1 %v9461_v31  ;;  %v9494_v31 = vld [vmem:[%s11636_s21 + $0x464] ss:$24 sps:$4 sm:$0xff]  }
 0x37e   :  { %5173 = vmatpush1.bf16.msra.mxu1 %v9459_v24  ;;  %v9492_v24 = vld [vmem:[%s11636_s21 + $0x460] ss:$24 sps:$4 sm:$0xff]  }
 0x37f   :  { %5174 = vmatprep.subr.bf16.mxu1 %v9464_v40  ;;  %v9497_v40 = vld [vmem:[%s11636_s21 + $0x494] ss:$24 sps:$4 sm:$0xff]  }
 0x382   :  { %5175 = vmatpush1.bf16.msra.mxu1 %v9462_v10  ;;  %v9495_v10 = vld [vmem:[%s11636_s21 + $0x490] ss:$24 sps:$4 sm:$0xff]  }
 0x383   :  { %5176 = vmatprep.subr.bf16.mxu1 %v9467_v62  ;;  %v9500_v62 = vld [vmem:[%s11636_s21 + $0x4c4] ss:$24 sps:$4 sm:$0xff]  }
 0x386   :  { %5177 = vmatpush1.bf16.msra.mxu1 %v9465_v48  ;;  %v9503_v48 = vld [vmem:[%s11636_s21 + $0x4f4] ss:$24 sps:$4 sm:$0xff]  }
 0x387   :  { %5178 = vmatprep.subr.bf16.mxu1 %v9470_v49  ;;  %v9501_v49 = vld [vmem:[%s11636_s21 + $0x4f0] ss:$24 sps:$4 sm:$0xff]  }
 0x38a   :  { %5179 = vmatpush1.bf16.msra.mxu1 %v9468_v55  ;;  %v9509_v55 = vld [vmem:[%s11636_s21 + $0x554] ss:$24 sps:$4 sm:$0xff]  }
 0x38b   :  { %5189 = vmatprep.subr.bf16.mxu1 %v9473_v56  ;;  %v9507_v56 = vld [vmem:[%s11636_s21 + $0x550] ss:$24 sps:$4 sm:$0xff]  }
 0x38d   :  { %5181 = vmatmul.mubr.bf16.vlgmr.msra.gmra.mrb[24].mxu1 %v10633_v6  ;;  %v9482_v6 = vld [vmem:[%s11636_s21 + $0x3a4] ss:$24 sps:$4 sm:$0xff]  }
 0x38e   :  { %5190 = vmatpush1.bf16.msra.mxu1 %v9471_v51  ;;  %5221 = vmatprep.mubr.bf16.mxu1 %v10661_v41  ;;  %v9608_v41 = vld [vmem:[%s11643_s24 + $0xf4] ss:$12 sps:$4 sm:$0xff]  }
 0x38f   :  { %5191 = vmatprep.subr.bf16.mxu1 %v9476_v61  ;;  %6410 = vmatprep.subr.bf16.mxu0 %v9608_v41  ;;  %v9515_v51 = vld [vmem:[%s11636_s21 + $0x5b4] ss:$24 sps:$4 sm:$0xff]   ;;  %v9513_v61 = vld [vmem:[%s11636_s21 + $0x5b0] ss:$24 sps:$4 sm:$0xff]   ;;  %v9528_v41 = vld [vmem:[%s11636_s21 + $0x6a0] ss:$24 sps:$4 sm:$0xff]  }
 0x390   :  { %6411 = vmatpush1.bf16.msra.mxu0 %v9606_v54  ;;  %v9530_v54 = vld [vmem:[%s11636_s21 + $0x6a4] ss:$24 sps:$4 sm:$0xff]  }
 0x391   :  { %6412 = vmatprep.subr.bf16.mxu0 %v9614_v35  ;;  %v9537_v35 = vld [vmem:[%s11636_s21 + $0x730] ss:$24 sps:$4 sm:$0xff]  }
 0x392   :  { %5192 = vmatpush1.bf16.msra.mxu1 %v9474_v63  ;;  %v9521_v63 = vld [vmem:[%s11636_s21 + $0x614] ss:$24 sps:$4 sm:$0xff]  }
 0x393   :  { %5193 = vmatprep.subr.bf16.mxu1 %v9479_v53  ;;  %v9519_v53 = vld [vmem:[%s11636_s21 + $0x610] ss:$24 sps:$4 sm:$0xff]  }
 0x394   :  { %6413 = vmatpush1.bf16.msra.mxu0 %v9612_v11  ;;  %v9539_v11 = vld [vmem:[%s11636_s21 + $0x734] ss:$24 sps:$4 sm:$0xff]  }
 0x395   :  { %6414 = vmatprep.subr.bf16.mxu0 %v9620_v14  ;;  %v9543_v14 = vld [vmem:[%s11636_s21 + $0x790] ss:$24 sps:$4 sm:$0xff]  }
 0x396   :  { %5194 = vmatpush1.bf16.msra.mxu1 %v9477_v4  ;;  %v9527_v4 = vld [vmem:[%s11636_s21 + $0x674] ss:$24 sps:$4 sm:$0xff]  }
 0x397   :  { %5195 = vmatprep.subr.bf16.mxu1 %v9482_v6  ;;  %v9525_v6 = vld [vmem:[%s11636_s21 + $0x670] ss:$24 sps:$4 sm:$0xff]  }
 0x398   :  { %6415 = vmatpush1.bf16.msra.mxu0 %v9618_v13  ;;  %v9545_v13 = vld [vmem:[%s11636_s21 + $0x794] ss:$24 sps:$4 sm:$0xff]  }
 0x399   :  { %6416 = vmatprep.subr.bf16.mxu0 %v9626_v22  ;;  %v9557_v22 = vld [vmem:[%s11636_s21 + $0x7f4] ss:$24 sps:$4 sm:$0xff]  }
 0x39a   :  { %5196 = vmatpush1.bf16.msra.mxu1 %v9480_v7  ;;  %v9531_v7 = vld [vmem:[%s11636_s21 + $0x6d0] ss:$24 sps:$4 sm:$0xff]  }
 0x39b   :  { %5197 = vmatprep.subr.bf16.mxu1 %v9485_v9  ;;  %v9534_v9 = vld [vmem:[%s11636_s21 + $0x700] ss:$24 sps:$4 sm:$0xff]  }
 0x39c   :  { %6417 = vmatpush1.bf16.msra.mxu0 %v9624_v23  ;;  %v9555_v23 = vld [vmem:[%s11636_s21 + $0x7f0] ss:$24 sps:$4 sm:$0xff]  }
 0x39d   :  { %6418 = vmatprep.subr.bf16.mxu0 %v9632_v32  ;;  %v9569_v32 = vld [vmem:[%s11636_s21 + $0x854] ss:$24 sps:$4 sm:$0xff]  }
 0x39e   :  { %5198 = vmatpush1.bf16.msra.mxu1 %v9483_v12  ;;  %v9542_v12 = vld [vmem:[%s11636_s21 + $0x764] ss:$24 sps:$4 sm:$0xff]  }
 0x39f   :  { %5199 = vmatprep.subr.bf16.mxu1 %v9488_v46  ;;  %v9540_v46 = vld [vmem:[%s11636_s21 + $0x760] ss:$24 sps:$4 sm:$0xff]  }
 0x3a0   :  { %6419 = vmatpush1.bf16.msra.mxu0 %v9630_v34  ;;  %v9567_v34 = vld [vmem:[%s11636_s21 + $0x850] ss:$24 sps:$4 sm:$0xff]  }
 0x3a1   :  { %6420 = vmatprep.subr.bf16.mxu0 %v9638_v43  ;;  %v9581_v43 = vld [vmem:[%s11636_s21 + $0x8b4] ss:$24 sps:$4 sm:$0xff]  }
 0x3a2   :  { %5200 = vmatpush1.bf16.msra.mxu1 %v9486_v15  ;;  %v9551_v15 = vld [vmem:[%s11636_s21 + $0x7c4] ss:$24 sps:$4 sm:$0xff]  }
 0x3a3   :  { %5201 = vmatprep.subr.bf16.mxu1 %v9491_v16  ;;  %v9549_v16 = vld [vmem:[%s11636_s21 + $0x7c0] ss:$24 sps:$4 sm:$0xff]  }
 0x3a4   :  { %6421 = vmatpush1.bf16.msra.mxu0 %v9636_v44  ;;  %v9579_v44 = vld [vmem:[%s11636_s21 + $0x8b0] ss:$24 sps:$4 sm:$0xff]  }
 0x3a5   :  { %6431 = vmatprep.subr.bf16.mxu0 %v9644_v45  ;;  %v9593_v45 = vld [vmem:[%s11636_s21 + $0x914] ss:$24 sps:$4 sm:$0xff]  }
 0x3a6   :  { %5202 = vmatpush1.bf16.msra.mxu1 %v9489_v18  ;;  %v9563_v18 = vld [vmem:[%s11636_s21 + $0x824] ss:$24 sps:$4 sm:$0xff]  }
 0x3a7   :  { %5203 = vmatprep.subr.bf16.mxu1 %v9494_v31  ;;  %v9561_v31 = vld [vmem:[%s11636_s21 + $0x820] ss:$24 sps:$4 sm:$0xff]  }
 0x3aa   :  { %5204 = vmatpush1.bf16.msra.mxu1 %v9492_v24  ;;  %v9575_v24 = vld [vmem:[%s11636_s21 + $0x884] ss:$24 sps:$4 sm:$0xff]  }
 0x3ab   :  { %5205 = vmatprep.subr.bf16.mxu1 %v9497_v40  ;;  %v9573_v40 = vld [vmem:[%s11636_s21 + $0x880] ss:$24 sps:$4 sm:$0xff]  }
 0x3ae   :  { %5206 = vmatpush1.bf16.msra.mxu1 %v9495_v10  ;;  %v9587_v10 = vld [vmem:[%s11636_s21 + $0x8e4] ss:$24 sps:$4 sm:$0xff]  }
 0x3af   :  { %5207 = vmatprep.subr.bf16.mxu1 %v9500_v62  ;;  %v9585_v62 = vld [vmem:[%s11636_s21 + $0x8e0] ss:$24 sps:$4 sm:$0xff]  }
 0x3b2   :  { %5208 = vmatpush1.bf16.msra.mxu1 %v9498_v47  ;;  %v9591_v47 = vld [vmem:[%s11636_s21 + $0x910] ss:$24 sps:$4 sm:$0xff]  }
 0x3b3   :  { %5209 = vmatprep.subr.bf16.mxu1 %v9503_v48  ;;  %v9599_v48 = vld [vmem:[%s11636_s21 + $0x944] ss:$24 sps:$4 sm:$0xff]  }
 0x3b6   :  { %5210 = vmatpush1.bf16.msra.mxu1 %v9501_v49  ;;  %v9597_v49 = vld [vmem:[%s11636_s21 + $0x940] ss:$24 sps:$4 sm:$0xff]  }
 0x3b7   :  { %5211 = vmatprep.subr.bf16.mxu1 %v9506_v25  ;;  %v9605_v25 = vld [vmem:[%s11636_s21 + $0x974] ss:$24 sps:$4 sm:$0xff]  }
 0x3ba   :  { %5212 = vmatpush1.bf16.msra.mxu1 %v9504_v26  ;;  %v9603_v26 = vld [vmem:[%s11636_s21 + $0x970] ss:$24 sps:$4 sm:$0xff]  }
 0x3bb   :  { %5213 = vmatprep.subr.bf16.mxu1 %v9509_v55  ;;  %v9611_v55 = vld [vmem:[%s11636_s21 + $0x9a4] ss:$24 sps:$4 sm:$0xff]  }
 0x3be   :  { %5214 = vmatpush1.bf16.msra.mxu1 %v9507_v56  ;;  %v9609_v56 = vld [vmem:[%s11636_s21 + $0x9a0] ss:$24 sps:$4 sm:$0xff]  }
 0x3bf   :  { %5215 = vmatprep.subr.bf16.mxu1 %v9512_v57  ;;  %v9615_v57 = vld [vmem:[%s11636_s21 + $0x9d0] ss:$24 sps:$4 sm:$0xff]  }
 0x3c2   :  { %5216 = vmatpush1.bf16.msra.mxu1 %v9510_v59  ;;  %v11175_v59 = vld [vmem:[%s11644_s30] sm:$0x3f] }
 0x3c3   :  { %5217 = vmatprep.subr.bf16.mxu1 %v9515_v51  ;;  %v11179_v51 = vld [vmem:[%s11645_s6] sm:$0x3f] }
 0x3c6   :  { %5218 = vmatpush1.bf16.msra.mxu1 %v9513_v61  ;;  %v2162_v61 = vrot.slane %v11175_v59, %v10424_v5 }
 0x3c7   :  { %5219 = vmatprep.subr.bf16.mxu1 %v9518_v29  ;;  %v11184_v29 = vld [vmem:[%s11646_s27] sm:$0x3f] }
 0x3ca   :  { %5220 = vmatpush1.bf16.msra.mxu1 %v9516_v0  ;;  %v9621_v0 = vld [vmem:[%s11636_s21 + $0xa00] ss:$24 sps:$4 sm:$0xff]  }
 0x3cb   :  { %5230 = vmatprep.subr.bf16.mxu1 %v9521_v63  ;;  %v2166_v63 = vrot.slane %v11175_v59, %v10429_v8 }
 0x3cd   :  { %5222 = vmatmul.mubr.bf16.vlgmr.msra.gmra.mrb[24].mxu1 %v10740_v17  ;;  %v9533_v17 = vld [vmem:[%s11636_s21 + $0x6d4] ss:$24 sps:$4 sm:$0xff]  }
 0x3ce   :  { %5231 = vmatpush1.bf16.msra.mxu1 %v9519_v53  ;;  %5262 = vmatprep.mubr.bf16.mxu1 %v10746_v28  ;;  %v9536_v28 = vld [vmem:[%s11636_s21 + $0x704] ss:$24 sps:$4 sm:$0xff]   ;;  %v5399_v53 = vrot.slane %v11179_v51, %v10424_v5 }
 0x3cf   :  { %5232 = vmatprep.subr.bf16.mxu1 %v9524_v2  ;;  %v2174_v2 = vrot.slane %v11175_v59, %v10449_v38 }
 0x3d2   :  { %5233 = vmatpush1.bf16.msra.mxu1 %v9522_v3  ;;  %v9629_v3 = vld [vmem:[%s11636_s21 + $0xa34] ss:$24 sps:$4 sm:$0xff]  }
 0x3d3   :  { %5234 = vmatprep.subr.bf16.mxu1 %v9527_v4 }
 0x3d6   :  { %5235 = vmatpush1.bf16.msra.mxu1 %v9525_v6  ;;  %v5403_v6 = vrot.slane %v11179_v51, %v10429_v8 }
 0x3d7   :  { %5236 = vmatprep.subr.bf16.mxu1 %v9530_v54 }
 0x3da   :  { %5237 = vmatpush1.bf16.msra.mxu1 %v9528_v41  ;;  %v5437_v41 = vrot.slane %v11184_v29, %v10424_v5 }
 0x3db   :  { %5238 = vmatprep.subr.bf16.mxu1 %v9533_v17 }
 0x3de   :  { %5239 = vmatpush1.bf16.msra.mxu1 %v9531_v7 }
 0x3df   :  { %5240 = vmatprep.subr.bf16.mxu1 %v9536_v28  ;;  %v5411_v28 = vrot.slane %v11179_v51, %v10449_v38 }
 0x3e2   :  { %5241 = vmatpush1.bf16.msra.mxu1 %v9534_v9 }
 0x3e3   :  { %5242 = vmatprep.subr.bf16.mxu1 %v9539_v11  ;;  %v5441_v11 = vrot.slane %v11184_v29, %v10429_v8 }
 0x3e6   :  { %5243 = vmatpush1.bf16.msra.mxu1 %v9537_v35 }
 0x3e7   :  { %5244 = vmatprep.subr.bf16.mxu1 %v9542_v12 }
 0x3ea   :  { %5245 = vmatpush1.bf16.msra.mxu1 %v9540_v46  ;;  %v9627_v46 = vld [vmem:[%s11636_s21 + $0xa30] ss:$24 sps:$4 sm:$0xff]  }
 0x3eb   :  { %5246 = vmatprep.subr.bf16.mxu1 %v9545_v13 }
 0x3ee   :  { %5247 = vmatpush1.bf16.msra.mxu1 %v9543_v14 }
 0x3ef   :  { %5248 = vmatprep.subr.bf16.mxu1 %v9551_v15  ;;  %v5449_v15 = vrot.slane %v11184_v29, %v10449_v38 }
 0x3f2   :  { %5249 = vmatpush1.bf16.msra.mxu1 %v9549_v16 }
 0x3f3   :  { %5250 = vmatprep.subr.bf16.mxu1 %v9557_v22 }
 0x3f6   :  { %5251 = vmatpush1.bf16.msra.mxu1 %v9555_v23  ;;  %v9635_v23 = vld [vmem:[%s11636_s21 + $0xa64] ss:$24 sps:$4 sm:$0xff]  }
 0x3f7   :  { %5252 = vmatprep.subr.bf16.mxu1 %v9563_v18 }
 0x3fa   :  { %5253 = vmatpush1.bf16.msra.mxu1 %v9561_v31 }
 0x3fb   :  { %5254 = vmatprep.subr.bf16.mxu1 %v9569_v32 }
 0x3fe   :  { %5255 = vmatpush1.bf16.msra.mxu1 %v9567_v34 }
 0x3ff   :  { %5256 = vmatprep.subr.bf16.mxu1 %v9575_v24 }
 0x402   :  { %5257 = vmatpush1.bf16.msra.mxu1 %v9573_v40  ;;  %v9633_v40 = vld [vmem:[%s11636_s21 + $0xa60] ss:$24 sps:$4 sm:$0xff]  }
 0x403   :  { %5258 = vmatprep.subr.bf16.mxu1 %v9581_v43 }
 0x406   :  { %5259 = vmatpush1.bf16.msra.mxu1 %v9579_v44 }
 0x407   :  { %5260 = vmatprep.subr.bf16.mxu1 %v9587_v10  ;;  %v9641_v10 = vld [vmem:[%s11636_s21 + $0xa94] ss:$24 sps:$4 sm:$0xff]  }
 0x40a   :  { %5261 = vmatpush1.bf16.msra.mxu1 %v9585_v62 }
 0x40b   :  { %5271 = vmatprep.subr.bf16.mxu1 %v9593_v45  ;;  %v9639_v45 = vld [vmem:[%s11636_s21 + $0xa90] ss:$24 sps:$4 sm:$0xff]  }
 0x40d   :  { %5263 = vmatmul.mubr.bf16.vlgmr.msra.gmra.mrb[24].mxu1 %v10827_v19  ;;  %v9617_v19 = vld [vmem:[%s11636_s21 + $0x9d4] ss:$24 sps:$4 sm:$0xff]  }
 0x40e   :  { %5272 = vmatpush1.bf16.msra.mxu1 %v9591_v47  ;;  %5303 = vmatprep.mubr.bf16.mxu1 %v10835_v33  ;;  %v9623_v33 = vld [vmem:[%s11636_s21 + $0xa04] ss:$24 sps:$4 sm:$0xff]  }
 0x40f   :  { %5273 = vmatprep.subr.bf16.mxu1 %v9599_v48  ;;  %v9642_v48 = vld [vmem:[%s11643_s24 + $0x180] ss:$12 sps:$4 sm:$0xff]  }
 0x412   :  { %5274 = vmatpush1.bf16.msra.mxu1 %v9597_v49 }
 0x413   :  { %5275 = vmatprep.subr.bf16.mxu1 %v9605_v25  ;;  %v9647_v25 = vld [vmem:[%s11636_s21 + $0xac4] ss:$24 sps:$4 sm:$0xff]  }
 0x416   :  { %5276 = vmatpush1.bf16.msra.mxu1 %v9603_v26  ;;  %v9650_v26 = vld [vmem:[%s11643_s24 + $0x19c] ss:$12 sps:$4 sm:$0xff]  }
 0x417   :  { %5277 = vmatprep.subr.bf16.mxu1 %v9611_v55 }
 0x41a   :  { %5278 = vmatpush1.bf16.msra.mxu1 %v9609_v56  ;;  %v9645_v56 = vld [vmem:[%s11636_s21 + $0xac0] ss:$24 sps:$4 sm:$0xff]  }
 0x41b   :  { %5279 = vmatprep.subr.bf16.mxu1 %v9617_v19  ;;  %v9648_v19 = vld [vmem:[%s11643_s24 + $0x198] ss:$12 sps:$4 sm:$0xff]  }
 0x41e   :  { %5280 = vmatpush1.bf16.msra.mxu1 %v9615_v57  ;;  %v9653_v57 = vld [vmem:[%s11636_s21 + $0xaf4] ss:$24 sps:$4 sm:$0xff]  }
 0x41f   :  { %5281 = vmatprep.subr.bf16.mxu1 %v9623_v33  ;;  %v9656_v33 = vld [vmem:[%s11643_s24 + $0x1b4] ss:$12 sps:$4 sm:$0xff]  }
 0x420   :  { %v4895_v4 = vpop.f32.mrb[20].mxu1 }
 0x421   :  { %v8692_v54 = vadd.f32 %v4895_v4, %v2162_v61  ;;  %v11198_v17 = vpop.f32.mrb[28].mxu0  ;;  %v4897_v7 = vpop.f32.mrb[21].mxu1  ;;  %v9651_v61 = vld [vmem:[%s11636_s21 + $0xaf0] ss:$24 sps:$4 sm:$0xff]   ;;  %v9665_v4 = vld [vmem:[%s11636_s21 + $0xb54] ss:$24 sps:$4 sm:$0xff]  }
 0x422   :  { %v8693_v9 = vadd.f32 %v4897_v7, %v2166_v63  ;;  %v5143_v35 = vpop.f32.mrb[29].mxu0  ;;  %5282 = vmatpush1.bf16.msra.mxu1 %v9621_v0  ;;  %v4899_v12 = vpop.f32.mrb[22].mxu1  ;;  %v9654_v0 = vld [vmem:[%s11643_s24 + $0x1b0] ss:$12 sps:$4 sm:$0xff]  }
 0x423   :  { %v5426_v13 = vmul.f32 %v8692_v54, %v5399_v53  ;;  %v8695_v14 = vadd.f32 %v5143_v35, %v2174_v2  ;;  %v5145_v16 = vpop.f32.mrb[30].mxu0  ;;  %v4900_v22 = vpop.f32.mrb[23].mxu1  ;;  %5283 = vmatprep.subr.bf16.mxu1 %v9629_v3  ;;  %v9659_v63 = vld [vmem:[%s11636_s21 + $0xb24] ss:$24 sps:$4 sm:$0xff]   ;;  %v9662_v53 = vld [vmem:[%s11643_s24 + $0x1cc] ss:$12 sps:$4 sm:$0xff]  }
 0x424   :  { %v5427_v18 = vmul.f32 %v8693_v9, %v5403_v6  ;;  %v5146_v31 = vpop.f32.mrb[31].mxu0  ;;  %v9657_v2 = vld [vmem:[%s11636_s21 + $0xb20] ss:$24 sps:$4 sm:$0xff]   ;;  %v9660_v3 = vld [vmem:[%s11643_s24 + $0x1c8] ss:$12 sps:$4 sm:$0xff]  }
 0x425   :  { %v5464_v32 = vadd.f32 %v5437_v41, %v5426_v13  ;;  %v5429_v34 = vmul.f32 %v8695_v14, %v5411_v28  ;;  %v9668_v6 = vld [vmem:[%s11643_s24 + $0x1e4] ss:$12 sps:$4 sm:$0xff]   ;;  %v9666_v41 = vld [vmem:[%s11643_s24 + $0x1e0] ss:$12 sps:$4 sm:$0xff]   ;;  %v9674_v28 = vld [vmem:[%s11643_s24 + $0x1fc] ss:$12 sps:$4 sm:$0xff]  }
 0x426   :  { %v5465_v24 = vadd.f32 %v5441_v11, %v5427_v18  ;;  %5284 = vmatpush1.bf16.msra.mxu1 %v9627_v46  ;;  %v9663_v54 = vld [vmem:[%s11636_s21 + $0xb50] ss:$24 sps:$4 sm:$0xff]   ;;  %v9671_v7 = vld [vmem:[%s11636_s21 + $0xb84] ss:$24 sps:$4 sm:$0xff]   ;;  %v9669_v9 = vld [vmem:[%s11636_s21 + $0xb80] ss:$24 sps:$4 sm:$0xff]  }
 0x427   :  { %v5470_v43 = vmax.f32 %v5464_v32, 0.0  ;;  %v5467_v44 = vadd.f32 %v5449_v15, %v5429_v34  ;;  %5285 = vmatprep.subr.bf16.mxu1 %v9635_v23  ;;  %v9672_v11 = vld [vmem:[%s11643_s24 + $0x1f8] ss:$12 sps:$4 sm:$0xff]   ;;  %v9677_v35 = vld [vmem:[%s11636_s21 + $0xbb4] ss:$24 sps:$4 sm:$0xff]  }
 0x428   :  { %v5471_v38 = vmax.f32 %v5465_v24, 0.0  ;;  %v9680_v12 = vld [vmem:[%s11643_s24 + $0x214] ss:$12 sps:$4 sm:$0xff]   ;;  %v9675_v46 = vld [vmem:[%s11636_s21 + $0xbb0] ss:$24 sps:$4 sm:$0xff]  }
 0x429   :  { %v5473_v62 = vmax.f32 %v5467_v44, 0.0  ;;  %v11214_v49 = vpack.c.bf16 %v5470_v43, %v5470_v43  ;;  %v9678_v13 = vld [vmem:[%s11643_s24 + $0x210] ss:$12 sps:$4 sm:$0xff]   ;;  %v9686_v15 = vld [vmem:[%s11643_s24 + $0x22c] ss:$12 sps:$4 sm:$0xff]  }
 0x42a   :  { %5286 = vmatpush1.bf16.msra.mxu1 %v9633_v40  ;;  %v11211_v47 = vpack.c.bf16 %v5471_v38, %v5471_v38  ;;  %v9683_v14 = vld [vmem:[%s11636_s21 + $0xbe4] ss:$24 sps:$4 sm:$0xff]   ;;  %v9681_v16 = vld [vmem:[%s11636_s21 + $0xbe0] ss:$24 sps:$4 sm:$0xff]   ;;  %v9684_v22 = vld [vmem:[%s11643_s24 + $0x228] ss:$12 sps:$4 sm:$0xff]  }
 0x42b   :  { %5287 = vmatprep.subr.bf16.mxu1 %v9641_v10  ;;  %v11220_v55 = vpack.c.bf16 %v5473_v62, %v5473_v62  ;;  %v9689_v23 = vld [vmem:[%s11636_s21 + $0xc14] ss:$24 sps:$4 sm:$0xff]   ;;  %v9692_v18 = vld [vmem:[%s11643_s24 + $0x244] ss:$12 sps:$4 sm:$0xff]   ;;  %v9698_v24 = vld [vmem:[%s11643_s24 + $0x25c] ss:$12 sps:$4 sm:$0xff]  }
 0x42c   :  { %6422 = vmatprep.mubr.bf16.mxu0 %v11211_v47  ;;  %v9687_v31 = vld [vmem:[%s11636_s21 + $0xc10] ss:$24 sps:$4 sm:$0xff]   ;;  %v9690_v32 = vld [vmem:[%s11643_s24 + $0x240] ss:$12 sps:$4 sm:$0xff]   ;;  %v9695_v34 = vld [vmem:[%s11636_s21 + $0xc44] ss:$24 sps:$4 sm:$0xff]  }
 0x42d   :  { %6423 = vmatmul.mubr.bf16.vlgmr.msra.gmra.mrb[32].mxu0 %v11214_v49  ;;  %v9693_v40 = vld [vmem:[%s11636_s21 + $0xc40] ss:$24 sps:$4 sm:$0xff]   ;;  %v9701_v44 = vld [vmem:[%s11636_s21 + $0xc74] ss:$24 sps:$4 sm:$0xff]   ;;  %v9699_v38 = vld [vmem:[%s11636_s21 + $0xc70] ss:$24 sps:$4 sm:$0xff]  }
 0x42e   :  { %5288 = vmatpush1.bf16.msra.mxu1 %v9639_v45  ;;  %6432 = vmatpush1.bf16.msra.mxu0 %v9642_v48  ;;  %v9696_v43 = vld [vmem:[%s11643_s24 + $0x258] ss:$12 sps:$4 sm:$0xff]   ;;  %v9704_v10 = vld [vmem:[%s11643_s24 + $0x274] ss:$12 sps:$4 sm:$0xff]  }
 0x42f   :  { %6463 = vmatprep.mubr.bf16.mxu0 %v11220_v55  ;;  %5289 = vmatprep.subr.bf16.mxu1 %v9647_v25  ;;  %v9707_v62 = vld [vmem:[%s11636_s21 + $0xca4] ss:$24 sps:$4 sm:$0xff]   ;;  %v9705_v45 = vld [vmem:[%s11636_s21 + $0xca0] ss:$24 sps:$4 sm:$0xff]   ;;  %v9708_v48 = vld [vmem:[%s11643_s24 + $0x288] ss:$12 sps:$4 sm:$0xff]  }
 0x430   :  { %6433 = vmatprep.subr.bf16.mxu0 %v9650_v26  ;;  %v9713_v25 = vld [vmem:[%s11636_s21 + $0xcd4] ss:$24 sps:$4 sm:$0xff]   ;;  %v2170_v26 = vrot.slane %v11175_v59, %v10446_v36 }
 0x432   :  { %5290 = vmatpush1.bf16.msra.mxu1 %v9645_v56  ;;  %6434 = vmatpush1.bf16.msra.mxu0 %v9648_v19  ;;  %v9716_v56 = vld [vmem:[%s11643_s24 + $0x2a4] ss:$12 sps:$4 sm:$0xff]  }
 0x433   :  { %5291 = vmatprep.subr.bf16.mxu1 %v9653_v57  ;;  %6435 = vmatprep.subr.bf16.mxu0 %v9656_v33  ;;  %v9711_v19 = vld [vmem:[%s11636_s21 + $0xcd0] ss:$24 sps:$4 sm:$0xff]   ;;  %v9714_v57 = vld [vmem:[%s11643_s24 + $0x2a0] ss:$12 sps:$4 sm:$0xff]   ;;  %v9719_v33 = vld [vmem:[%s11636_s21 + $0xd04] ss:$24 sps:$4 sm:$0xff]  }
 0x436   :  { %5292 = vmatpush1.bf16.msra.mxu1 %v9651_v61  ;;  %6436 = vmatpush1.bf16.msra.mxu0 %v9654_v0  ;;  %v8694_v61 = vadd.f32 %v11198_v17, %v2170_v26  ;;  %v5407_v0 = vrot.slane %v11179_v51, %v10446_v36  ;;  %v9728_v17 = vld [vmem:[%s11643_s24 + $0x2d4] ss:$12 sps:$4 sm:$0xff]  }
 0x437   :  { %5293 = vmatprep.subr.bf16.mxu1 %v9659_v63  ;;  %6437 = vmatprep.subr.bf16.mxu0 %v9662_v53  ;;  %v9722_v63 = vld [vmem:[%s11643_s24 + $0x2bc] ss:$12 sps:$4 sm:$0xff]   ;;  %v9717_v53 = vld [vmem:[%s11636_s21 + $0xd00] ss:$24 sps:$4 sm:$0xff]  }
 0x438   :  { %v9750_v26 = vld [vmem:[%s11636_s21 + $0xe80] ss:$24 sps:$4 sm:$0xff]  }
 0x43a   :  { %5294 = vmatpush1.bf16.msra.mxu1 %v9657_v2  ;;  %6438 = vmatpush1.bf16.msra.mxu0 %v9660_v3  ;;  %v9720_v2 = vld [vmem:[%s11643_s24 + $0x2b8] ss:$12 sps:$4 sm:$0xff]   ;;  %v9725_v3 = vld [vmem:[%s11636_s21 + $0xd34] ss:$24 sps:$4 sm:$0xff]  }
 0x43b   :  { %5295 = vmatprep.subr.bf16.mxu1 %v9665_v4  ;;  %6439 = vmatprep.subr.bf16.mxu0 %v9668_v6  ;;  %v5428_v4 = vmul.f32 %v8694_v61, %v5407_v0  ;;  %v5445_v6 = vrot.slane %v11184_v29, %v10446_v36  ;;  %v9758_v61 = vld [vmem:[%s11636_s21 + $0xee4] ss:$24 sps:$4 sm:$0xff]  }
 0x43c   :  { %v9782_v0 = vld [vmem:[%s11643_s24 + $0x390] ss:$12 sps:$4 sm:$0xff]  }
 0x43e   :  { %5296 = vmatpush1.bf16.msra.mxu1 %v9663_v54  ;;  %6440 = vmatpush1.bf16.msra.mxu0 %v9666_v41  ;;  %v9723_v54 = vld [vmem:[%s11636_s21 + $0xd30] ss:$24 sps:$4 sm:$0xff]  }
 0x43f   :  { %5297 = vmatprep.subr.bf16.mxu1 %v9671_v7  ;;  %6441 = vmatprep.subr.bf16.mxu0 %v9674_v28  ;;  %v9726_v41 = vld [vmem:[%s11643_s24 + $0x2d0] ss:$12 sps:$4 sm:$0xff]   ;;  %v5466_v28 = vadd.f32 %v5445_v6, %v5428_v4  ;;  %v2156_v4 = vld [vmem:[%s11636_s21 + $0xf40] sm:$0x33] }
 0x440   :  { %v9731_v7 = vld [vmem:[%s11636_s21 + $0xd64] ss:$24 sps:$4 sm:$0xff]  }
 0x441   :  { %v9790_v6 = vld [vmem:[%s11643_s24 + $0x3c4] ss:$12 sps:$4 sm:$0xff]  }
 0x442   :  { %5298 = vmatpush1.bf16.msra.mxu1 %v9669_v9  ;;  %6442 = vmatpush1.bf16.msra.mxu0 %v9672_v11  ;;  %v9734_v9 = vld [vmem:[%s11643_s24 + $0x2ec] ss:$12 sps:$4 sm:$0xff]  }
 0x443   :  { %5299 = vmatprep.subr.bf16.mxu1 %v9677_v35  ;;  %6443 = vmatprep.subr.bf16.mxu0 %v9680_v12  ;;  %v9729_v11 = vld [vmem:[%s11636_s21 + $0xd60] ss:$24 sps:$4 sm:$0xff]   ;;  %v9732_v35 = vld [vmem:[%s11643_s24 + $0x2e8] ss:$12 sps:$4 sm:$0xff]  }
 0x444   :  { %v9737_v12 = vld [vmem:[%s11636_s21 + $0xd94] ss:$24 sps:$4 sm:$0xff]  }
 0x446   :  { %5300 = vmatpush1.bf16.msra.mxu1 %v9675_v46  ;;  %6444 = vmatpush1.bf16.msra.mxu0 %v9678_v13  ;;  %v5472_v46 = vmax.f32 %v5466_v28, 0.0  ;;  %v9766_v13 = vld [vmem:[%s11643_s24 + $0x304] ss:$12 sps:$4 sm:$0xff]  }
 0x447   :  { %5301 = vmatprep.subr.bf16.mxu1 %v9683_v14  ;;  %6445 = vmatprep.subr.bf16.mxu0 %v9686_v15  ;;  %v9735_v14 = vld [vmem:[%s11636_s21 + $0xd90] ss:$24 sps:$4 sm:$0xff]   ;;  %v9740_v15 = vld [vmem:[%s11636_s21 + $0xdc4] ss:$24 sps:$4 sm:$0xff]  }
 0x44a   :  { %5302 = vmatpush1.bf16.msra.mxu1 %v9681_v16  ;;  %6446 = vmatpush1.bf16.msra.mxu0 %v9684_v22  ;;  %v9764_v16 = vld [vmem:[%s11643_s24 + $0x300] ss:$12 sps:$4 sm:$0xff]   ;;  %v11295_v22 = vpack.c.bf16 %v5472_v46, %v5472_v46  ;;  %v9799_v46 = vld [vmem:[%s11643_s24 + $0x408] ss:$12 sps:$4 sm:$0x3f]  }
 0x44b   :  { %5312 = vmatprep.subr.bf16.mxu1 %v9689_v23  ;;  %6447 = vmatprep.subr.bf16.mxu0 %v9692_v18  ;;  %v9769_v23 = vld [vmem:[%s11643_s24 + $0x31c] ss:$12 sps:$4 sm:$0xff]   ;;  %v9738_v18 = vld [vmem:[%s11636_s21 + $0xdc0] ss:$24 sps:$4 sm:$0xff]  }
 0x44d   :  { %5304 = vmatmul.mubr.bf16.vlgmr.msra.gmra.mrb[24].mxu1 %v10922_v37  ;;  %v9702_v37 = vld [vmem:[%s11643_s24 + $0x270] ss:$12 sps:$4 sm:$0xff]  }
 0x44e   :  { %5313 = vmatpush1.bf16.msra.mxu1 %v9687_v31  ;;  %5344 = vmatprep.mubr.bf16.mxu1 %v10926_v42  ;;  %v9710_v42 = vld [vmem:[%s11643_s24 + $0x28c] ss:$12 sps:$4 sm:$0xff]  }
 0x44f   :  { %6448 = vmatpush1.bf16.msra.mxu0 %v9690_v32  ;;  %5314 = vmatprep.subr.bf16.mxu1 %v9695_v34  ;;  %v9743_v31 = vld [vmem:[%s11636_s21 + $0xdf4] ss:$24 sps:$4 sm:$0xff]   ;;  %v9767_v32 = vld [vmem:[%s11643_s24 + $0x318] ss:$12 sps:$4 sm:$0xff]  }
 0x450   :  { %6449 = vmatprep.subr.bf16.mxu0 %v9698_v24  ;;  %v9772_v34 = vld [vmem:[%s11643_s24 + $0x334] ss:$12 sps:$4 sm:$0xff]   ;;  %v9741_v24 = vld [vmem:[%s11636_s21 + $0xdf0] ss:$24 sps:$4 sm:$0xff]  }
 0x452   :  { %5315 = vmatpush1.bf16.msra.mxu1 %v9693_v40  ;;  %v9746_v40 = vld [vmem:[%s11636_s21 + $0xe24] ss:$24 sps:$4 sm:$0xff]  }
 0x453   :  { %6450 = vmatpush1.bf16.msra.mxu0 %v9696_v43  ;;  %5316 = vmatprep.subr.bf16.mxu1 %v9701_v44  ;;  %v9770_v43 = vld [vmem:[%s11643_s24 + $0x330] ss:$12 sps:$4 sm:$0xff]   ;;  %v9775_v44 = vld [vmem:[%s11643_s24 + $0x34c] ss:$12 sps:$4 sm:$0xff]  }
 0x454   :  { %6451 = vmatprep.subr.bf16.mxu0 %v9704_v10  ;;  %v9744_v10 = vld [vmem:[%s11636_s21 + $0xe20] ss:$24 sps:$4 sm:$0xff]  }
 0x456   :  { %5317 = vmatpush1.bf16.msra.mxu1 %v9699_v38  ;;  %v9749_v38 = vld [vmem:[%s11636_s21 + $0xe54] ss:$24 sps:$4 sm:$0xff]  }
 0x457   :  { %6452 = vmatpush1.bf16.msra.mxu0 %v9702_v37  ;;  %5318 = vmatprep.subr.bf16.mxu1 %v9707_v62  ;;  %v9773_v37 = vld [vmem:[%s11643_s24 + $0x348] ss:$12 sps:$4 sm:$0xff]   ;;  %v9778_v62 = vld [vmem:[%s11643_s24 + $0x364] ss:$12 sps:$4 sm:$0xff]  }
 0x458   :  { %6453 = vmatprep.subr.bf16.mxu0 %v9710_v42  ;;  %v9747_v42 = vld [vmem:[%s11636_s21 + $0xe50] ss:$24 sps:$4 sm:$0xff]  }
 0x45a   :  { %5319 = vmatpush1.bf16.msra.mxu1 %v9705_v45  ;;  %v9752_v45 = vld [vmem:[%s11636_s21 + $0xe84] ss:$24 sps:$4 sm:$0xff]  }
 0x45b   :  { %6454 = vmatpush1.bf16.msra.mxu0 %v9708_v48  ;;  %5320 = vmatprep.subr.bf16.mxu1 %v9713_v25  ;;  %v9776_v48 = vld [vmem:[%s11643_s24 + $0x360] ss:$12 sps:$4 sm:$0xff]   ;;  %v9781_v25 = vld [vmem:[%s11643_s24 + $0x37c] ss:$12 sps:$4 sm:$0xff]  }
 0x45c   :  { %6455 = vmatprep.subr.bf16.mxu0 %v9716_v56  ;;  %v9755_v56 = vld [vmem:[%s11636_s21 + $0xeb4] ss:$24 sps:$4 sm:$0xff]  }
 0x45e   :  { %5321 = vmatpush1.bf16.msra.mxu1 %v9711_v19  ;;  %v9779_v19 = vld [vmem:[%s11643_s24 + $0x378] ss:$12 sps:$4 sm:$0xff]  }
 0x45f   :  { %6456 = vmatpush1.bf16.msra.mxu0 %v9714_v57  ;;  %5322 = vmatprep.subr.bf16.mxu1 %v9719_v33  ;;  %v9784_v57 = vld [vmem:[%s11643_s24 + $0x394] ss:$12 sps:$4 sm:$0xff]   ;;  %v9753_v33 = vld [vmem:[%s11636_s21 + $0xeb0] ss:$24 sps:$4 sm:$0xff]  }
 0x460   :  { %6457 = vmatprep.subr.bf16.mxu0 %v9722_v63  ;;  %v9787_v63 = vld [vmem:[%s11643_s24 + $0x3ac] ss:$12 sps:$4 sm:$0xff]  }
 0x462   :  { %5323 = vmatpush1.bf16.msra.mxu1 %v9717_v53  ;;  %v9756_v53 = vld [vmem:[%s11636_s21 + $0xee0] ss:$24 sps:$4 sm:$0xff]  }
 0x463   :  { %6458 = vmatpush1.bf16.msra.mxu0 %v9720_v2  ;;  %5324 = vmatprep.subr.bf16.mxu1 %v9725_v3  ;;  %v9761_v2 = vld [vmem:[%s11636_s21 + $0xf14] ss:$24 sps:$4 sm:$0xff]  }
 0x464   :  { %6459 = vmatprep.subr.bf16.mxu0 %v9728_v17  ;;  %v9785_v3 = vld [vmem:[%s11643_s24 + $0x3a8] ss:$12 sps:$4 sm:$0xff]  }
 0x465   :  { %v9759_v17 = vld [vmem:[%s11636_s21 + $0xf10] ss:$24 sps:$4 sm:$0xff]   ;;  %s10079_s21 = smov [#allocation7]  }
 0x466   :  { %5325 = vmatpush1.bf16.msra.mxu1 %v9723_v54  ;;  %v8238_v54 = vcombine.high %v2156_v4, %v2156_v4  ;;  %s7542_s25 = sshll.u32 %s10079_s21, 4  ;;  %s7543_s25 = int_to_ptr.vmem [resolvable:$true] %s7542_s25 }
 0x467   :  { %6460 = vmatpush1.bf16.msra.mxu0 %v9726_v41  ;;  %5326 = vmatprep.subr.bf16.mxu1 %v9731_v7  ;;  %v8237_v41 = vcombine.low %v2156_v4, %v2156_v4  ;;  %v9788_v7 = vld [vmem:[%s11643_s24 + $0x3c0] ss:$12 sps:$4 sm:$0xff]  }
 0x468   :  { %6461 = vmatprep.subr.bf16.mxu0 %v9734_v9  ;;  %v9791_v9 = vld [vmem:[%s11643_s24 + $0x3d8] ss:$12 sps:$4 sm:$0xff]   ;;  %v9818_v4 = vld [vmem:[%s11643_s24 + $0x260] ss:$12 sps:$4 sm:$0xff]  }
 0x469   :  { %v4651_v28 = vsel %vm228_vm0, %v8237_v41, 0  ;;  %v9822_v41 = vld [vmem:[%s11643_s24 + $0x290] ss:$12 sps:$4 sm:$0xff]  }
 0x46a   :  { %5327 = vmatpush1.bf16.msra.mxu1 %v9729_v11  ;;  %v9796_v11 = vld [vmem:[%s11643_s24 + $0x3f4] ss:$12 sps:$4 sm:$0xff]  }
 0x46b   :  { %6462 = vmatpush1.bf16.msra.mxu0 %v9732_v35  ;;  %5328 = vmatprep.subr.bf16.mxu1 %v9737_v12  ;;  %v9794_v35 = vld [vmem:[%s11643_s24 + $0x3f0] ss:$12 sps:$4 sm:$0xff]   ;;  %v9797_v12 = vld [vmem:[%s11643_s24 + $0x40c] ss:$12 sps:$4 sm:$0x3f]  }
 0x46c   :  { %6472 = vmatprep.subr.bf16.mxu0 %v9766_v13  ;;  %v6382_v13 = vsel %vm6380_vm10, %v9799_v46, 0  ;;  %v9832_v46 = vld [vmem:[%s11643_s24 + $0x308] ss:$12 sps:$4 sm:$0xff]  }
 0x46e   :  { %6464 = vmatmul.mubr.bf16.vlgmr.msra.gmra.mrb[32].mxu0 %v11295_v22  ;;  %5329 = vmatpush1.bf16.msra.mxu1 %v9735_v14  ;;  %v2178_v14 = vrot.slane %v11175_v59, %v10789_v21 }
 0x46f   :  { %5330 = vmatprep.subr.bf16.mxu1 %v9740_v15  ;;  %6473 = vmatpush1.bf16.msra.mxu0 %v9764_v16  ;;  %v2182_v15 = vrot.slane %v11175_v59, %v10700_v27  ;;  %v5415_v16 = vrot.slane %v11179_v51, %v10789_v21 }
 0x470   :  { %6474 = vmatprep.subr.bf16.mxu0 %v9769_v23 }
 0x472   :  { %5331 = vmatpush1.bf16.msra.mxu1 %v9738_v18  ;;  %v5419_v18 = vrot.slane %v11179_v51, %v10700_v27 }
 0x473   :  { %5332 = vmatprep.subr.bf16.mxu1 %v9743_v31  ;;  %6475 = vmatpush1.bf16.msra.mxu0 %v9767_v32  ;;  %v5453_v32 = vrot.slane %v11184_v29, %v10789_v21 }
 0x474   :  { %6476 = vmatprep.subr.bf16.mxu0 %v9772_v34 }
 0x476   :  { %5333 = vmatpush1.bf16.msra.mxu1 %v9741_v24 }
 0x477   :  { %5334 = vmatprep.subr.bf16.mxu1 %v9746_v40  ;;  %6477 = vmatpush1.bf16.msra.mxu0 %v9770_v43  ;;  %v5457_v40 = vrot.slane %v11184_v29, %v10700_v27  ;;  %v9802_v27 = vld [vmem:[%s11643_s24 + $0xe0] ss:$12 sps:$4 sm:$0xff]  }
 0x478   :  { %6478 = vmatprep.subr.bf16.mxu0 %v9775_v44  ;;  %v9803_v29 = vld [vmem:[%s11643_s24 + $0x20] ss:$12 sps:$4 sm:$0xff]  }
 0x47a   :  { %5335 = vmatpush1.bf16.msra.mxu1 %v9744_v10 }
 0x47b   :  { %5336 = vmatprep.subr.bf16.mxu1 %v9749_v38  ;;  %6479 = vmatpush1.bf16.msra.mxu0 %v9773_v37 }
 0x47c   :  { %6480 = vmatprep.subr.bf16.mxu0 %v9778_v62 }
 0x47e   :  { %5337 = vmatpush1.bf16.msra.mxu1 %v9747_v42  ;;  %v9801_v42 = vld [vmem:[%s11643_s24 + $0x8] ss:$12 sps:$4 sm:$0xff]  }
 0x47f   :  { %5338 = vmatprep.subr.bf16.mxu1 %v9752_v45  ;;  %6481 = vmatpush1.bf16.msra.mxu0 %v9776_v48  ;;  %v9804_v48 = vld [vmem:[%s11643_s24 + $0xf8] ss:$12 sps:$4 sm:$0xff]  }
 0x480   :  { %6482 = vmatprep.subr.bf16.mxu0 %v9781_v25  ;;  %v9805_v25 = vld [vmem:[%s11643_s24 + $0x38] ss:$12 sps:$4 sm:$0xff]  }
 0x482   :  { %5339 = vmatpush1.bf16.msra.mxu1 %v9750_v26  ;;  %v9806_v26 = vld [vmem:[%s11643_s24 + $0x110] ss:$12 sps:$4 sm:$0xff]  }
 0x483   :  { %5340 = vmatprep.subr.bf16.mxu1 %v9755_v56  ;;  %6483 = vmatpush1.bf16.msra.mxu0 %v9779_v19  ;;  %v9807_v56 = vld [vmem:[%s11643_s24 + $0x50] ss:$12 sps:$4 sm:$0xff]   ;;  %v9808_v19 = vld [vmem:[%s11643_s24 + $0x128] ss:$12 sps:$4 sm:$0xff]  }
 0x484   :  { %6484 = vmatprep.subr.bf16.mxu0 %v9784_v57  ;;  %v9809_v57 = vld [vmem:[%s11643_s24 + $0x68] ss:$12 sps:$4 sm:$0xff]  }
 0x486   :  { %5341 = vmatpush1.bf16.msra.mxu1 %v9753_v33  ;;  %v9811_v33 = vld [vmem:[%s11643_s24 + $0x80] ss:$12 sps:$4 sm:$0xff]  }
 0x487   :  { %5342 = vmatprep.subr.bf16.mxu1 %v9758_v61  ;;  %6485 = vmatpush1.bf16.msra.mxu0 %v9782_v0  ;;  %v9812_v61 = vld [vmem:[%s11643_s24 + $0x158] ss:$12 sps:$4 sm:$0xff]  }
 0x488   :  { %6486 = vmatprep.subr.bf16.mxu0 %v9787_v63  ;;  %v9813_v0 = vld [vmem:[%s11643_s24 + $0x98] ss:$12 sps:$4 sm:$0xff]   ;;  %v9814_v63 = vld [vmem:[%s11643_s24 + $0x170] ss:$12 sps:$4 sm:$0xff]  }
 0x48a   :  { %5343 = vmatpush1.bf16.msra.mxu1 %v9756_v53  ;;  %v9815_v53 = vld [vmem:[%s11643_s24 + $0xb0] ss:$12 sps:$4 sm:$0xff]  }
 0x48b   :  { %5353 = vmatprep.subr.bf16.mxu1 %v9761_v2  ;;  %6487 = vmatpush1.bf16.msra.mxu0 %v9785_v3  ;;  %v9816_v2 = vld [vmem:[%s11643_s24 + $0x248] ss:$12 sps:$4 sm:$0xff]  }
 0x48c   :  { %6488 = vmatprep.subr.bf16.mxu0 %v9790_v6  ;;  %v9817_v3 = vld [vmem:[%s11643_s24 + $0x188] ss:$12 sps:$4 sm:$0xff]   ;;  %v9819_v6 = vld [vmem:[%s11643_s24 + $0x1a0] ss:$12 sps:$4 sm:$0xff]  }
 0x48d   :  { %5345 = vmatmul.mubr.bf16.vlgmr.msra.gmra.mrb[24].mxu1 %v11011_v39  ;;  %v9793_v39 = vld [vmem:[%s11643_s24 + $0x3dc] ss:$12 sps:$4 sm:$0xff]  }
 0x48e   :  { %5354 = vmatpush1.bf16.msra.mxu1 %v9759_v17  ;;  %5385 = vmatprep.mubr.bf16.mxu1 %v10076_v20  ;;  %v9820_v17 = vld [vmem:[%s11643_s24 + $0x278] ss:$12 sps:$4 sm:$0xff]  }
 0x48f   :  { %8243 = vmatprep.subr.msk.bf16.mxu1 %vm228_vm0, %v8238_v54  ;;  %6489 = vmatpush1.bf16.msra.mxu0 %v9788_v7  ;;  %v9821_v54 = vld [vmem:[%s11643_s24 + $0x1b8] ss:$12 sps:$4 sm:$0xff]   ;;  %v9823_v7 = vld [vmem:[%s11643_s24 + $0x1d0] ss:$12 sps:$4 sm:$0xff]  }
 0x490   :  { %6490 = vmatprep.subr.bf16.mxu0 %v9793_v39  ;;  %v9827_v39 = vld [vmem:[%s11643_s24 + $0x200] ss:$12 sps:$4 sm:$0xff]  }
 0x492   :  { %5356 = vmatpush1.bf16.msra.mxu1 %v4651_v28  ;;  %v9825_v28 = vld [vmem:[%s11643_s24 + $0x1e8] ss:$12 sps:$4 sm:$0xff]  }
 0x493   :  { %8580 = vmatprep.subr.bf16.mxu1 %v10074_v1  ;;  %6491 = vmatpush1.bf16.msra.mxu0 %v9791_v9  ;;  %v9828_v9 = vld [vmem:[%s11643_s24 + $0x2d8] ss:$12 sps:$4 sm:$0xff]  }
 0x494   :  { %6492 = vmatprep.subr.bf16.mxu0 %v9796_v11  ;;  %v9829_v11 = vld [vmem:[%s11643_s24 + $0x218] ss:$12 sps:$4 sm:$0xff]  }
 0x497   :  { %6493 = vmatpush1.bf16.msra.mxu0 %v9794_v35  ;;  %v9830_v35 = vld [vmem:[%s11643_s24 + $0x2f0] ss:$12 sps:$4 sm:$0xff]  }
 0x498   :  { %8377 = vmatprep.subr.msk.bf16.mxu0 %vm6380_vm10, %v9797_v12  ;;  %v9831_v12 = vld [vmem:[%s11643_s24 + $0x230] ss:$12 sps:$4 sm:$0xff]  }
 0x499   :  { %8244 = vmatmul.mubr.msk.bf16.vlgmr.msra.gmra.mrb[24].mxu1 %vm4634_vm9, %v11023_v50  ;;  %v9800_v50 = vld [vmem:[%s11643_s24 + $0xc8] ss:$12 sps:$4 sm:$0xff]  }
 0x49a   :  { %8586 = vmatprep.mubr.msk.bf16.mxu1 %vm10075_vm1, %v10074_v1 }
 0x49b   :  { %6495 = vmatpush1.bf16.msra.mxu0 %v6382_v13  ;;  %v9833_v13 = vld [vmem:[%s11643_s24 + $0x320] ss:$12 sps:$4 sm:$0xff]  }
 0x49c   :  { %8450 = vmatprep.subr.bf16.mxu0 %v9800_v50  ;;  %v9834_v50 = vld [vmem:[%s11643_s24 + $0x338] ss:$12 sps:$4 sm:$0xff]  }
 0x56c   :  { %v5387_v23 = vpop.f32.mrb[24].mxu1 }
 0x56d   :  { %v8696_v31 = vadd.f32 %v5387_v23, %v2178_v14  ;;  %v5389_v34 = vpop.f32.mrb[25].mxu1  ;;  %v9835_v14 = vld [vmem:[%s11643_s24 + $0x350] ss:$12 sps:$4 sm:$0xff]  }
 0x56e   :  { %v8697_v24 = vadd.f32 %v5389_v34, %v2182_v15  ;;  %v5391_v43 = vpop.f32.mrb[26].mxu1  ;;  %v9837_v15 = vld [vmem:[%s11643_s24 + $0x380] ss:$12 sps:$4 sm:$0xff]   ;;  %v9839_v23 = vld [vmem:[%s11643_s24 + $0x3b0] ss:$12 sps:$4 sm:$0xff]  }
 0x56f   :  { %v5430_v59 = vmul.f32 %v8696_v31, %v5415_v16  ;;  %v5392_v44 = vpop.f32.mrb[27].mxu1  ;;  %v9838_v16 = vld [vmem:[%s11643_s24 + $0x398] ss:$12 sps:$4 sm:$0xff]   ;;  %v9841_v31 = vld [vmem:[%s11643_s24 + $0x3e0] ss:$12 sps:$4 sm:$0xff]  }
 0x570   :  { %v5431_v10 = vmul.f32 %v8697_v24, %v5419_v18  ;;  %v9840_v18 = vld [vmem:[%s11643_s24 + $0x3c8] ss:$12 sps:$4 sm:$0xff]   ;;  %v9843_v34 = vld [vmem:[%s11643_s24 + $0x410] ss:$12 sps:$4 sm:$0x3f]   ;;  %v9845_v43 = vld [vmem:[%s11647_s7] sm:$0xff]  }
 0x571   :  { %v5468_v38 = vadd.f32 %v5453_v32, %v5430_v59  ;;  %v9842_v32 = vld [vmem:[%s11643_s24 + $0x3f8] ss:$12 sps:$4 sm:$0xff]   ;;  %v6388_v24 = vsel %vm6380_vm10, %v9843_v34, 0  ;;  %v9846_v59 = vld [vmem:[%s11647_s7 + $0x48] sm:$0xff]  }
 0x572   :  { %v5469_v37 = vadd.f32 %v5457_v40, %v5431_v10  ;;  %v9844_v40 = vld [vmem:[%s11647_s7 + $0x40] sm:$0xff]   ;;  %v9847_v44 = vld [vmem:[%s11647_s7 + $0x8] sm:$0xff]   ;;  %v9848_v10 = vld [vmem:[%s11647_s7 + $0x50] sm:$0xff]  }
 0x573   :  { %v5474_v51 = vmax.f32 %v5468_v38, 0.0  ;;  %v9850_v38 = vld [vmem:[%s11647_s7 + $0x58] sm:$0xff]  }
 0x574   :  { %v5475_v62 = vmax.f32 %v5469_v37, 0.0  ;;  %v9851_v37 = vld [vmem:[%s11647_s7 + $0x18] sm:$0xff]  }
 0x575   :  { %v11363_v45 = vpack.c.bf16 %v5474_v51, %v5474_v51  ;;  %v9852_v51 = vld [vmem:[%s11647_s7 + $0x60] sm:$0xff]  }
 0x576   :  { %v11360_v21 = vpack.c.bf16 %v5475_v62, %v5475_v62  ;;  %v9853_v62 = vld [vmem:[%s11647_s7 + $0x20] sm:$0xff]  }
 0x578   :  { %8378 = vmatprep.mubr.msk.bf16.mxu0 %vm6376_vm11, %v11360_v21 }
 0x579   :  { %6505 = vmatmul.mubr.bf16.vlgmr.msra.gmra.mrb[32].mxu0 %v11363_v45 }
 0x57a   :  { %8451 = vmatpush3.bf16.msra.mxu0 %v9801_v42  ;;  %6545 = vmatprep.mubr.bf16.mxu0 %v11211_v47  ;;  %v9810_v47 = vld [vmem:[%s11643_s24 + $0x140] ss:$12 sps:$4 sm:$0xff]  }
 0x57b   :  { %8452 = vmatprep.subr.bf16.mxu0 %v9802_v27  ;;  %v9855_v42 = vld [vmem:[%s11647_s7 + $0x28] sm:$0xff]   ;;  %v9857_v27 = vld [vmem:[%s11647_s7 + $0x30] sm:$0xff]  }
 0x57e   :  { %8453 = vmatpush3.bf16.msra.mxu0 %v9803_v29  ;;  %v9858_v29 = vld [vmem:[%s11647_s7 + $0x78] sm:$0xff]  }
 0x57f   :  { %8454 = vmatprep.subr.bf16.mxu0 %v9804_v48  ;;  %v9859_v48 = vld [vmem:[%s11647_s7 + $0x38] sm:$0xff]  }
 0x582   :  { %8455 = vmatpush3.bf16.msra.mxu0 %v9805_v25  ;;  %v10077_v25 = vmov 0.0|0.0  }
 0x583   :  { %8456 = vmatprep.subr.bf16.mxu0 %v9806_v26  ;;  %v9860_v26 = vld [vmem:[%s11647_s7 + $0x80] sm:$0xff]  }
 0x584   :  { %8581 = vmatpush3.bf16.msra.mxu1 %v9860_v26 }
 0x585   :  { %8582 = vmatprep.subr.bf16.mxu1 %v10074_v1 }
 0x586   :  { %8457 = vmatpush3.bf16.msra.mxu0 %v9807_v56  ;;  %v9861_v56 = vld [vmem:[%s11647_s7 + $0x88] sm:$0xff]  }
 0x587   :  { %8458 = vmatprep.subr.bf16.mxu0 %v9808_v19  ;;  %v9862_v19 = vld [vmem:[%s11647_s7 + $0x90] sm:$0x3f]  }
 0x588   :  { %8583 = vmatpush3.bf16.msra.mxu1 %v9861_v56 }
 0x589   :  { %8584 = vmatprep.subr.bf16.mxu1 %v10074_v1 }
 0x58a   :  { %8459 = vmatpush3.bf16.msra.mxu0 %v9809_v57  ;;  %v6842_v57 = vsel %vm6380_vm10, %v9862_v19, 0 }
 0x58b   :  { %8460 = vmatprep.subr.bf16.mxu0 %v9810_v47  ;;  %v5658_v47 = vld [vmem:[%s11648_s10] sm:$0x7] }
 0x58c   :  { %8585 = vmatpush3.bf16.msra.mxu1 %v6842_v57 }
 0x58d   :  { %8662 = vmatprep.subr.bf16.mxu1 %v10077_v25 }
 0x58e   :  { %8461 = vmatpush3.bf16.msra.mxu0 %v9811_v33  ;;  %v11456_v33 = vld [vmem:[%s11649_s11] sm:$0x7] }
 0x58f   :  { %8462 = vmatprep.subr.bf16.mxu0 %v9812_v61  ;;  %v5663_v61 = vrot.slane %v5658_v47, %v10424_v5 }
 0x592   :  { %8463 = vmatpush3.bf16.msra.mxu0 %v9813_v0  ;;  %v11460_v0 = vld [vmem:[%s11650_s15] sm:$0x7] }
 0x593   :  { %8464 = vmatprep.subr.bf16.mxu0 %v9814_v63  ;;  %v5667_v63 = vrot.slane %v5658_v47, %v10429_v8 }
 0x596   :  { %8465 = vmatpush3.bf16.msra.mxu0 %v9815_v53  ;;  %v6638_v53 = vrot.slane %v11456_v33, %v10424_v5 }
 0x597   :  { %8472 = vmatprep.subr.bf16.mxu0 %v9816_v2 }
 0x599   :  { %6546 = vmatmul.mubr.bf16.vlgmr.msra.gmra.mrb[36].mxu0 %v11214_v49  ;;  %v9824_v49 = vld [vmem:[%s11643_s24 + $0x2a8] ss:$12 sps:$4 sm:$0xff]  }
 0x59a   :  { %8473 = vmatpush3.bf16.msra.mxu0 %v9817_v3  ;;  %6585 = vmatprep.mubr.bf16.mxu0 %v11220_v55  ;;  %v9826_v55 = vld [vmem:[%s11643_s24 + $0x2c0] ss:$12 sps:$4 sm:$0xff]   ;;  %v6642_v3 = vrot.slane %v11456_v33, %v10429_v8 }
 0x59b   :  { %8474 = vmatprep.subr.bf16.mxu0 %v9818_v4 }
 0x59e   :  { %8475 = vmatpush3.bf16.msra.mxu0 %v9819_v6  ;;  %v6658_v6 = vrot.slane %v11460_v0, %v10424_v5 }
 0x59f   :  { %8476 = vmatprep.subr.bf16.mxu0 %v9820_v17 }
 0x5a2   :  { %8477 = vmatpush3.bf16.msra.mxu0 %v9821_v54 }
 0x5a3   :  { %8478 = vmatprep.subr.bf16.mxu0 %v9822_v41  ;;  %v6662_v41 = vrot.slane %v11460_v0, %v10429_v8 }
 0x5a6   :  { %8479 = vmatpush3.bf16.msra.mxu0 %v9823_v7 }
 0x5a7   :  { %8480 = vmatprep.subr.bf16.mxu0 %v9824_v49 }
 0x5aa   :  { %8481 = vmatpush3.bf16.msra.mxu0 %v9825_v28 }
 0x5ab   :  { %8482 = vmatprep.subr.bf16.mxu0 %v9826_v55 }
 0x5ae   :  { %8483 = vmatpush3.bf16.msra.mxu0 %v9827_v39 }
 0x5af   :  { %8484 = vmatprep.subr.bf16.mxu0 %v9828_v9 }
 0x5b2   :  { %8485 = vmatpush3.bf16.msra.mxu0 %v9829_v11 }
 0x5b3   :  { %8486 = vmatprep.subr.bf16.mxu0 %v9830_v35  ;;  %v6946_v35 = vld [vmem:[%s11651_s16] sm:$0xff] }
 0x5b6   :  { %8487 = vmatpush3.bf16.msra.mxu0 %v9831_v12  ;;  %v6947_v12 = vld [vmem:[%s11651_s16 + $0x8] sm:$0xff] }
 0x5b7   :  { %6593 = vmatprep.subr.bf16.mxu0 %v10076_v20 }
 0x5b9   :  { %6586 = vmatmul.mubr.bf16.vlgmr.msra.gmra.mrb[40].mxu0 %v11295_v22  ;;  %v9836_v22 = vld [vmem:[%s11643_s24 + $0x368] ss:$12 sps:$4 sm:$0xff]  }
 0x5ba   :  { %6594 = vmatpush1.bf16.msra.mxu0 %v9832_v46  ;;  %8379 = vmatprep.mubr.msk.bf16.mxu0 %vm6376_vm11, %v11360_v21  ;;  %v9854_v21 = vld [vmem:[%s11647_s7 + $0x68] sm:$0xff]  }
 0x5bb   :  { %6595 = vmatprep.subr.bf16.mxu0 %v10076_v20 }
 0x5be   :  { %6596 = vmatpush1.bf16.msra.mxu0 %v9833_v13  ;;  %v8657_v13 = vpack.c.bf16 %v6947_v12, %v6946_v35 }
 0x5bf   :  { %6597 = vmatprep.subr.bf16.mxu0 %v10076_v20 }
 0x5c2   :  { %6598 = vmatpush1.bf16.msra.mxu0 %v9834_v50 }
 0x5c3   :  { %6599 = vmatprep.subr.bf16.mxu0 %v10076_v20 }
 0x5c6   :  { %6600 = vmatpush1.bf16.msra.mxu0 %v9835_v14  ;;  %v6948_v14 = vld [vmem:[%s11651_s16 + $0x10] sm:$0xff] }
 0x5c7   :  { %6601 = vmatprep.subr.bf16.mxu0 %v10076_v20 }
 0x5ca   :  { %6602 = vmatpush1.bf16.msra.mxu0 %v9836_v22  ;;  %v6949_v22 = vld [vmem:[%s11651_s16 + $0x18] sm:$0xff] }
 0x5cb   :  { %6603 = vmatprep.subr.bf16.mxu0 %v10076_v20  ;;  %v8660_v8 = vpack.c.bf16 %v6949_v22, %v6948_v14 }
 0x5ce   :  { %6604 = vmatpush1.bf16.msra.mxu0 %v9837_v15  ;;  %v7102_v15 = vld [vmem:[%s11652_s18] sm:$0xff] }
 0x5cf   :  { %6605 = vmatprep.subr.bf16.mxu0 %v10076_v20 }
 0x5d2   :  { %6606 = vmatpush1.bf16.msra.mxu0 %v9838_v16  ;;  %v7103_v16 = vld [vmem:[%s11652_s18 + $0x8] sm:$0xff] }
 0x5d3   :  { %6607 = vmatprep.subr.bf16.mxu0 %v10076_v20 }
 0x5d6   :  { %6608 = vmatpush1.bf16.msra.mxu0 %v9839_v23  ;;  %v8669_v23 = vpack.c.bf16 %v7103_v16, %v7102_v15 }
 0x5d7   :  { %6609 = vmatprep.subr.bf16.mxu0 %v10076_v20 }
 0x5da   :  { %6610 = vmatpush1.bf16.msra.mxu0 %v9840_v18  ;;  %v7104_v18 = vld [vmem:[%s11652_s18 + $0x10] sm:$0xff] }
 0x5db   :  { %6611 = vmatprep.subr.bf16.mxu0 %v10076_v20 }
 0x5de   :  { %6612 = vmatpush1.bf16.msra.mxu0 %v9841_v31  ;;  %v7105_v31 = vld [vmem:[%s11652_s18 + $0x18] sm:$0xff] }
 0x5df   :  { %6613 = vmatprep.subr.bf16.mxu0 %v10076_v20 }
 0x5e2   :  { %6614 = vmatpush1.bf16.msra.mxu0 %v9842_v32  ;;  %v8672_v32 = vpack.c.bf16 %v7105_v31, %v7104_v18 }
 0x5e3   :  { %6615 = vmatprep.subr.bf16.mxu0 %v10076_v20  ;;  %v9849_v20 = vld [vmem:[%s11647_s7 + $0x10] sm:$0xff]  }
 0x5e6   :  { %6616 = vmatpush1.bf16.msra.mxu0 %v6388_v24 }
 0x5e7   :  { %8494 = vmatprep.subr.bf16.mxu0 %v9844_v40 }
 0x5e9   :  { %6626 = vmatmul.mubr.bf16.vlgmr.msra.gmra.mrb[44].mxu0 %v11363_v45  ;;  %v9856_v45 = vld [vmem:[%s11647_s7 + $0x70] sm:$0xff]  }
 0x5ea   :  { %8495 = vmatpush3.bf16.msra.mxu0 %v9845_v43 }
 0x5eb   :  { %8496 = vmatprep.subr.bf16.mxu0 %v9846_v59 }
 0x5ee   :  { %8497 = vmatpush3.bf16.msra.mxu0 %v9847_v44  ;;  %v5671_v44 = vrot.slane %v5658_v47, %v10446_v36  ;;  %v7024_v47 = vld [vmem:[%s11653_s22] sm:$0xff] }
 0x5ef   :  { %8498 = vmatprep.subr.bf16.mxu0 %v9848_v10 }
 0x5f2   :  { %8499 = vmatpush3.bf16.msra.mxu0 %v9849_v20 }
 0x5f3   :  { %8500 = vmatprep.subr.bf16.mxu0 %v9850_v38 }
 0x5f6   :  { %8501 = vmatpush3.bf16.msra.mxu0 %v9851_v37 }
 0x5f7   :  { %8502 = vmatprep.subr.bf16.mxu0 %v9852_v51 }
 0x5fa   :  { %8503 = vmatpush3.bf16.msra.mxu0 %v9853_v62 }
 0x5fb   :  { %8504 = vmatprep.subr.bf16.mxu0 %v9854_v21 }
 0x5fe   :  { %8505 = vmatpush3.bf16.msra.mxu0 %v9855_v42  ;;  %v6646_v42 = vrot.slane %v11456_v33, %v10446_v36  ;;  %v7026_v33 = vld [vmem:[%s11653_s22 + $0x10] sm:$0xff] }
 0x5ff   :  { %8506 = vmatprep.subr.bf16.mxu0 %v9856_v45 }
 0x602   :  { %8507 = vmatpush3.bf16.msra.mxu0 %v9857_v27 }
 0x603   :  { %8508 = vmatprep.subr.bf16.mxu0 %v9858_v29  ;;  %v6666_v29 = vrot.slane %v11460_v0, %v10446_v36  ;;  %v7180_v0 = vld [vmem:[%s11654_s23] sm:$0xff] }
 0x606   :  { %8509 = vmatpush3.bf16.msra.mxu0 %v9859_v48 }
 0x607   :  { %8656 = vmatprep.subr.bf16.mxu0 %v10077_v25 }
 0x64c   :  { %v6506_v2 = vpop.f32.mrb[32].mxu0 }
 0x64d   :  { %v8698_v4 = vadd.f32 %v6506_v2, %v5663_v61  ;;  %v6508_v17 = vpop.f32.mrb[33].mxu0  ;;  %v7025_v61 = vld [vmem:[%s11653_s22 + $0x8] sm:$0xff] }
 0x64e   :  { %v8699_v54 = vadd.f32 %v6508_v17, %v5667_v63  ;;  %v6510_v7 = vpop.f32.mrb[34].mxu0  ;;  %v7182_v17 = vld [vmem:[%s11654_s23 + $0x10] sm:$0xff] }
 0x64f   :  { %v6650_v49 = vmul.f32 %v8698_v4, %v6638_v53  ;;  %v6511_v28 = vpop.f32.mrb[35].mxu0  ;;  %v8663_v53 = vpack.c.bf16 %v7025_v61, %v7024_v47  ;;  %v7181_v4 = vld [vmem:[%s11654_s23 + $0x8] sm:$0xff] }
 0x650   :  { %v6651_v55 = vmul.f32 %v8699_v54, %v6642_v3  ;;  %v7027_v3 = vld [vmem:[%s11653_s22 + $0x18] sm:$0xff] }
 0x651   :  { %v6670_v39 = vadd.f32 %v6658_v6, %v6650_v49  ;;  %v8666_v36 = vpack.c.bf16 %v7027_v3, %v7026_v33  ;;  %v8675_v6 = vpack.c.bf16 %v7181_v4, %v7180_v0  ;;  %v7183_v54 = vld [vmem:[%s11654_s23 + $0x18] sm:$0xff] }
 0x652   :  { %v6671_v9 = vadd.f32 %v6662_v41, %v6651_v55  ;;  %v8678_v41 = vpack.c.bf16 %v7183_v54, %v7182_v17 }
 0x653   :  { %v6673_v11 = vmax.f32 %v6670_v39, 0.0 }
 0x654   :  { %v6674_v46 = vmax.f32 %v6671_v9, 0.0 }
 0x655   :  { %v6676_v50 = vpack.c.bf16 %v6673_v11, %v6673_v11 }
 0x656   :  { %v6677_v5 = vpack.c.bf16 %v6674_v46, %v6674_v46  ;;  %v8380_v46 = vld [vmem:[%s11655_s26] ss:$0 sm:$0xff] }
 0x658   :  { %6876 = vmatprep.mubr.bf16.mxu0 %v6677_v5 }
 0x659   :  { %6877 = vmatmul.mubr.bf16.vlgmr.msra.gmra.mrb[48].mxu0 %v6676_v50  ;;  %v8401_v50 = vld [vmem:[%s11656_s28] ss:$0 sm:$0xff] }
 0x65a   :  { %8658 = vmatpush3.bf16.msra.mxu0 %v8657_v13  ;;  %8598 = vmatprep.mubr.msk.f32.mxu0 %vm10075_vm1, %v10074_v1 }
 0x65b   :  { %8659 = vmatprep.subr.bf16.mxu0 %v10077_v25 }
 0x65e   :  { %8661 = vmatpush3.bf16.msra.mxu0 %v8660_v8  ;;  %v8402_v8 = vld [vmem:[%s11657_s1] ss:$0 sm:$0xff] }
 0x65f   :  { %8668 = vmatprep.subr.bf16.mxu0 %v10077_v25 }
 0x661   :  { %8599 = vmatmul.mubr.msk.f32.vlgmr.msra.gmra.mrb[52].mxu0 %vm6941_vm5, %v10412_v60 }
 0x662   :  { %8670 = vmatpush3.bf16.msra.mxu0 %v8669_v23  ;;  %8620 = vmatprep.mubr.msk.f32.mxu0 %vm10075_vm1, %v10074_v1 }
 0x663   :  { %8671 = vmatprep.subr.bf16.mxu0 %v10077_v25 }
 0x666   :  { %8673 = vmatpush3.bf16.msra.mxu0 %v8672_v32 }
 0x667   :  { %8680 = vmatprep.subr.bf16.mxu0 %v10077_v25 }
 0x669   :  { %8621 = vmatmul.mubr.msk.f32.vlgmr.msra.gmra.mrb[54].mxu0 %vm6941_vm5, %v10621_v52 }
 0x66a   :  { %8642 = vmatprep.mubr.msk.f32.mxu0 %vm10075_vm1, %v10074_v1 }
 0x66c   :  { %v8466_v34 = vpop.f32.mrb[36].mxu0 }
 0x66d   :  { %v8467_v24 = vpop.f32.mrb[37].mxu0 }
 0x66e   :  { %v8468_v40 = vadd.f32 %v8467_v24, %v8466_v34  ;;  %v8469_v43 = vpop.f32.mrb[38].mxu0 }
 0x66f   :  { %v8470_v59 = vpop.f32.mrb[39].mxu0 }
 0x670   :  { %v6548_v38 = vadd.f32 %v8468_v40, %v5671_v44  ;;  %v7317_v44 = vld [vmem:[%s11658_s2] sm:$0xff] }
 0x68c   :  { %v8488_v10 = vpop.f32.mrb[40].mxu0 }
 0x68d   :  { %v8489_v20 = vpop.f32.mrb[41].mxu0 }
 0x68e   :  { %v8490_v37 = vadd.f32 %v8489_v20, %v8488_v10  ;;  %v8491_v51 = vpop.f32.mrb[42].mxu0  ;;  %v7318_v10 = vld [vmem:[%s11658_s2 + $0x8] sm:$0xff]  ;;  %v7414_v20 = vld [vmem:[%s11659_s0] sm:$0xff] }
 0x68f   :  { %v8492_v62 = vpop.f32.mrb[43].mxu0  ;;  %v7319_v51 = vld [vmem:[%s11658_s2 + $0x10] sm:$0xff] }
 0x690   :  { %v6588_v21 = vadd.f32 %v8490_v37, %v6548_v38  ;;  %v8681_v38 = vpack.c.bf16 %v7318_v10, %v7317_v44  ;;  %v7415_v37 = vld [vmem:[%s11659_s0 + $0x8] sm:$0xff]  ;;  %v7320_v62 = vld [vmem:[%s11658_s2 + $0x18] sm:$0xff] }
 0x692   :  { %8682 = vmatpush3.bf16.msra.mxu0 %v8681_v38 }
 0x693   :  { %8683 = vmatprep.subr.bf16.mxu0 %v10077_v25 }
 0x6bc   :  { %v6627_v45 = vpop.f32.mrb[44].mxu0 }
 0x6bd   :  { %v6628_v27 = vadd.f32 %v6627_v45, %v6588_v21  ;;  %v6629_v48 = vpop.f32.mrb[45].mxu0  ;;  %v8687_v21 = vpack.c.bf16 %v7415_v37, %v7414_v20  ;;  %v7417_v45 = vld [vmem:[%s11659_s0 + $0x18] sm:$0xff] }
 0x6be   :  { %v6630_v26 = vpop.f32.mrb[46].mxu0 }
 0x6bf   :  { %v6652_v56 = vmul.f32 %v6646_v42, %v6628_v27  ;;  %v6631_v19 = vpop.f32.mrb[47].mxu0  ;;  %v7416_v42 = vld [vmem:[%s11659_s0 + $0x10] sm:$0xff]  ;;  %v8684_v27 = vpack.c.bf16 %v7320_v62, %v7319_v51 }
 0x6c1   :  { %v6672_v57 = vadd.f32 %v6666_v29, %v6652_v56  ;;  %v8690_v29 = vpack.c.bf16 %v7417_v45, %v7416_v42  ;;  %8685 = vmatpush3.bf16.msra.mxu0 %v8684_v27 }
 0x6c3   :  { %v6675_v63 = vmax.f32 %v6672_v57, 0.0 }
 0x6c5   :  { %v6678_v2 = vpack.c.bf16 %v6675_v63, %v6675_v63 }
 0x6c7   :  { %8587 = vmatmul.mubr.msk.bf16.vlgmr.msra.gmra.mrb[28].mxu1 %vm6837_vm12, %v6678_v2 }
 0x6c8   :  { %8664 = vmatpush3.bf16.msra.mxu1 %v8663_v53  ;;  %8609 = vmatprep.mubr.msk.f32.mxu1 %vm10075_vm1, %v10074_v1 }
 0x6c9   :  { %8665 = vmatprep.subr.bf16.mxu1 %v10077_v25 }
 0x6cc   :  { %8667 = vmatpush3.bf16.msra.mxu1 %v8666_v36 }
 0x6cd   :  { %8674 = vmatprep.subr.bf16.mxu1 %v10077_v25 }
 0x6cf   :  { %8610 = vmatmul.mubr.msk.f32.vlgmr.msra.gmra.mrb[32].mxu1 %vm6941_vm5, %v10439_v30 }
 0x6d0   :  { %8631 = vmatprep.mubr.msk.f32.mxu1 %vm10075_vm1, %v10074_v1  ;;  %8676 = vmatpush3.bf16.msra.mxu1 %v8675_v6  ;;  %v7299_v6 = vpop.xlane.xlu1 %7298 }
 0x6d1   :  { %8677 = vmatprep.subr.bf16.mxu1 %v10077_v25  ;;  %vm7300_vm15 = vcmp.eq.f32.partialorder %v7299_v6, 0.0 }
 0x6d4   :  { %8679 = vmatpush3.bf16.msra.mxu1 %v8678_v41 }
 0x6d5   :  { %8686 = vmatprep.subr.bf16.mxu1 %v10077_v25 }
 0x72c   :  { %v8510_v7 = vpop.f32.mrb[48].mxu0 }
 0x72d   :  { %v8511_v49 = vpop.f32.mrb[49].mxu0 }
 0x72e   :  { %v8512_v28 = vadd.f32 %v8511_v49, %v8510_v7  ;;  %v8513_v55 = vpop.f32.mrb[50].mxu0 }
 0x72f   :  { %v8514_v39 = vpop.f32.mrb[51].mxu0 }
 0x730   :  { %v6879_v5 = vadd.f32 %v8512_v28, %v8380_v46 }
 0x734   :  { %v7019_v9 = vpop.f32.mrb[52].mxu0 }
 0x735   :  { %v8600_v11 = vpop.f32.mrb[53].mxu0  ;;  %9863 = vtanh.f32 %v7019_v9 }
 0x73c   :  { %v7175_v35 = vpop.f32.mrb[54].mxu0 }
 0x73d   :  { %v8622_v12 = vpop.f32.mrb[55].mxu0 }
 0x73f   :  { %v9864_v40 = vpop.eup %9863 }
 0x79a   :  { %v6918_v13 = vpop.f32.mrb[28].mxu1 }
 0x79b   :  { %v6919_v14 = vadd.f32 %v6918_v13, %v6879_v5  ;;  %v8588_v22 = vpop.f32.mrb[29].mxu1 }
 0x79c   :  { %v6921_v15 = vpop.f32.mrb[30].mxu1 }
 0x79d   :  { %v6931_v16 = vmul.f32 %v8401_v50, %v6919_v14  ;;  %v8589_v23 = vpop.f32.mrb[31].mxu1  ;;  %v8409_v50 = vsel %vm7300_vm15, 1.0, %v10074_v1 }
 0x79f   :  { %v6939_v18 = vadd.f32 %v8402_v8, %v6931_v16 }
 0x7a1   :  { %v11519_v31 = vmax.f32 %v6939_v18, 0.0 }
 0x7a2   :  { %v7097_v32 = vpop.f32.mrb[32].mxu1 }
 0x7a3   :  { %6945 = vst.msk [vmem:[#allocation7] sm:$0xff] %vm6941_vm5, %v11519_v31  ;;  %9865 = vtanh.f32 %v7097_v32  ;;  %v8611_v34 = vpop.f32.mrb[33].mxu1  ;;  %8632 = vmatmul.mubr.msk.f32.vlgmr.msra.gmra.mrb[34].mxu1 %vm6941_vm5, %v11519_v31  ;;  %v7303_v24 = vsel %vm6941_vm5, %v11519_v31, 0.0 }
 0x7a4   :  { %7304 = vadd.xlane.f32.xlu1 %v7303_v24  ;;  %8653 = vmatprep.mubr.msk.f32.mxu1 %vm10075_vm1, %v10074_v1  ;;  %9867 = vtanh.f32 %v7175_v35 }
 0x7a5   :  { %8688 = vmatpush3.bf16.msra.mxu1 %v8687_v21 }
 0x7a6   :  { %8689 = vmatprep.subr.bf16.mxu1 %v10077_v25  ;;  %v7287_v25 = vpop.xlane.xlu0 %7286 }
 0x7a7   :  { %vm7288_vm14 = vcmp.eq.f32.partialorder %v7287_v25, 0.0 }
 0x7a8   :  { %v8407_v13 = vsel %vm7288_vm14, 1.0, %v10074_v1 }
 0x7a9   :  { %8691 = vmatpush3.bf16.msra.mxu1 %v8690_v29 }
 0x7aa   :  { %v7293_v4 = vpop.xlane.xlu0 %7292 }
 0x7ab   :  { %vm7294_vm13 = vcmp.eq.f32.partialorder %v7293_v4, 0.0 }
 0x7ac   :  { %v8408_v12 = vsel %vm7294_vm13, 1.0, %v10074_v1 }
 0x7ad   :  { %v9866_v43 = vpop.eup %9865 }
 0x7ae   :  { %v7258_v59 = vmax.f32 %v9864_v40, %v9866_v43  ;;  %v9868_v56 = vpop.eup %9867 }
 0x831   :  { %v7305_v39 = vpop.xlane.xlu1 %7304 }
 0x832   :  { %vm7306_vm0 = vcmp.eq.f32.partialorder %v7305_v39, 0.0 }
 0x833   :  { %v8410_v22 = vsel %vm7306_vm0, 1.0, %v10074_v1 }
 0x876   :  { %v7253_v48 = vpop.f32.mrb[34].mxu1 }
 0x877   :  { %9869 = vtanh.f32 %v7253_v48  ;;  %v8633_v26 = vpop.f32.mrb[35].mxu1 }
 0x881   :  { %v9870_v19 = vpop.eup %9869 }
 0x882   :  { %v7259_v57 = vmax.f32 %v9868_v56, %v9870_v19 }
 0x884   :  { %v7260_v47 = vmax.f32 %v7258_v59, %v7259_v57 }
 0x886   :  { %v7261_v61 = vsub.f32 %v9864_v40, %v7260_v47  ;;  %v7264_v63 = vsub.f32 %v9866_v43, %v7260_v47  ;;  %v7267_v53 = vsub.f32 %v9868_v56, %v7260_v47  ;;  %v7270_v2 = vsub.f32 %v9870_v19, %v7260_v47 }
 0x888   :  { %v7262_v33 = vmul.f32 1.442695, %v7261_v61  ;;  %v7265_v3 = vmul.f32 1.442695, %v7264_v63  ;;  %v7268_v36 = vmul.f32 1.442695, %v7267_v53 }
 0x889   :  { %v7271_v0 = vmul.f32 1.442695, %v7270_v2 }
 0x88a   :  { %9871 = vpow2.f32 %v7262_v33 }
 0x88b   :  { %9873 = vpow2.f32 %v7265_v3 }
 0x88c   :  { %9875 = vpow2.f32 %v7268_v36 }
 0x88d   :  { %9877 = vpow2.f32 %v7271_v0 }
 0x894   :  { %v9872_v17 = vpop.eup %9871 }
 0x895   :  { %v9874_v54 = vpop.eup %9873  ;;  %v7276_v41 = vmul.f32 %v9872_v17, %v10412_v60 }
 0x896   :  { %v9876_v7 = vpop.eup %9875  ;;  %v7273_v49 = vadd.f32 %v9874_v54, %v9872_v17  ;;  %v7277_v28 = vmul.f32 %v9874_v54, %v10439_v30  ;;  %v7309_v30 = vadd.f32 %v8408_v12, %v8407_v13 }
 0x897   :  { %v9878_v55 = vpop.eup %9877  ;;  %v7279_v35 = vmul.f32 %v9876_v7, %v10621_v52 }
 0x898   :  { %v7274_v9 = vadd.f32 %v9876_v7, %v7273_v49  ;;  %v7278_v11 = vadd.f32 %v7277_v28, %v7276_v41  ;;  %v7281_v60 = vmul.f32 %v9878_v55, %v11519_v31  ;;  %v7310_v8 = vadd.f32 %v8409_v50, %v7309_v30  ;;  %v8411_v31 = vld [vmem:[%s11660_s5] ss:$0 sm:$0xff] }
 0x89a   :  { %v7275_v46 = vadd.f32 %v9878_v55, %v7274_v9  ;;  %v7280_v5 = vadd.f32 %v7279_v35, %v7278_v11  ;;  %v7311_v15 = vadd.f32 %v8410_v22, %v7310_v8 }
 0x89c   :  { %9879 = vrcp.f32 %v7275_v46  ;;  %v7282_v14 = vadd.f32 %v7281_v60, %v7280_v5  ;;  %v7313_v52 = vadd.f32 1.0, %v7311_v15  ;;  %vm7312_vm1 = vcmp.gt.f32.partialorder %v7311_v15, 0.0 }
 0x89e   :  { %v7314_v18 = vsel %vm7312_vm1, %v7313_v52, 1.0 }
 0x8a6   :  { %v9880_v16 = vpop.eup %9879 }
 0x8a7   :  { %v7284_v23 = vmul.f32 %v9880_v16, %v7282_v14 }
 0x8a9   :  { %v7315_v32 = vmul.f32 %v7314_v18, %v7284_v23 }
 0x8ab   :  { %8643 = vmatmul.mubr.msk.f32.vlgmr.msra.gmra.mrb[56].mxu0 %vm6941_vm5, %v7315_v32  ;;  %7316 = vst.msk [vmem:[#allocation9] sm:$0xff] %vm6941_vm5, %v7315_v32  ;;  %8654 = vmatmul.mubr.msk.f32.vlgmr.msra.gmra.mrb[36].mxu1 %vm6941_vm5, %v7315_v32 }
 0x97e   :  { %v7397_v34 = vpop.f32.mrb[56].mxu0  ;;  %v11551_v24 = vpop.f32.mrb[36].mxu1 }
 0x97f   :  { %v7398_v40 = vadd.f32 %v8411_v31, %v7397_v34  ;;  %v8644_v43 = vpop.f32.mrb[57].mxu0  ;;  %v8655_v59 = vpop.f32.mrb[37].mxu1 }
 0x981   :  { %v7402_v44 = vsel %vm7401_vm2, %v7398_v40, -inf }
 0x982   :  { %7403 = vmax.xlane.f32.xlu0 %v7402_v44 }
 0xa0f   :  { %v11553_v10 = vpop.xlane.xlu0 %7403 }
 0xa10   :  { %v7405_v20 = vsub.f32 %v7398_v40, %v11553_v10 }
 0xa12   :  { %v7406_v38 = vmul.f32 1.442695, %v7405_v20 }
 0xa14   :  { %9881 = vpow2.f32 %v7406_v38 }
 0xa1e   :  { %v9882_v37 = vpop.eup %9881 }
 0xa1f   :  { %v7408_v51 = vsel %vm7401_vm2, %v9882_v37, 0.0 }
 0xa20   :  { %7409 = vadd.xlane.f32.xlu1 %v7408_v51 }
 0xa21   :  { %9896 = shalt.err (!%p9893_p4)
}
 0xa22   :  { %s11661_s3 = sld [smem:[#allocation47_spill]] }
 0xa28   :  { %s9897_s8 = scalar_lea.hbm %s11661_s3, 128 }
 0xa29   :  { %p9898_p5 = scmp.ne.s32.totalorder %s11661_s3, %s9897_s8  ;;  %p9901_p6 = scmp.lt.u32.totalorder %s9897_s8, %s11661_s3 }
 0xa2b   :  { %p9903_p7 = pnand %p9901_p6, %p9898_p5 }
 0xa2d   :  { %9906 = shalt.err (!%p9903_p7)
}
 0xa2e   :  { %7525 = dma.vmem_to_hbm [thread:$0]  %s7523_s13, 128, %s11661_s3, [#allocation5]  }
 0xa2f   :  { %s9907_s14 = scalar_lea.vmem %s7543_s25, 128  ;;  %p9912_p9 = scmp.lt.s32.totalorder %s7543_s25, %s7543_s25 }
 0xa30   :  { %p9908_p8 = scmp.ne.s32.totalorder %s7543_s25, %s9907_s14  ;;  %p9913_p10 = scmp.lt.s32.totalorder %s9907_s14, %s9907_s14 }
 0xa32   :  { %p9914_p11 = por %p9913_p10, %p9912_p9 }
 0xa34   :  { %p9915_p12 = pnand %p9914_p11, %p9908_p8 }
 0xa36   :  { %9918 = shalt.err (!%p9915_p12)
}
 0xa37   :  { %s9919_s19 = scalar_lea.hbm %s10327_s20, 128 }
 0xa38   :  { %p9920_p13 = scmp.ne.s32.totalorder %s10327_s20, %s9919_s19  ;;  %p9923_p0 = scmp.lt.u32.totalorder %s9919_s19, %s10327_s20 }
 0xa3a   :  { %p9925_p1 = pnand %p9923_p0, %p9920_p13 }
 0xa3c   :  { %9928 = shalt.err (!%p9925_p1)
}
 0xa3d   :  { %7545 = dma.vmem_to_hbm [thread:$0]  %s7543_s25, 128, %s10327_s20, [#allocation8]  }
 0xa3e   :  { %s10080_s24 = smov [#allocation2]   ;;  %s10081_s6 = smov [#allocation6]  }
 0xa3f   :  { %s7512_s30 = sshll.u32 %s10080_s24, 4  ;;  %s7532_s27 = sshll.u32 %s10081_s6, 4  ;;  %s7513_s30 = int_to_ptr.vmem [resolvable:$true] %s7512_s30  ;;  %s7533_s27 = int_to_ptr.vmem [resolvable:$true] %s7532_s27 }
 0xa40   :  { %s9929_s7 = scalar_lea.vmem %s7513_s30, 128  ;;  %p9934_p3 = scmp.lt.s32.totalorder %s7513_s30, %s7513_s30 }
 0xa41   :  { %p9930_p2 = scmp.ne.s32.totalorder %s7513_s30, %s9929_s7  ;;  %p9935_p4 = scmp.lt.s32.totalorder %s9929_s7, %s9929_s7 }
 0xa43   :  { %p9936_p5 = por %p9935_p4, %p9934_p3 }
 0xa45   :  { %p9937_p6 = pnand %p9936_p5, %p9930_p2 }
 0xa47   :  { %9940 = shalt.err (!%p9937_p6)
}
 0xa48   :  { %s11662_s10 = sld [smem:[#allocation46_spill]] }
 0xa4e   :  { %s9941_s11 = scalar_lea.hbm %s11662_s10, 128 }
 0xa4f   :  { %p9942_p7 = scmp.ne.s32.totalorder %s11662_s10, %s9941_s11  ;;  %p9945_p8 = scmp.lt.u32.totalorder %s9941_s11, %s11662_s10 }
 0xa51   :  { %p9947_p9 = pnand %p9945_p8, %p9942_p7 }
 0xa53   :  { %9950 = shalt.err (!%p9947_p9)
}
 0xa54   :  { %7515 = dma.vmem_to_hbm [thread:$0]  %s7513_s30, 128, %s11662_s10, [#allocation3]  }
 0xa55   :  { %s9951_s20 = scalar_lea.vmem %s7533_s27, 128  ;;  %p9956_p11 = scmp.lt.s32.totalorder %s7533_s27, %s7533_s27 }
 0xa56   :  { %p9952_p10 = scmp.ne.s32.totalorder %s7533_s27, %s9951_s20  ;;  %p9957_p12 = scmp.lt.s32.totalorder %s9951_s20, %s9951_s20 }
 0xa58   :  { %p9958_p13 = por %p9957_p12, %p9956_p11 }
 0xa5a   :  { %p9959_p0 = pnand %p9958_p13, %p9952_p10 }
 0xa5c   :  { %9962 = shalt.err (!%p9959_p0)
}
 0xa5d   :  { %s9963_s15 = scalar_lea.hbm %s10322_s17, 128 }
 0xa5e   :  { %p9964_p1 = scmp.ne.s32.totalorder %s10322_s17, %s9963_s15  ;;  %p9967_p2 = scmp.lt.u32.totalorder %s9963_s15, %s10322_s17 }
 0xa60   :  { %p9969_p3 = pnand %p9967_p2, %p9964_p1 }
 0xa62   :  { %9972 = shalt.err (!%p9969_p3)
}
 0xa63   :  { %7535 = dma.vmem_to_hbm [thread:$0]  %s7533_s27, 128, %s10322_s17, [#allocation5]  }
 0xa64   :  { %s10082_s16 = smov [#allocation9]  }
 0xa65   :  { %s7552_s18 = sshll.u32 %s10082_s16, 4  ;;  %s7553_s18 = int_to_ptr.vmem [resolvable:$true] %s7552_s18 }
 0xa66   :  { %s9973_s22 = scalar_lea.vmem %s7553_s18, 128  ;;  %p9978_p5 = scmp.lt.s32.totalorder %s7553_s18, %s7553_s18 }
 0xa67   :  { %p9974_p4 = scmp.ne.s32.totalorder %s7553_s18, %s9973_s22  ;;  %p9979_p6 = scmp.lt.s32.totalorder %s9973_s22, %s9973_s22 }
 0xa69   :  { %p9980_p7 = por %p9979_p6, %p9978_p5 }
 0xa6b   :  { %p9981_p8 = pnand %p9980_p7, %p9974_p4 }
 0xa6d   :  { %9984 = shalt.err (!%p9981_p8)
}
 0xa6e   :  { %s9985_s23 = scalar_lea.hbm %s10332_s12, 128 }
 0xa6f   :  { %p9986_p9 = scmp.ne.s32.totalorder %s10332_s12, %s9985_s23  ;;  %p9989_p10 = scmp.lt.u32.totalorder %s9985_s23, %s10332_s12 }
 0xa71   :  { %p9991_p11 = pnand %p9989_p10, %p9986_p9 }
 0xa73   :  { %9994 = shalt.err (!%p9991_p11)
}
 0xa74   :  { %s11663_s17 = sld [smem:[#allocation45_spill]]  ;;  %v7496_v21 = vand.u32 127, %v390_v58  ;;  %s10083_s26 = smov [#allocation10]   ;;  %vm7504_vm6 = vcmask 64512  }
 0xa75   :  { %7555 = dma.vmem_to_hbm [thread:$0]  %s7553_s18, 128, %s10332_s12, [#allocation8]  }
 0xa76   :  { %vm7497_vm3 = vcmp.ge.s32.totalorder %v7496_v21, 1  ;;  %vm7498_vm4 = vcmp.le.s32.totalorder %v7496_v21, 2  ;;  %s7562_s28 = sshll.u32 %s10083_s26, 4  ;;  %s7563_s28 = int_to_ptr.vmem [resolvable:$true] %s7562_s28 }
 0xa77   :  { %vm7499_vm5 = vmand %vm7497_vm3, %vm7498_vm4  ;;  %s9995_s12 = scalar_lea.vmem %s7563_s28, 128  ;;  %p10000_p13 = scmp.lt.s32.totalorder %s7563_s28, %s7563_s28 }
 0xa78   :  { %v8415_v29 = vsel %vm7499_vm5, 1.0, %v10074_v1  ;;  %p9996_p12 = scmp.ne.s32.totalorder %s7563_s28, %s9995_s12  ;;  %p10001_p0 = scmp.lt.s32.totalorder %s9995_s12, %s9995_s12 }
 0xa7a   :  { %v8413_v27 = vld [vmem:[%s11663_s17] ss:$0 sm:$0xff]  ;;  %p10002_p1 = por %p10001_p0, %p10000_p13 }
 0xa7b   :  { %v7492_v26 = vadd.f32 %v8413_v27, %v11551_v24 }
 0xa7c   :  { %p10003_p2 = pnand %p10002_p1, %p9996_p12 }
 0xaad   :  { %v7410_v62 = vpop.xlane.xlu1 %7409 }
 0xaae   :  { %9883 = vlog2.f32 %v7410_v62 }
 0xab8   :  { %v9884_v42 = vpop.eup %9883 }
 0xab9   :  { %v7412_v45 = vmul.f32 0.6931472, %v9884_v42 }
 0xabb   :  { %v7413_v48 = vadd.f32 %v7412_v45, %v11553_v10 }
 0xabd   :  { %v7502_v56 = vmul.f32 %v8415_v29, %v7413_v48 }
 0xabf   :  { %v7503_v19 = vsub.f32 %v7492_v26, %v7502_v56 }
 0xac1   :  { %7505 = vst.msk [vmem:[#allocation10] sm:$0xff] %vm7504_vm6, %v7503_v19 }
 0xac2   :  { %10006 = shalt.err (!%p10003_p2)
}
 0xac3   :  { %s10007_s1 = scalar_lea.hbm %s10337_s4, 128 }
 0xac4   :  { %p10008_p3 = scmp.ne.s32.totalorder %s10337_s4, %s10007_s1  ;;  %p10011_p4 = scmp.lt.u32.totalorder %s10007_s1, %s10337_s4 }
 0xac6   :  { %p10013_p5 = pnand %p10011_p4, %p10008_p3 }
 0xac8   :  { %10016 = shalt.err (!%p10013_p5)
}
 0xac9   :  { %7565 = dma.vmem_to_hbm [thread:$0]  %s7563_s28, 128, %s10337_s4, [#allocation11]  }
 0xaca   :  { %10017 = dma.done.wait [#allocation3], 128  }
 0xacb   :  { %10018 = vsyncadd [#allocation3], 4294967168 }
 0xacc   :  { %10019 = dma.done.wait [#allocation5], 256  }
 0xacd   :  { %10020 = vsyncadd [#allocation5], 4294967040 }
 0xace   :  { %10021 = dma.done.wait [#allocation8], 256  }
 0xacf   :  { %10022 = vsyncadd [#allocation8], 4294967040 }
 0xad0   :  { %10023 = dma.done.wait [#allocation11], 128  }
 0xad1   :  { %10024 = vsyncadd [#allocation11], 4294967168 }
 0xad2   :  { %7584 = vsyncpa [#allocation3], 1 }
 0xad3   :  { %7585 = vsyncpa [#allocation5], 1 }
 0xad4   :  { %7586 = vsyncpa [#allocation8], 1 }
 0xad5   :  { %7587 = vsyncpa [#allocation11], 1 }

</bundles_post_ra>
